<compile_context>
chip_gen: v6e
topology: v6e:2x2x1
jax: 0.10.0
libtpu: 0.0.40
codegen_flags: <defaults>
</compile_context>

<pallas_src>
import jax
import jax.numpy as jnp
from jax import lax
from jax.experimental import pallas as pl
from jax.experimental.pallas import tpu as pltpu

EPS = 1e-5
LANES = 128
VMEM_LIMIT = 48 * 1024 * 1024   # > 16/32 MiB scoped defaults, < v7x 64 MiB physical


def _round_up(x, m):
    return (x + m - 1) // m * m


def _pick_tile_m(m, cap=1024):
    """Largest multiple-of-8 divisor of m that is <= min(cap, m//2); fallback m."""
    best = None
    t = 8
    limit = min(cap, m // 2)
    while t <= limit:
        if m % t == 0:
            best = t
        t += 8
    return best if best is not None else m


# ------------------------------------------------------------------ kernels --

def _stats_kernel(x_ref, sum_ref, sq_ref):
    """Phase-1 BatchNorm reduction: per-channel sum / sum-of-squares accumulated
    across M tiles ('arbitrary' grid axis, resident (1, Cp) outputs)."""
    @pl.when(pl.program_id(0) == 0)
    def _init():
        sum_ref[...] = jnp.zeros_like(sum_ref)
        sq_ref[...] = jnp.zeros_like(sq_ref)

    x = x_ref[...]                                    # (TILE_M, Cp) f32
    sum_ref[...] += jnp.sum(x, axis=0, keepdims=True)
    sq_ref[...] += jnp.sum(x * x, axis=0, keepdims=True)


def _shifted_conv3x3(act_bf16, w_ref, h, wp):
    """3x3 conv as 9 shifted-window MXU dots on a flattened padded slab.

    act_bf16: ((h+3)*wp, Cp) normalized+ReLU'd activation (spatially padded).
    Output row j = y*wp + x holds the conv result at pixel (y, x); wrap-around
    columns x in {wp-2, wp-1} are garbage and sliced off by the wrapper.
    """
    l = h * wp
    acc = jnp.zeros((l, act_bf16.shape[-1]), jnp.float32)
    for k in range(9):
        dh, dw = divmod(k, 3)
        off = dh * wp + dw
        acc += jnp.dot(act_bf16[off:off + l, :], w_ref[k],
                       preferred_element_type=jnp.float32)
    return acc


def _make_conv1_kernel(h, wp):
    def bn_relu_conv_kernel(xpad_ref, w_ref, scale_ref, shift_ref, o_ref):
        # Fused: folded-BN normalize -> ReLU -> 3x3 conv, one image per grid step.
        x = xpad_ref[0]                                             # f32
        act = jnp.maximum(x * scale_ref[...] + shift_ref[...], 0.0)  # f32 elementwise
        o_ref[0] = _shifted_conv3x3(act.astype(jnp.bfloat16), w_ref, h, wp)
    return bn_relu_conv_kernel


def _make_conv2_kernel(h, wp):
    def bn_relu_conv_add_kernel(ypad_ref, w_ref, scale_ref, shift_ref,
                                xpad_ref, o_ref):
        # Fused: normalize -> ReLU -> 3x3 conv -> + identity shortcut.
        l = h * wp
        y = ypad_ref[0]
        act = jnp.maximum(y * scale_ref[...] + shift_ref[...], 0.0)
        acc = _shifted_conv3x3(act.astype(jnp.bfloat16), w_ref, h, wp)
        res = xpad_ref[0, pl.ds(wp + 1, l), :]   # interior of padded x == shortcut
        o_ref[0] = acc + res
    return bn_relu_conv_add_kernel


# ------------------------------------------------------------------ wrappers --

def _channel_stats(x_flat, cp):
    m = x_flat.shape[0]
    tm = _pick_tile_m(m)
    return pl.pallas_call(
        _stats_kernel,
        grid=(m // tm,),
        in_specs=[pl.BlockSpec((tm, cp), lambda i: (i, 0))],
        out_specs=(pl.BlockSpec((1, cp), lambda i: (0, 0)),
                   pl.BlockSpec((1, cp), lambda i: (0, 0))),
        out_shape=(jax.ShapeDtypeStruct((1, cp), jnp.float32),
                   jax.ShapeDtypeStruct((1, cp), jnp.float32)),
        compiler_params=pltpu.CompilerParams(
            dimension_semantics=("arbitrary",),
            vmem_limit_bytes=VMEM_LIMIT),
    )(x_flat)


def _fold_bn(s, q, gamma, beta, count):
    """Fold batch stats + affine into y = scale*x + shift, and the per-channel
    halo fill value p with relu(scale*p + shift) == 0 (reproduces zero padding)."""
    mean = s[0] / count
    var = jnp.maximum(q[0] / count - mean * mean, 0.0)   # biased variance
    inv_std = lax.rsqrt(var + EPS)
    scale = gamma * inv_std
    shift = beta - mean * scale
    pad = jnp.where(jnp.abs(scale) > 1e-30, -shift / scale, 0.0)
    return scale.reshape(1, -1), shift.reshape(1, -1), pad


def _spatial_pad_flat(x_nhwc, pad_vals):
    """(N,H,W,Cp) -> (N,(H+3)*(W+2),Cp): 1-px halo filled with pad_vals; two extra
    bottom rows keep the in-kernel shifted slices in bounds for wrap columns."""
    n, h, w, cp = x_nhwc.shape
    full = jnp.broadcast_to(pad_vals.reshape(1, 1, 1, cp), (n, h + 3, w + 2, cp))
    full = full.at[:, 1:h + 1, 1:w + 1, :].set(x_nhwc)
    return full.reshape(n, (h + 3) * (w + 2), cp)


def _conv_call(kernel, inputs, n, hp_wp, l, cp, with_residual):
    slab_spec = pl.BlockSpec((1, hp_wp, cp), lambda i: (i, 0, 0))
    in_specs = [slab_spec,
                pl.BlockSpec((9, cp, cp), lambda i: (0, 0, 0)),   # weights resident
                pl.BlockSpec((1, cp), lambda i: (0, 0)),          # scale resident
                pl.BlockSpec((1, cp), lambda i: (0, 0))]          # shift resident
    if with_residual:
        in_specs.append(slab_spec)
    return pl.pallas_call(
        kernel,
        grid=(n,),
        in_specs=in_specs,
        out_specs=pl.BlockSpec((1, l, cp), lambda i: (i, 0, 0)),
        out_shape=jax.ShapeDtypeStruct((n, l, cp), jnp.float32),
        compiler_params=pltpu.CompilerParams(
            dimension_semantics=("parallel",),     # megacore-shard images on v7x
            vmem_limit_bytes=VMEM_LIMIT),
    )(*inputs)


def preact_block_forward(x_nchw, params):
    """PreActBlock.forward (stride=1, in_planes==planes, affine BN, no conv bias)."""
    g1, b1, w1, g2, b2, w2 = params
    n, c, h, w = x_nchw.shape
    planes = w1.shape[0]
    assert c == planes, "identity-shortcut configuration requires in_planes == planes"

    cp = _round_up(max(c, LANES), LANES)            # lane-dense channel padding
    wp = w + 2
    hp_wp = (h + 3) * wp
    l = h * wp
    m = n * h * w

    x_nhwc = jnp.transpose(x_nchw, (0, 2, 3, 1)).astype(jnp.float32)
    x_nhwc = jnp.pad(x_nhwc, ((0, 0), (0, 0), (0, 0), (0, cp - c)))

    def vpad(v):
        return jnp.pad(v.astype(jnp.float32), (0, cp - v.shape[0]))

    def wmat(wt):                                    # OIHW -> (9, Cp_in, Cp_out) bf16
        co, ci = wt.shape[0], wt.shape[1]
        wk = jnp.transpose(wt.astype(jnp.float32), (2, 3, 1, 0)).reshape(9, ci, co)
        wk = jnp.pad(wk, ((0, 0), (0, cp - ci), (0, cp - co)))
        return wk.astype(jnp.bfloat16)

    g1p, b1p, g2p, b2p = vpad(g1), vpad(b1), vpad(g2), vpad(b2)
    w1m, w2m = wmat(w1), wmat(w2)

    # bn1 batch stats (tiled two-phase reduction) -> folded scale/shift
    s1, q1 = _channel_stats(x_nhwc.reshape(m, cp), cp)
    scale1, shift1, pad1 = _fold_bn(s1, q1, g1p, b1p, m)

    # conv1(relu(bn1(x))), fused, per image
    xpad = _spatial_pad_flat(x_nhwc, pad1)
    y1 = _conv_call(_make_conv1_kernel(h, wp), [xpad, w1m, scale1, shift1],
                    n, hp_wp, l, cp, with_residual=False)
    y1_valid = y1.reshape(n, h, wp, cp)[:, :, :w, :]   # drop wrap-around columns

    # bn2 batch stats on the conv1 output
    s2, q2 = _channel_stats(y1_valid.reshape(m, cp), cp)
    scale2, shift2, pad2 = _fold_bn(s2, q2, g2p, b2p, m)

    # conv2(relu(bn2(y1))) + identity shortcut, fused, per image
    ypad = _spatial_pad_flat(y1_valid, pad2)
    out = _conv_call(_make_conv2_kernel(h, wp), [ypad, w2m, scale2, shift2, xpad],
                     n, hp_wp, l, cp, with_residual=True)

    out = out.reshape(n, h, wp, cp)[:, :, :w, :c]
    return jnp.transpose(out, (0, 3, 1, 2))            # back to NCHW
    # TODO(synk): relu_with_stats also appends preact.abs().mean().item() to a
    # host-side python list (self.avg_preacts); that side effect has no place in
    # the returned tensor.


# ---------------------------------------------------------------- reference --

def _ref_forward(x, params):
    g1, b1, w1, g2, b2, w2 = params

    def bn(t, g, b):
        mean = t.mean(axis=(0, 2, 3), keepdims=True)
        var = ((t - mean) ** 2).mean(axis=(0, 2, 3), keepdims=True)
        return ((t - mean) / jnp.sqrt(var + EPS)) * g.reshape(1, -1, 1, 1) + b.reshape(1, -1, 1, 1)

    def conv(t, wt):
        return lax.conv_general_dilated(t, wt, (1, 1), ((1, 1), (1, 1)),
                                        dimension_numbers=("NCHW", "OIHW", "NCHW"))

    out = jax.nn.relu(bn(x, g1, b1))
    shortcut = x
    out = conv(out, w1)
    out = conv(jax.nn.relu(bn(out, g2, b2)), w2)
    return out + shortcut


# --------------------------------------------------------------------- main --

if __name__ == "__main__":
    key = jax.random.PRNGKey(0)
    kx, k1, k2, k3, k4, k5, k6 = jax.random.split(key, 7)

    N, in_planes, planes, H, W = 2, 4, 4, 16, 16
    x = jax.random.normal(kx, (N, in_planes, H, W), dtype=jnp.float32)

    # Deterministic synthetic parameters (shapes from PreActBlock.__init__):
    g1 = 1.0 + 0.1 * jax.random.normal(k1, (in_planes,), dtype=jnp.float32)        # bn1.weight
    b1 = 0.1 * jax.random.normal(k2, (in_planes,), dtype=jnp.float32)              # bn1.bias
    w1 = 0.1 * jax.random.normal(k3, (planes, in_planes, 3, 3), dtype=jnp.float32)  # conv1
    g2 = 1.0 + 0.1 * jax.random.normal(k4, (planes,), dtype=jnp.float32)            # bn2.weight
    b2 = 0.1 * jax.random.normal(k5, (planes,), dtype=jnp.float32)                  # bn2.bias
    w2 = 0.1 * jax.random.normal(k6, (planes, planes, 3, 3), dtype=jnp.float32)     # conv2
    params = (g1, b1, w1, g2, b2, w2)

    fwd = jax.jit(preact_block_forward)
    out = jax.block_until_ready(fwd(x, params))
    ref = jax.block_until_ready(_ref_forward(x, params))

    assert out.shape == (N, planes, H, W), out.shape
    # bf16 MXU operands (f32 accumulation/stats) => slightly looser tolerance.
    assert jnp.allclose(out, ref, atol=2e-2, rtol=2e-2), float(jnp.max(jnp.abs(out - ref)))
    print("KERNEL_OK")
</pallas_src>

<mosaic_0001>
module attributes {stable_mosaic.version = 11 : i64} {
  func.func @_stats_kernel(%arg0: i32, %arg1: memref<256x128xf32, #tpu.memory_space<vmem>>, %arg2: memref<1x128xf32, #tpu.memory_space<vmem>>, %arg3: memref<1x128xf32, #tpu.memory_space<vmem>>) attributes {dimension_semantics = [#tpu.dimension_semantics<arbitrary>], iteration_bounds = array<i64: 2>, scalar_prefetch = 0 : i64, scratch_operands = 0 : i64, tpu.core_type = #tpu.core_type<tc>, window_params = [{transform_indices = @transform_0, window_bounds = array<i64: 256, 128>}, {pipeline_mode = #tpu.pipeline_mode<synchronous>, transform_indices = @transform_1, window_bounds = array<i64: 1, 128>}, {pipeline_mode = #tpu.pipeline_mode<synchronous>, transform_indices = @transform_2, window_bounds = array<i64: 1, 128>}]} {
    %c0_i32 = arith.constant 0 : i32
    %0 = arith.cmpi eq, %arg0, %c0_i32 : i32
    %1 = arith.extui %0 : i1 to i32
    %c0_i32_0 = arith.constant 0 : i32
    %2 = arith.cmpi ne, %1, %c0_i32_0 : i32
    scf.if %2 {
      %cst_11 = arith.constant 0.000000e+00 : f32
      %15 = vector.broadcast %cst_11 : f32 to vector<1x128xf32>
      %c0_12 = arith.constant 0 : index
      %c0_13 = arith.constant 0 : index
      %16 = vector.load %arg2[%c0_12, %c0_13] : memref<1x128xf32, #tpu.memory_space<vmem>>, vector<1x128xf32>
      tpu.vector_store %arg2[%c0_12, %c0_13], %15 {strides = array<i32>} : memref<1x128xf32, #tpu.memory_space<vmem>>, vector<1x128xf32>,
      %cst_14 = arith.constant 0.000000e+00 : f32
      %17 = vector.broadcast %cst_14 : f32 to vector<1x128xf32>
      %c0_15 = arith.constant 0 : index
      %c0_16 = arith.constant 0 : index
      %18 = vector.load %arg3[%c0_15, %c0_16] : memref<1x128xf32, #tpu.memory_space<vmem>>, vector<1x128xf32>
      tpu.vector_store %arg3[%c0_15, %c0_16], %17 {strides = array<i32>} : memref<1x128xf32, #tpu.memory_space<vmem>>, vector<1x128xf32>,
    } else {
    }
    %c0 = arith.constant 0 : index
    %c0_1 = arith.constant 0 : index
    %3 = vector.load %arg1[%c0, %c0_1] : memref<256x128xf32, #tpu.memory_space<vmem>>, vector<256x128xf32>
    %c0_2 = arith.constant 0 : index
    %c0_3 = arith.constant 0 : index
    %4 = vector.load %arg2[%c0_2, %c0_3] : memref<1x128xf32, #tpu.memory_space<vmem>>, vector<1x128xf32>
    %cst = arith.constant dense<0.000000e+00> : vector<128xf32>
    %5 = vector.multi_reduction <add>, %3, %cst [0] : vector<256x128xf32> to vector<128xf32>
    %6 = vector.shape_cast %5 : vector<128xf32> to vector<1x128xf32>
    %7 = arith.addf %4, %6 : vector<1x128xf32>
    %c0_4 = arith.constant 0 : index
    %c0_5 = arith.constant 0 : index
    %8 = vector.load %arg2[%c0_4, %c0_5] : memref<1x128xf32, #tpu.memory_space<vmem>>, vector<1x128xf32>
    tpu.vector_store %arg2[%c0_4, %c0_5], %7 {strides = array<i32>} : memref<1x128xf32, #tpu.memory_space<vmem>>, vector<1x128xf32>,
    %c0_6 = arith.constant 0 : index
    %c0_7 = arith.constant 0 : index
    %9 = vector.load %arg3[%c0_6, %c0_7] : memref<1x128xf32, #tpu.memory_space<vmem>>, vector<1x128xf32>
    %10 = arith.mulf %3, %3 : vector<256x128xf32>
    %cst_8 = arith.constant dense<0.000000e+00> : vector<128xf32>
    %11 = vector.multi_reduction <add>, %10, %cst_8 [0] : vector<256x128xf32> to vector<128xf32>
    %12 = vector.shape_cast %11 : vector<128xf32> to vector<1x128xf32>
    %13 = arith.addf %9, %12 : vector<1x128xf32>
    %c0_9 = arith.constant 0 : index
    %c0_10 = arith.constant 0 : index
    %14 = vector.load %arg3[%c0_9, %c0_10] : memref<1x128xf32, #tpu.memory_space<vmem>>, vector<1x128xf32>
    tpu.vector_store %arg3[%c0_9, %c0_10], %13 {strides = array<i32>} : memref<1x128xf32, #tpu.memory_space<vmem>>, vector<1x128xf32>,
    return
  }
  func.func @transform_0(%arg0: i32) -> (i32, i32) {
    %c0_i32 = arith.constant 0 : i32
    %c0_i32_0 = arith.constant 0 : i32
    return %arg0, %c0_i32 : i32, i32
  }
  func.func @transform_1(%arg0: i32) -> (i32, i32) {
    %c0_i32 = arith.constant 0 : i32
    %c0_i32_0 = arith.constant 0 : i32
    %c0_i32_1 = arith.constant 0 : i32
    return %c0_i32, %c0_i32_0 : i32, i32
  }
  func.func @transform_2(%arg0: i32) -> (i32, i32) {
    %c0_i32 = arith.constant 0 : i32
    %c0_i32_0 = arith.constant 0 : i32
    %c0_i32_1 = arith.constant 0 : i32
    return %c0_i32, %c0_i32_0 : i32, i32
  }
}

module attributes {stable_mosaic.version = 11 : i64} {
  func.func @bn_relu_conv_kernel(%arg0: i32, %arg1: memref<1x342x128xf32, #tpu.memory_space<vmem>>, %arg2: memref<9x128x128xbf16, #tpu.memory_space<vmem>>, %arg3: memref<1x128xf32, #tpu.memory_space<vmem>>, %arg4: memref<1x128xf32, #tpu.memory_space<vmem>>, %arg5: memref<1x288x128xf32, #tpu.memory_space<vmem>>) attributes {dimension_semantics = [#tpu.dimension_semantics<parallel>], iteration_bounds = array<i64: 2>, scalar_prefetch = 0 : i64, scratch_operands = 0 : i64, tpu.core_type = #tpu.core_type<tc>, window_params = [{transform_indices = @transform_0, window_bounds = array<i64: 1, 342, 128>}, {pipeline_mode = #tpu.pipeline_mode<synchronous>, transform_indices = @transform_1, window_bounds = array<i64: 9, 128, 128>}, {pipeline_mode = #tpu.pipeline_mode<synchronous>, transform_indices = @transform_2, window_bounds = array<i64: 1, 128>}, {pipeline_mode = #tpu.pipeline_mode<synchronous>, transform_indices = @transform_3, window_bounds = array<i64: 1, 128>}, {transform_indices = @transform_4, window_bounds = array<i64: 1, 288, 128>}]} {
    %c0 = arith.constant 0 : index
    %c0_0 = arith.constant 0 : index
    %c0_1 = arith.constant 0 : index
    %0 = vector.load %arg1[%c0, %c0_0, %c0_1] : memref<1x342x128xf32, #tpu.memory_space<vmem>>, vector<1x342x128xf32>
    %1 = vector.shape_cast %0 : vector<1x342x128xf32> to vector<342x128xf32>
    %c0_2 = arith.constant 0 : index
    %c0_3 = arith.constant 0 : index
    %2 = vector.load %arg3[%c0_2, %c0_3] : memref<1x128xf32, #tpu.memory_space<vmem>>, vector<1x128xf32>
    %3 = vector.broadcast %2 : vector<1x128xf32> to vector<342x128xf32>
    %4 = arith.mulf %1, %3 : vector<342x128xf32>
    %c0_4 = arith.constant 0 : index
    %c0_5 = arith.constant 0 : index
    %5 = vector.load %arg4[%c0_4, %c0_5] : memref<1x128xf32, #tpu.memory_space<vmem>>, vector<1x128xf32>
    %6 = vector.broadcast %5 : vector<1x128xf32> to vector<342x128xf32>
    %7 = arith.addf %4, %6 : vector<342x128xf32>
    %cst = arith.constant 0.000000e+00 : f32
    %8 = vector.broadcast %cst : f32 to vector<342x128xf32>
    %9 = arith.maximumf %7, %8 : vector<342x128xf32>
    %10 = arith.truncf %9 : vector<342x128xf32> to vector<342x128xbf16>
    %cst_6 = arith.constant 0.000000e+00 : f32
    %11 = vector.broadcast %cst_6 : f32 to vector<288x128xf32>
    %12 = vector.extract_strided_slice %10 {offsets = [0, 0], sizes = [288, 128], strides = [1, 1]} : vector<342x128xbf16> to vector<288x128xbf16>
    %c0_7 = arith.constant 0 : index
    %c0_8 = arith.constant 0 : index
    %c0_9 = arith.constant 0 : index
    %13 = vector.load %arg2[%c0_7, %c0_8, %c0_9] : memref<9x128x128xbf16, #tpu.memory_space<vmem>>, vector<1x128x128xbf16>
    %14 = vector.shape_cast %13 : vector<1x128x128xbf16> to vector<128x128xbf16>
    %cst_10 = arith.constant dense<0.000000e+00> : vector<288x128xf32>
    %15 = tpu.matmul %12, %14, %cst_10 {dimension_numbers = #tpu.dot_dimension_numbers<[1], [0], [0], [1], [0, 0, 1, 1], [], []>} : vector<288x128xbf16>, vector<128x128xbf16>, vector<288x128xf32> -> vector<288x128xf32>
    %16 = arith.addf %11, %15 : vector<288x128xf32>
    %17 = vector.extract_strided_slice %10 {offsets = [1, 0], sizes = [288, 128], strides = [1, 1]} : vector<342x128xbf16> to vector<288x128xbf16>
    %c1 = arith.constant 1 : index
    %c0_11 = arith.constant 0 : index
    %c0_12 = arith.constant 0 : index
    %18 = vector.load %arg2[%c1, %c0_11, %c0_12] : memref<9x128x128xbf16, #tpu.memory_space<vmem>>, vector<1x128x128xbf16>
    %19 = vector.shape_cast %18 : vector<1x128x128xbf16> to vector<128x128xbf16>
    %cst_13 = arith.constant dense<0.000000e+00> : vector<288x128xf32>
    %20 = tpu.matmul %17, %19, %cst_13 {dimension_numbers = #tpu.dot_dimension_numbers<[1], [0], [0], [1], [0, 0, 1, 1], [], []>} : vector<288x128xbf16>, vector<128x128xbf16>, vector<288x128xf32> -> vector<288x128xf32>
    %21 = arith.addf %16, %20 : vector<288x128xf32>
    %22 = vector.extract_strided_slice %10 {offsets = [2, 0], sizes = [288, 128], strides = [1, 1]} : vector<342x128xbf16> to vector<288x128xbf16>
    %c2 = arith.constant 2 : index
    %c0_14 = arith.constant 0 : index
    %c0_15 = arith.constant 0 : index
    %23 = vector.load %arg2[%c2, %c0_14, %c0_15] : memref<9x128x128xbf16, #tpu.memory_space<vmem>>, vector<1x128x128xbf16>
    %24 = vector.shape_cast %23 : vector<1x128x128xbf16> to vector<128x128xbf16>
    %cst_16 = arith.constant dense<0.000000e+00> : vector<288x128xf32>
    %25 = tpu.matmul %22, %24, %cst_16 {dimension_numbers = #tpu.dot_dimension_numbers<[1], [0], [0], [1], [0, 0, 1, 1], [], []>} : vector<288x128xbf16>, vector<128x128xbf16>, vector<288x128xf32> -> vector<288x128xf32>
    %26 = arith.addf %21, %25 : vector<288x128xf32>
    %27 = vector.extract_strided_slice %10 {offsets = [18, 0], sizes = [288, 128], strides = [1, 1]} : vector<342x128xbf16> to vector<288x128xbf16>
    %c3 = arith.constant 3 : index
    %c0_17 = arith.constant 0 : index
    %c0_18 = arith.constant 0 : index
    %28 = vector.load %arg2[%c3, %c0_17, %c0_18] : memref<9x128x128xbf16, #tpu.memory_space<vmem>>, vector<1x128x128xbf16>
    %29 = vector.shape_cast %28 : vector<1x128x128xbf16> to vector<128x128xbf16>
    %cst_19 = arith.constant dense<0.000000e+00> : vector<288x128xf32>
    %30 = tpu.matmul %27, %29, %cst_19 {dimension_numbers = #tpu.dot_dimension_numbers<[1], [0], [0], [1], [0, 0, 1, 1], [], []>} : vector<288x128xbf16>, vector<128x128xbf16>, vector<288x128xf32> -> vector<288x128xf32>
    %31 = arith.addf %26, %30 : vector<288x128xf32>
    %32 = vector.extract_strided_slice %10 {offsets = [19, 0], sizes = [288, 128], strides = [1, 1]} : vector<342x128xbf16> to vector<288x128xbf16>
    %c4 = arith.constant 4 : index
    %c0_20 = arith.constant 0 : index
    %c0_21 = arith.constant 0 : index
    %33 = vector.load %arg2[%c4, %c0_20, %c0_21] : memref<9x128x128xbf16, #tpu.memory_space<vmem>>, vector<1x128x128xbf16>
    %34 = vector.shape_cast %33 : vector<1x128x128xbf16> to vector<128x128xbf16>
    %cst_22 = arith.constant dense<0.000000e+00> : vector<288x128xf32>
    %35 = tpu.matmul %32, %34, %cst_22 {dimension_numbers = #tpu.dot_dimension_numbers<[1], [0], [0], [1], [0, 0, 1, 1], [], []>} : vector<288x128xbf16>, vector<128x128xbf16>, vector<288x128xf32> -> vector<288x128xf32>
    %36 = arith.addf %31, %35 : vector<288x128xf32>
    %37 = vector.extract_strided_slice %10 {offsets = [20, 0], sizes = [288, 128], strides = [1, 1]} : vector<342x128xbf16> to vector<288x128xbf16>
    %c5 = arith.constant 5 : index
    %c0_23 = arith.constant 0 : index
    %c0_24 = arith.constant 0 : index
    %38 = vector.load %arg2[%c5, %c0_23, %c0_24] : memref<9x128x128xbf16, #tpu.memory_space<vmem>>, vector<1x128x128xbf16>
    %39 = vector.shape_cast %38 : vector<1x128x128xbf16> to vector<128x128xbf16>
    %cst_25 = arith.constant dense<0.000000e+00> : vector<288x128xf32>
    %40 = tpu.matmul %37, %39, %cst_25 {dimension_numbers = #tpu.dot_dimension_numbers<[1], [0], [0], [1], [0, 0, 1, 1], [], []>} : vector<288x128xbf16>, vector<128x128xbf16>, vector<288x128xf32> -> vector<288x128xf32>
    %41 = arith.addf %36, %40 : vector<288x128xf32>
    %42 = vector.extract_strided_slice %10 {offsets = [36, 0], sizes = [288, 128], strides = [1, 1]} : vector<342x128xbf16> to vector<288x128xbf16>
    %c6 = arith.constant 6 : index
    %c0_26 = arith.constant 0 : index
    %c0_27 = arith.constant 0 : index
    %43 = vector.load %arg2[%c6, %c0_26, %c0_27] : memref<9x128x128xbf16, #tpu.memory_space<vmem>>, vector<1x128x128xbf16>
    %44 = vector.shape_cast %43 : vector<1x128x128xbf16> to vector<128x128xbf16>
    %cst_28 = arith.constant dense<0.000000e+00> : vector<288x128xf32>
    %45 = tpu.matmul %42, %44, %cst_28 {dimension_numbers = #tpu.dot_dimension_numbers<[1], [0], [0], [1], [0, 0, 1, 1], [], []>} : vector<288x128xbf16>, vector<128x128xbf16>, vector<288x128xf32> -> vector<288x128xf32>
    %46 = arith.addf %41, %45 : vector<288x128xf32>
    %47 = vector.extract_strided_slice %10 {offsets = [37, 0], sizes = [288, 128], strides = [1, 1]} : vector<342x128xbf16> to vector<288x128xbf16>
    %c7 = arith.constant 7 : index
    %c0_29 = arith.constant 0 : index
    %c0_30 = arith.constant 0 : index
    %48 = vector.load %arg2[%c7, %c0_29, %c0_30] : memref<9x128x128xbf16, #tpu.memory_space<vmem>>, vector<1x128x128xbf16>
    %49 = vector.shape_cast %48 : vector<1x128x128xbf16> to vector<128x128xbf16>
    %cst_31 = arith.constant dense<0.000000e+00> : vector<288x128xf32>
    %50 = tpu.matmul %47, %49, %cst_31 {dimension_numbers = #tpu.dot_dimension_numbers<[1], [0], [0], [1], [0, 0, 1, 1], [], []>} : vector<288x128xbf16>, vector<128x128xbf16>, vector<288x128xf32> -> vector<288x128xf32>
    %51 = arith.addf %46, %50 : vector<288x128xf32>
    %52 = vector.extract_strided_slice %10 {offsets = [38, 0], sizes = [288, 128], strides = [1, 1]} : vector<342x128xbf16> to vector<288x128xbf16>
    %c8 = arith.constant 8 : index
    %c0_32 = arith.constant 0 : index
    %c0_33 = arith.constant 0 : index
    %53 = vector.load %arg2[%c8, %c0_32, %c0_33] : memref<9x128x128xbf16, #tpu.memory_space<vmem>>, vector<1x128x128xbf16>
    %54 = vector.shape_cast %53 : vector<1x128x128xbf16> to vector<128x128xbf16>
    %cst_34 = arith.constant dense<0.000000e+00> : vector<288x128xf32>
    %55 = tpu.matmul %52, %54, %cst_34 {dimension_numbers = #tpu.dot_dimension_numbers<[1], [0], [0], [1], [0, 0, 1, 1], [], []>} : vector<288x128xbf16>, vector<128x128xbf16>, vector<288x128xf32> -> vector<288x128xf32>
    %56 = arith.addf %51, %55 : vector<288x128xf32>
    %c0_35 = arith.constant 0 : index
    %c0_36 = arith.constant 0 : index
    %c0_37 = arith.constant 0 : index
    %57 = vector.load %arg5[%c0_35, %c0_36, %c0_37] : memref<1x288x128xf32, #tpu.memory_space<vmem>>, vector<1x288x128xf32>
    %58 = vector.shape_cast %57 : vector<1x288x128xf32> to vector<288x128xf32>
    %59 = vector.shape_cast %56 : vector<288x128xf32> to vector<1x288x128xf32>
    tpu.vector_store %arg5[%c0_35, %c0_36, %c0_37], %59 {strides = array<i32>} : memref<1x288x128xf32, #tpu.memory_space<vmem>>, vector<1x288x128xf32>,
    return
  }
  func.func @transform_0(%arg0: i32) -> (i32, i32, i32) {
    %c0_i32 = arith.constant 0 : i32
    %c0_i32_0 = arith.constant 0 : i32
    %c0_i32_1 = arith.constant 0 : i32
    return %arg0, %c0_i32, %c0_i32_0 : i32, i32, i32
  }
  func.func @transform_1(%arg0: i32) -> (i32, i32, i32) {
    %c0_i32 = arith.constant 0 : i32
    %c0_i32_0 = arith.constant 0 : i32
    %c0_i32_1 = arith.constant 0 : i32
    %c0_i32_2 = arith.constant 0 : i32
    return %c0_i32, %c0_i32_0, %c0_i32_1 : i32, i32, i32
  }
  func.func @transform_2(%arg0: i32) -> (i32, i32) {
    %c0_i32 = arith.constant 0 : i32
    %c0_i32_0 = arith.constant 0 : i32
    %c0_i32_1 = arith.constant 0 : i32
    return %c0_i32, %c0_i32_0 : i32, i32
  }
  func.func @transform_3(%arg0: i32) -> (i32, i32) {
    %c0_i32 = arith.constant 0 : i32
    %c0_i32_0 = arith.constant 0 : i32
    %c0_i32_1 = arith.constant 0 : i32
    return %c0_i32, %c0_i32_0 : i32, i32
  }
  func.func @transform_4(%arg0: i32) -> (i32, i32, i32) {
    %c0_i32 = arith.constant 0 : i32
    %c0_i32_0 = arith.constant 0 : i32
    %c0_i32_1 = arith.constant 0 : i32
    return %arg0, %c0_i32, %c0_i32_0 : i32, i32, i32
  }
}

module attributes {stable_mosaic.version = 11 : i64} {
  func.func @bn_relu_conv_add_kernel(%arg0: i32, %arg1: memref<1x342x128xf32, #tpu.memory_space<vmem>>, %arg2: memref<9x128x128xbf16, #tpu.memory_space<vmem>>, %arg3: memref<1x128xf32, #tpu.memory_space<vmem>>, %arg4: memref<1x128xf32, #tpu.memory_space<vmem>>, %arg5: memref<1x342x128xf32, #tpu.memory_space<vmem>>, %arg6: memref<1x288x128xf32, #tpu.memory_space<vmem>>) attributes {dimension_semantics = [#tpu.dimension_semantics<parallel>], iteration_bounds = array<i64: 2>, scalar_prefetch = 0 : i64, scratch_operands = 0 : i64, tpu.core_type = #tpu.core_type<tc>, window_params = [{transform_indices = @transform_0, window_bounds = array<i64: 1, 342, 128>}, {pipeline_mode = #tpu.pipeline_mode<synchronous>, transform_indices = @transform_1, window_bounds = array<i64: 9, 128, 128>}, {pipeline_mode = #tpu.pipeline_mode<synchronous>, transform_indices = @transform_2, window_bounds = array<i64: 1, 128>}, {pipeline_mode = #tpu.pipeline_mode<synchronous>, transform_indices = @transform_3, window_bounds = array<i64: 1, 128>}, {transform_indices = @transform_4, window_bounds = array<i64: 1, 342, 128>}, {transform_indices = @transform_5, window_bounds = array<i64: 1, 288, 128>}]} {
    %c0 = arith.constant 0 : index
    %c0_0 = arith.constant 0 : index
    %c0_1 = arith.constant 0 : index
    %0 = vector.load %arg1[%c0, %c0_0, %c0_1] : memref<1x342x128xf32, #tpu.memory_space<vmem>>, vector<1x342x128xf32>
    %1 = vector.shape_cast %0 : vector<1x342x128xf32> to vector<342x128xf32>
    %c0_2 = arith.constant 0 : index
    %c0_3 = arith.constant 0 : index
    %2 = vector.load %arg3[%c0_2, %c0_3] : memref<1x128xf32, #tpu.memory_space<vmem>>, vector<1x128xf32>
    %3 = vector.broadcast %2 : vector<1x128xf32> to vector<342x128xf32>
    %4 = arith.mulf %1, %3 : vector<342x128xf32>
    %c0_4 = arith.constant 0 : index
    %c0_5 = arith.constant 0 : index
    %5 = vector.load %arg4[%c0_4, %c0_5] : memref<1x128xf32, #tpu.memory_space<vmem>>, vector<1x128xf32>
    %6 = vector.broadcast %5 : vector<1x128xf32> to vector<342x128xf32>
    %7 = arith.addf %4, %6 : vector<342x128xf32>
    %cst = arith.constant 0.000000e+00 : f32
    %8 = vector.broadcast %cst : f32 to vector<342x128xf32>
    %9 = arith.maximumf %7, %8 : vector<342x128xf32>
    %10 = arith.truncf %9 : vector<342x128xf32> to vector<342x128xbf16>
    %cst_6 = arith.constant 0.000000e+00 : f32
    %11 = vector.broadcast %cst_6 : f32 to vector<288x128xf32>
    %12 = vector.extract_strided_slice %10 {offsets = [0, 0], sizes = [288, 128], strides = [1, 1]} : vector<342x128xbf16> to vector<288x128xbf16>
    %c0_7 = arith.constant 0 : index
    %c0_8 = arith.constant 0 : index
    %c0_9 = arith.constant 0 : index
    %13 = vector.load %arg2[%c0_7, %c0_8, %c0_9] : memref<9x128x128xbf16, #tpu.memory_space<vmem>>, vector<1x128x128xbf16>
    %14 = vector.shape_cast %13 : vector<1x128x128xbf16> to vector<128x128xbf16>
    %cst_10 = arith.constant dense<0.000000e+00> : vector<288x128xf32>
    %15 = tpu.matmul %12, %14, %cst_10 {dimension_numbers = #tpu.dot_dimension_numbers<[1], [0], [0], [1], [0, 0, 1, 1], [], []>} : vector<288x128xbf16>, vector<128x128xbf16>, vector<288x128xf32> -> vector<288x128xf32>
    %16 = arith.addf %11, %15 : vector<288x128xf32>
    %17 = vector.extract_strided_slice %10 {offsets = [1, 0], sizes = [288, 128], strides = [1, 1]} : vector<342x128xbf16> to vector<288x128xbf16>
    %c1 = arith.constant 1 : index
    %c0_11 = arith.constant 0 : index
    %c0_12 = arith.constant 0 : index
    %18 = vector.load %arg2[%c1, %c0_11, %c0_12] : memref<9x128x128xbf16, #tpu.memory_space<vmem>>, vector<1x128x128xbf16>
    %19 = vector.shape_cast %18 : vector<1x128x128xbf16> to vector<128x128xbf16>
    %cst_13 = arith.constant dense<0.000000e+00> : vector<288x128xf32>
    %20 = tpu.matmul %17, %19, %cst_13 {dimension_numbers = #tpu.dot_dimension_numbers<[1], [0], [0], [1], [0, 0, 1, 1], [], []>} : vector<288x128xbf16>, vector<128x128xbf16>, vector<288x128xf32> -> vector<288x128xf32>
    %21 = arith.addf %16, %20 : vector<288x128xf32>
    %22 = vector.extract_strided_slice %10 {offsets = [2, 0], sizes = [288, 128], strides = [1, 1]} : vector<342x128xbf16> to vector<288x128xbf16>
    %c2 = arith.constant 2 : index
    %c0_14 = arith.constant 0 : index
    %c0_15 = arith.constant 0 : index
    %23 = vector.load %arg2[%c2, %c0_14, %c0_15] : memref<9x128x128xbf16, #tpu.memory_space<vmem>>, vector<1x128x128xbf16>
    %24 = vector.shape_cast %23 : vector<1x128x128xbf16> to vector<128x128xbf16>
    %cst_16 = arith.constant dense<0.000000e+00> : vector<288x128xf32>
    %25 = tpu.matmul %22, %24, %cst_16 {dimension_numbers = #tpu.dot_dimension_numbers<[1], [0], [0], [1], [0, 0, 1, 1], [], []>} : vector<288x128xbf16>, vector<128x128xbf16>, vector<288x128xf32> -> vector<288x128xf32>
    %26 = arith.addf %21, %25 : vector<288x128xf32>
    %27 = vector.extract_strided_slice %10 {offsets = [18, 0], sizes = [288, 128], strides = [1, 1]} : vector<342x128xbf16> to vector<288x128xbf16>
    %c3 = arith.constant 3 : index
    %c0_17 = arith.constant 0 : index
    %c0_18 = arith.constant 0 : index
    %28 = vector.load %arg2[%c3, %c0_17, %c0_18] : memref<9x128x128xbf16, #tpu.memory_space<vmem>>, vector<1x128x128xbf16>
    %29 = vector.shape_cast %28 : vector<1x128x128xbf16> to vector<128x128xbf16>
    %cst_19 = arith.constant dense<0.000000e+00> : vector<288x128xf32>
    %30 = tpu.matmul %27, %29, %cst_19 {dimension_numbers = #tpu.dot_dimension_numbers<[1], [0], [0], [1], [0, 0, 1, 1], [], []>} : vector<288x128xbf16>, vector<128x128xbf16>, vector<288x128xf32> -> vector<288x128xf32>
    %31 = arith.addf %26, %30 : vector<288x128xf32>
    %32 = vector.extract_strided_slice %10 {offsets = [19, 0], sizes = [288, 128], strides = [1, 1]} : vector<342x128xbf16> to vector<288x128xbf16>
    %c4 = arith.constant 4 : index
    %c0_20 = arith.constant 0 : index
    %c0_21 = arith.constant 0 : index
    %33 = vector.load %arg2[%c4, %c0_20, %c0_21] : memref<9x128x128xbf16, #tpu.memory_space<vmem>>, vector<1x128x128xbf16>
    %34 = vector.shape_cast %33 : vector<1x128x128xbf16> to vector<128x128xbf16>
    %cst_22 = arith.constant dense<0.000000e+00> : vector<288x128xf32>
    %35 = tpu.matmul %32, %34, %cst_22 {dimension_numbers = #tpu.dot_dimension_numbers<[1], [0], [0], [1], [0, 0, 1, 1], [], []>} : vector<288x128xbf16>, vector<128x128xbf16>, vector<288x128xf32> -> vector<288x128xf32>
    %36 = arith.addf %31, %35 : vector<288x128xf32>
    %37 = vector.extract_strided_slice %10 {offsets = [20, 0], sizes = [288, 128], strides = [1, 1]} : vector<342x128xbf16> to vector<288x128xbf16>
    %c5 = arith.constant 5 : index
    %c0_23 = arith.constant 0 : index
    %c0_24 = arith.constant 0 : index
    %38 = vector.load %arg2[%c5, %c0_23, %c0_24] : memref<9x128x128xbf16, #tpu.memory_space<vmem>>, vector<1x128x128xbf16>
    %39 = vector.shape_cast %38 : vector<1x128x128xbf16> to vector<128x128xbf16>
    %cst_25 = arith.constant dense<0.000000e+00> : vector<288x128xf32>
    %40 = tpu.matmul %37, %39, %cst_25 {dimension_numbers = #tpu.dot_dimension_numbers<[1], [0], [0], [1], [0, 0, 1, 1], [], []>} : vector<288x128xbf16>, vector<128x128xbf16>, vector<288x128xf32> -> vector<288x128xf32>
    %41 = arith.addf %36, %40 : vector<288x128xf32>
    %42 = vector.extract_strided_slice %10 {offsets = [36, 0], sizes = [288, 128], strides = [1, 1]} : vector<342x128xbf16> to vector<288x128xbf16>
    %c6 = arith.constant 6 : index
    %c0_26 = arith.constant 0 : index
    %c0_27 = arith.constant 0 : index
    %43 = vector.load %arg2[%c6, %c0_26, %c0_27] : memref<9x128x128xbf16, #tpu.memory_space<vmem>>, vector<1x128x128xbf16>
    %44 = vector.shape_cast %43 : vector<1x128x128xbf16> to vector<128x128xbf16>
    %cst_28 = arith.constant dense<0.000000e+00> : vector<288x128xf32>
    %45 = tpu.matmul %42, %44, %cst_28 {dimension_numbers = #tpu.dot_dimension_numbers<[1], [0], [0], [1], [0, 0, 1, 1], [], []>} : vector<288x128xbf16>, vector<128x128xbf16>, vector<288x128xf32> -> vector<288x128xf32>
    %46 = arith.addf %41, %45 : vector<288x128xf32>
    %47 = vector.extract_strided_slice %10 {offsets = [37, 0], sizes = [288, 128], strides = [1, 1]} : vector<342x128xbf16> to vector<288x128xbf16>
    %c7 = arith.constant 7 : index
    %c0_29 = arith.constant 0 : index
    %c0_30 = arith.constant 0 : index
    %48 = vector.load %arg2[%c7, %c0_29, %c0_30] : memref<9x128x128xbf16, #tpu.memory_space<vmem>>, vector<1x128x128xbf16>
    %49 = vector.shape_cast %48 : vector<1x128x128xbf16> to vector<128x128xbf16>
    %cst_31 = arith.constant dense<0.000000e+00> : vector<288x128xf32>
    %50 = tpu.matmul %47, %49, %cst_31 {dimension_numbers = #tpu.dot_dimension_numbers<[1], [0], [0], [1], [0, 0, 1, 1], [], []>} : vector<288x128xbf16>, vector<128x128xbf16>, vector<288x128xf32> -> vector<288x128xf32>
    %51 = arith.addf %46, %50 : vector<288x128xf32>
    %52 = vector.extract_strided_slice %10 {offsets = [38, 0], sizes = [288, 128], strides = [1, 1]} : vector<342x128xbf16> to vector<288x128xbf16>
    %c8 = arith.constant 8 : index
    %c0_32 = arith.constant 0 : index
    %c0_33 = arith.constant 0 : index
    %53 = vector.load %arg2[%c8, %c0_32, %c0_33] : memref<9x128x128xbf16, #tpu.memory_space<vmem>>, vector<1x128x128xbf16>
    %54 = vector.shape_cast %53 : vector<1x128x128xbf16> to vector<128x128xbf16>
    %cst_34 = arith.constant dense<0.000000e+00> : vector<288x128xf32>
    %55 = tpu.matmul %52, %54, %cst_34 {dimension_numbers = #tpu.dot_dimension_numbers<[1], [0], [0], [1], [0, 0, 1, 1], [], []>} : vector<288x128xbf16>, vector<128x128xbf16>, vector<288x128xf32> -> vector<288x128xf32>
    %56 = arith.addf %51, %55 : vector<288x128xf32>
    %c0_35 = arith.constant 0 : index
    %c19 = arith.constant 19 : index
    %c0_36 = arith.constant 0 : index
    %57 = vector.load %arg5[%c0_35, %c19, %c0_36] : memref<1x342x128xf32, #tpu.memory_space<vmem>>, vector<1x288x128xf32>
    %58 = vector.shape_cast %57 : vector<1x288x128xf32> to vector<288x128xf32>
    %59 = arith.addf %56, %58 : vector<288x128xf32>
    %c0_37 = arith.constant 0 : index
    %c0_38 = arith.constant 0 : index
    %c0_39 = arith.constant 0 : index
    %60 = vector.load %arg6[%c0_37, %c0_38, %c0_39] : memref<1x288x128xf32, #tpu.memory_space<vmem>>, vector<1x288x128xf32>
    %61 = vector.shape_cast %60 : vector<1x288x128xf32> to vector<288x128xf32>
    %62 = vector.shape_cast %59 : vector<288x128xf32> to vector<1x288x128xf32>
    tpu.vector_store %arg6[%c0_37, %c0_38, %c0_39], %62 {strides = array<i32>} : memref<1x288x128xf32, #tpu.memory_space<vmem>>, vector<1x288x128xf32>,
    return
  }
  func.func @transform_0(%arg0: i32) -> (i32, i32, i32) {
    %c0_i32 = arith.constant 0 : i32
    %c0_i32_0 = arith.constant 0 : i32
    %c0_i32_1 = arith.constant 0 : i32
    return %arg0, %c0_i32, %c0_i32_0 : i32, i32, i32
  }
  func.func @transform_1(%arg0: i32) -> (i32, i32, i32) {
    %c0_i32 = arith.constant 0 : i32
    %c0_i32_0 = arith.constant 0 : i32
    %c0_i32_1 = arith.constant 0 : i32
    %c0_i32_2 = arith.constant 0 : i32
    return %c0_i32, %c0_i32_0, %c0_i32_1 : i32, i32, i32
  }
  func.func @transform_2(%arg0: i32) -> (i32, i32) {
    %c0_i32 = arith.constant 0 : i32
    %c0_i32_0 = arith.constant 0 : i32
    %c0_i32_1 = arith.constant 0 : i32
    return %c0_i32, %c0_i32_0 : i32, i32
  }
  func.func @transform_3(%arg0: i32) -> (i32, i32) {
    %c0_i32 = arith.constant 0 : i32
    %c0_i32_0 = arith.constant 0 : i32
    %c0_i32_1 = arith.constant 0 : i32
    return %c0_i32, %c0_i32_0 : i32, i32
  }
  func.func @transform_4(%arg0: i32) -> (i32, i32, i32) {
    %c0_i32 = arith.constant 0 : i32
    %c0_i32_0 = arith.constant 0 : i32
    %c0_i32_1 = arith.constant 0 : i32
    return %arg0, %c0_i32, %c0_i32_0 : i32, i32, i32
  }
  func.func @transform_5(%arg0: i32) -> (i32, i32, i32) {
    %c0_i32 = arith.constant 0 : i32
    %c0_i32_0 = arith.constant 0 : i32
    %c0_i32_1 = arith.constant 0 : i32
    return %arg0, %c0_i32, %c0_i32_0 : i32, i32, i32
  }
}

</mosaic_0001>

<bundles_post_ra>
// kernel: preact_block_forward.4
= control target key start
LH: loop header
LB: loop body
LE: loop exit
PB: predicated region body
PF: predicated region fallthrough
CT: control target
= control target key end

     0   :  { %s355_s9 = smov 0   ;;  %s421_s0 = inlined_call_operand.vmem [shape: f32[512,128], index: 0, kind: input, shape index: {}]   ;;  %s422_s1 = inlined_call_operand.vmem [shape: f32[1,128], index: 1, kind: output, shape index: {0}]   ;;  %s423_s2 = inlined_call_operand.vmem [shape: f32[1,128], index: 2, kind: output, shape index: {1}]  }
   0x1 LB: > { %s313_s10 = sadd.s32 4294967295, %s337_s9   ;;  %p316_p0 = scmp.ge.s32.totalorder %s337_s9, 1  ;;  %s337_s9 = sphi %s355_s9, %s13_s9  }
   0x2   : > { %p106_p1 = scmp.lt.s32.totalorder %s337_s9, 3 }
   0x4   : > { %p107_p2 = pnand %p316_p0, %p106_p1 }
   0x5   : > { %s317_s11 = sshll.u32 (!%p107_p2), %s313_s10, 5  ;;  %p319_p4 = scmp.ne.s32.totalorder (!%p107_p2), %s313_s10, 0 }
   0x6   : > { %110 = sbr.rel (%p107_p2) target bundleno = 98 (0x62), region = 24  ;;  %p124_p3 = scmp.lt.s32.totalorder (!%p107_p2), %s317_s11, 63 }
   0xb   : > { %s425_s11 = smov (!%p124_p3, %s317_s11), 63  ;;  %132 = sbr.rel (%p319_p4) target bundleno = 18 (0x12), region = 28 }
   0xc   : > { %s318_s12 = sshll.u32 %s425_s11, 3 }
   0xd   : > { %s366_s15 = scalar_lea.vmem %s421_s0, %s318_s12 }
  0x10   : > { %v339_v0 = vmov 0.0  }
  0x11   : > { %133 = vst [vmem:[%s422_s1] sm:$0x1] %v339_v0  ;;  %134 = vst [vmem:[%s423_s2] sm:$0x1] %v339_v0 }
  0x12 PF: > { %v135_v1 = vld [vmem:[%s366_s15] sm:$0xff]  ;;  %v136_v2 = vld [vmem:[%s366_s15 + $0x8] sm:$0xff]  ;;  %v137_v3 = vld [vmem:[%s366_s15 + $0x10] sm:$0xff] }
  0x13   : > { %v138_v4 = vld [vmem:[%s366_s15 + $0x18] sm:$0xff]  ;;  %v168_v5 = vadd.f32 %v136_v2, %v135_v1  ;;  %v208_v6 = vmul.f32 %v135_v1, %v135_v1  ;;  %v209_v7 = vmul.f32 %v136_v2, %v136_v2  ;;  %v210_v8 = vmul.f32 %v137_v3, %v137_v3  ;;  %v139_v9 = vld [vmem:[%s366_s15 + $0x20] sm:$0xff]  ;;  %v140_v13 = vld [vmem:[%s366_s15 + $0x28] sm:$0xff] }
  0x14   : > { %v211_v11 = vmul.f32 %v138_v4, %v138_v4  ;;  %v212_v15 = vmul.f32 %v139_v9, %v139_v9  ;;  %v141_v17 = vld [vmem:[%s366_s15 + $0x30] sm:$0xff]  ;;  %v213_v19 = vmul.f32 %v140_v13, %v140_v13  ;;  %v142_v21 = vld [vmem:[%s366_s15 + $0x38] sm:$0xff]  ;;  %v143_v25 = vld [vmem:[%s366_s15 + $0x40] sm:$0xff] }
  0x15   : > { %v169_v10 = vadd.f32 %v168_v5, %v137_v3  ;;  %v240_v12 = vadd.f32 %v209_v7, %v208_v6  ;;  %v214_v23 = vmul.f32 %v141_v17, %v141_v17  ;;  %v215_v27 = vmul.f32 %v142_v21, %v142_v21  ;;  %v144_v29 = vld [vmem:[%s366_s15 + $0x48] sm:$0xff]  ;;  %v145_v33 = vld [vmem:[%s366_s15 + $0x50] sm:$0xff]  ;;  %v146_v37 = vld [vmem:[%s366_s15 + $0x58] sm:$0xff] }
  0x16   : > { %v216_v31 = vmul.f32 %v143_v25, %v143_v25  ;;  %v217_v35 = vmul.f32 %v144_v29, %v144_v29  ;;  %v218_v39 = vmul.f32 %v145_v33, %v145_v33  ;;  %v147_v41 = vld [vmem:[%s366_s15 + $0x60] sm:$0xff]  ;;  %v219_v43 = vmul.f32 %v146_v37, %v146_v37  ;;  %v148_v45 = vld [vmem:[%s366_s15 + $0x68] sm:$0xff]  ;;  %v149_v49 = vld [vmem:[%s366_s15 + $0x70] sm:$0xff] }
  0x17   : > { %v170_v14 = vadd.f32 %v169_v10, %v138_v4  ;;  %v241_v16 = vadd.f32 %v240_v12, %v210_v8  ;;  %v220_v47 = vmul.f32 %v147_v41, %v147_v41  ;;  %v221_v51 = vmul.f32 %v148_v45, %v148_v45  ;;  %v150_v53 = vld [vmem:[%s366_s15 + $0x78] sm:$0xff]  ;;  %v151_v57 = vld [vmem:[%s366_s15 + $0x80] sm:$0xff]  ;;  %v152_v61 = vld [vmem:[%s366_s15 + $0x88] sm:$0xff] }
  0x18   : > { %v222_v55 = vmul.f32 %v149_v49, %v149_v49  ;;  %v223_v59 = vmul.f32 %v150_v53, %v150_v53  ;;  %v224_v63 = vmul.f32 %v151_v57, %v151_v57  ;;  %v153_v1 = vld [vmem:[%s366_s15 + $0x90] sm:$0xff]  ;;  %v225_v3 = vmul.f32 %v152_v61, %v152_v61  ;;  %v154_v5 = vld [vmem:[%s366_s15 + $0x98] sm:$0xff] }
  0x19   : > { %v171_v18 = vadd.f32 %v170_v14, %v139_v9  ;;  %v242_v20 = vadd.f32 %v241_v16, %v211_v11  ;;  %v226_v7 = vmul.f32 %v153_v1, %v153_v1  ;;  %v155_v9 = vld [vmem:[%s366_s15 + $0xa0] sm:$0xff]  ;;  %v227_v11 = vmul.f32 %v154_v5, %v154_v5 }
  0x1b   : > { %v172_v22 = vadd.f32 %v171_v18, %v140_v13  ;;  %v243_v24 = vadd.f32 %v242_v20, %v212_v15  ;;  %v156_v13 = vld [vmem:[%s366_s15 + $0xa8] sm:$0xff]  ;;  %v228_v15 = vmul.f32 %v155_v9, %v155_v9 }
  0x1d   : > { %v173_v26 = vadd.f32 %v172_v22, %v141_v17  ;;  %v244_v28 = vadd.f32 %v243_v24, %v213_v19  ;;  %v157_v17 = vld [vmem:[%s366_s15 + $0xb0] sm:$0xff]  ;;  %v229_v19 = vmul.f32 %v156_v13, %v156_v13 }
  0x1f   : > { %v174_v30 = vadd.f32 %v173_v26, %v142_v21  ;;  %v245_v32 = vadd.f32 %v244_v28, %v214_v23  ;;  %v158_v21 = vld [vmem:[%s366_s15 + $0xb8] sm:$0xff]  ;;  %v230_v23 = vmul.f32 %v157_v17, %v157_v17 }
  0x21   : > { %v175_v34 = vadd.f32 %v174_v30, %v143_v25  ;;  %v246_v36 = vadd.f32 %v245_v32, %v215_v27  ;;  %v159_v25 = vld [vmem:[%s366_s15 + $0xc0] sm:$0xff]  ;;  %v231_v27 = vmul.f32 %v158_v21, %v158_v21 }
  0x23   : > { %v176_v38 = vadd.f32 %v175_v34, %v144_v29  ;;  %v247_v40 = vadd.f32 %v246_v36, %v216_v31  ;;  %v160_v29 = vld [vmem:[%s366_s15 + $0xc8] sm:$0xff]  ;;  %v232_v31 = vmul.f32 %v159_v25, %v159_v25 }
  0x25   : > { %v177_v42 = vadd.f32 %v176_v38, %v145_v33  ;;  %v248_v44 = vadd.f32 %v247_v40, %v217_v35  ;;  %v161_v33 = vld [vmem:[%s366_s15 + $0xd0] sm:$0xff]  ;;  %v233_v35 = vmul.f32 %v160_v29, %v160_v29 }
  0x27   : > { %v178_v46 = vadd.f32 %v177_v42, %v146_v37  ;;  %v249_v48 = vadd.f32 %v248_v44, %v218_v39  ;;  %v162_v37 = vld [vmem:[%s366_s15 + $0xd8] sm:$0xff]  ;;  %v234_v39 = vmul.f32 %v161_v33, %v161_v33 }
  0x29   : > { %v179_v50 = vadd.f32 %v178_v46, %v147_v41  ;;  %v250_v52 = vadd.f32 %v249_v48, %v219_v43  ;;  %v163_v41 = vld [vmem:[%s366_s15 + $0xe0] sm:$0xff]  ;;  %v235_v43 = vmul.f32 %v162_v37, %v162_v37 }
  0x2b   : > { %v180_v54 = vadd.f32 %v179_v50, %v148_v45  ;;  %v251_v56 = vadd.f32 %v250_v52, %v220_v47  ;;  %v164_v45 = vld [vmem:[%s366_s15 + $0xe8] sm:$0xff]  ;;  %v236_v47 = vmul.f32 %v163_v41, %v163_v41 }
  0x2d   : > { %v181_v58 = vadd.f32 %v180_v54, %v149_v49  ;;  %v252_v60 = vadd.f32 %v251_v56, %v221_v51  ;;  %v165_v49 = vld [vmem:[%s366_s15 + $0xf0] sm:$0xff]  ;;  %v237_v51 = vmul.f32 %v164_v45, %v164_v45 }
  0x2f   : > { %v182_v62 = vadd.f32 %v181_v58, %v150_v53  ;;  %v253_v0 = vadd.f32 %v252_v60, %v222_v55  ;;  %v166_v53 = vld [vmem:[%s366_s15 + $0xf8] sm:$0xff]  ;;  %v238_v55 = vmul.f32 %v165_v49, %v165_v49 }
  0x30   : > { %v239_v58 = vmul.f32 %v166_v53, %v166_v53 }
  0x31   : > { %v183_v2 = vadd.f32 %v182_v62, %v151_v57  ;;  %v254_v4 = vadd.f32 %v253_v0, %v223_v59 }
  0x33   : > { %v184_v6 = vadd.f32 %v183_v2, %v152_v61  ;;  %v255_v8 = vadd.f32 %v254_v4, %v224_v63 }
  0x35   : > { %v185_v10 = vadd.f32 %v184_v6, %v153_v1  ;;  %v256_v12 = vadd.f32 %v255_v8, %v225_v3 }
  0x37   : > { %v186_v14 = vadd.f32 %v185_v10, %v154_v5  ;;  %v257_v16 = vadd.f32 %v256_v12, %v226_v7  ;;  %v167_v7 = vld [vmem:[%s422_s1] sm:$0x1] }
  0x38   : > { %v207_v12 = vld [vmem:[%s423_s2] sm:$0x1] }
  0x39   : > { %v187_v18 = vadd.f32 %v186_v14, %v155_v9  ;;  %v258_v20 = vadd.f32 %v257_v16, %v227_v11 }
  0x3b   : > { %v188_v22 = vadd.f32 %v187_v18, %v156_v13  ;;  %v259_v24 = vadd.f32 %v258_v20, %v228_v15 }
  0x3d   : > { %v189_v26 = vadd.f32 %v188_v22, %v157_v17  ;;  %v260_v28 = vadd.f32 %v259_v24, %v229_v19 }
  0x3f   : > { %v190_v30 = vadd.f32 %v189_v26, %v158_v21  ;;  %v261_v32 = vadd.f32 %v260_v28, %v230_v23 }
  0x41   : > { %v191_v34 = vadd.f32 %v190_v30, %v159_v25  ;;  %v262_v36 = vadd.f32 %v261_v32, %v231_v27 }
  0x43   : > { %v192_v38 = vadd.f32 %v191_v34, %v160_v29  ;;  %v263_v40 = vadd.f32 %v262_v36, %v232_v31 }
  0x45   : > { %v193_v42 = vadd.f32 %v192_v38, %v161_v33  ;;  %v264_v44 = vadd.f32 %v263_v40, %v233_v35 }
  0x47   : > { %v194_v46 = vadd.f32 %v193_v42, %v162_v37  ;;  %v265_v48 = vadd.f32 %v264_v44, %v234_v39 }
  0x49   : > { %v195_v50 = vadd.f32 %v194_v46, %v163_v41  ;;  %v266_v52 = vadd.f32 %v265_v48, %v235_v43 }
  0x4b   : > { %v196_v54 = vadd.f32 %v195_v50, %v164_v45  ;;  %v267_v56 = vadd.f32 %v266_v52, %v236_v47 }
  0x4d   : > { %v197_v57 = vadd.f32 %v196_v54, %v165_v49  ;;  %v268_v59 = vadd.f32 %v267_v56, %v237_v51 }
  0x4f   : > { %v198_v60 = vadd.f32 %v197_v57, %v166_v53  ;;  %v269_v61 = vadd.f32 %v268_v59, %v238_v55 }
  0x51   : > { %v199_v62 = vrot.slane %v198_v60, 4  ;;  %v270_v63 = vadd.f32 %v269_v61, %v239_v58 }
  0x53   : > { %v200_v0 = vadd.f32 %v199_v62, %v198_v60  ;;  %v271_v1 = vrot.slane %v270_v63, 4 }
  0x55   : > { %v201_v2 = vrot.slane %v200_v0, 2  ;;  %v272_v3 = vadd.f32 %v271_v1, %v270_v63 }
  0x57   : > { %v202_v4 = vadd.f32 %v201_v2, %v200_v0  ;;  %v273_v5 = vrot.slane %v272_v3, 2 }
  0x59   : > { %v203_v6 = vrot.slane %v202_v4, 1  ;;  %v274_v8 = vadd.f32 %v273_v5, %v272_v3 }
  0x5b   : > { %v204_v9 = vadd.f32 %v203_v6, %v202_v4  ;;  %v275_v10 = vrot.slane %v274_v8, 1 }
  0x5d   : > { %v205_v11 = vadd.f32 %v204_v9, %v167_v7  ;;  %v276_v13 = vadd.f32 %v275_v10, %v274_v8 }
  0x5f   : > { %206 = vst [vmem:[%s422_s1] sm:$0x1] %v205_v11  ;;  %v277_v14 = vadd.f32 %v276_v13, %v207_v12 }
  0x61   : > { %278 = vst [vmem:[%s423_s2] sm:$0x1] %v277_v14 }
  0x62 PF: > { %s13_s9 = sadd.s32 1, %s337_s9  }
  0x63   : > { %p10_p5 = scmp.ge.s32.totalorder %s13_s9, 4  }
  0x65   :  { %12 = sbr.rel (!%p10_p5) target bundleno = 1 (0x1), region = 62 }

// kernel: preact_block_forward.5
= control target key start
LH: loop header
LB: loop body
LE: loop exit
PB: predicated region body
PF: predicated region fallthrough
CT: control target
= control target key end

     0   :  { %s4530_s15 = smov 0   ;;  %s5951_s0 = inlined_call_operand.vmem [shape: f32[2,342,128], index: 0, kind: input, shape index: {}]   ;;  %s5952_s1 = inlined_call_operand.vmem [shape: bf16[9,128,128], index: 1, kind: input, shape index: {}]   ;;  %s5953_s2 = inlined_call_operand.vmem [shape: f32[1,128], index: 2, kind: input, shape index: {}]   ;;  %s5954_s3 = inlined_call_operand.vmem [shape: f32[1,128], index: 3, kind: input, shape index: {}]   ;;  %s5955_s4 = inlined_call_operand.vmem [shape: f32[2,288,128], index: 4, kind: output, shape index: {}]  }
   0x1 LB: > { %s3484_s16 = sadd.s32 4294967295, %s4503_s15   ;;  %p3488_p0 = scmp.ge.s32.totalorder %s4503_s15, 1  ;;  %s4503_s15 = sphi %s4530_s15, %s14_s15  }
   0x2   : > { %p162_p1 = scmp.lt.s32.totalorder %s4503_s15, 3 }
   0x4   : > { %p163_p2 = pnand %p3488_p0, %p162_p1 }
   0x6   : > { %166 = sbr.rel (%p163_p2) target bundleno = 574 (0x23e), region = 36 }
   0xb   : > { %v4423_v0 = vld [vmem:[%s5952_s1 + $0x78] sm:$0xff]   ;;  %p188_p3 = scmp.lt.s32.totalorder %s3484_s16, 1  ;;  %v4424_v1 = vld [vmem:[%s5952_s1 + $0x70] sm:$0xff]   ;;  %v4425_v2 = vld [vmem:[%s5952_s1 + $0x68] sm:$0xff]   ;;  %vm435_vm0 = vsmask.f32 7424 }
   0xc   : > { %4397 = vmatprep.subr.bf16.mxu1 %v4423_v0  ;;  %3929 = vmatprep.subr.bf16.mxu0 %v4423_v0  ;;  %v4426_v3 = vld [vmem:[%s5952_s1 + $0x60] sm:$0xff]   ;;  %v4427_v19 = vld [vmem:[%s5952_s1 + $0x58] sm:$0xff]   ;;  %v4428_v38 = vld [vmem:[%s5952_s1 + $0x50] sm:$0xff]   ;;  %vm1088_vm1 = vcmask 1046528   ;;  %vm1704_vm2 = vsmask.f32 6400 }
   0xd   : > { %s6163_s16 = smov (!%p188_p3, %s3484_s16), 1  ;;  %4405 = vmatpush3.bf16.msra.mxu1 %v4423_v0  ;;  %3930 = vmatpush3.bf16.msra.mxu0 %v4423_v0  ;;  %v4565_v8 = vld [vmem:[%s5953_s2] ss:$0 sm:$0xff]  ;;  %v4429_v57 = vld [vmem:[%s5952_s1 + $0x48] sm:$0xff]   ;;  %vm2083_vm3 = vcmask 1045504   ;;  %vm3076_vm4 = vcmask 1044480  }
   0xe   : > { %4398 = vmatprep.subr.bf16.mxu1 %v4424_v1  ;;  %3931 = vmatprep.subr.bf16.mxu0 %v4424_v1  ;;  %s4413_s23 = smul.u32 344, %s6163_s16  ;;  %v4570_v9 = vld [vmem:[%s5954_s3] ss:$0 sm:$0xff]  ;;  %vm2699_vm5 = vsmask.f32 5376 }
  0x10   : > { %s4553_s26 = scalar_lea.vmem %s5951_s0, %s4413_s23 }
  0x11   : > { %4406 = vmatpush3.bf16.msra.mxu1 %v4424_v1  ;;  %3932 = vmatpush3.bf16.msra.mxu0 %v4424_v1  ;;  %v215_v4 = vld [vmem:[%s4553_s26 + $0x80] sm:$0xff]  ;;  %v216_v5 = vld [vmem:[%s4553_s26 + $0x88] sm:$0xff]  ;;  %v217_v6 = vld [vmem:[%s4553_s26 + $0x90] sm:$0xff] }
  0x12   : > { %4399 = vmatprep.subr.bf16.mxu1 %v4425_v2  ;;  %3933 = vmatprep.subr.bf16.mxu0 %v4425_v2  ;;  %v218_v7 = vld [vmem:[%s4553_s26 + $0x98] sm:$0xff]  ;;  %v264_v10 = vmul.f32 %v4565_v8, %v215_v4  ;;  %v265_v11 = vmul.f32 %v4565_v8, %v216_v5  ;;  %v266_v12 = vmul.f32 %v4565_v8, %v217_v6  ;;  %v219_v14 = vld [vmem:[%s4553_s26 + $0xa0] sm:$0xff]  ;;  %v220_v15 = vld [vmem:[%s4553_s26 + $0xa8] sm:$0xff] }
  0x13   : > { %v267_v13 = vmul.f32 %v4565_v8, %v218_v7  ;;  %v268_v16 = vmul.f32 %v4565_v8, %v219_v14  ;;  %v269_v17 = vmul.f32 %v4565_v8, %v220_v15  ;;  %v199_v18 = vld [vmem:[%s4553_s26] sm:$0xff]  ;;  %v200_v23 = vld [vmem:[%s4553_s26 + $0x8] sm:$0xff]  ;;  %v201_v24 = vld [vmem:[%s4553_s26 + $0x10] sm:$0xff] }
  0x14   : > { %v313_v20 = vadd.f32 %v4570_v9, %v264_v10  ;;  %v314_v21 = vadd.f32 %v4570_v9, %v265_v11  ;;  %v315_v22 = vadd.f32 %v4570_v9, %v266_v12  ;;  %v202_v28 = vld [vmem:[%s4553_s26 + $0x18] sm:$0xff]  ;;  %v248_v29 = vmul.f32 %v4565_v8, %v199_v18  ;;  %v203_v46 = vld [vmem:[%s4553_s26 + $0x20] sm:$0xff]  ;;  %v204_v47 = vld [vmem:[%s4553_s26 + $0x28] sm:$0xff] }
  0x15   : > { %4407 = vmatpush3.bf16.msra.mxu1 %v4425_v2  ;;  %3934 = vmatpush3.bf16.msra.mxu0 %v4425_v2  ;;  %v316_v25 = vadd.f32 %v4570_v9, %v267_v13  ;;  %v317_v26 = vadd.f32 %v4570_v9, %v268_v16  ;;  %v318_v27 = vadd.f32 %v4570_v9, %v269_v17  ;;  %v221_v52 = vld [vmem:[%s4553_s26 + $0xb0] sm:$0xff]  ;;  %v222_v5 = vld [vmem:[%s4553_s26 + $0xb8] sm:$0xff]  ;;  %v223_v13 = vld [vmem:[%s4553_s26 + $0xc0] sm:$0xff] }
  0x16   : > { %4400 = vmatprep.subr.bf16.mxu1 %v4426_v3  ;;  %3935 = vmatprep.subr.bf16.mxu0 %v4426_v3  ;;  %v355_v30 = vmax.f32 %v313_v20, 0.0  ;;  %v356_v31 = vmax.f32 %v314_v21, 0.0  ;;  %v357_v32 = vmax.f32 %v315_v22, 0.0  ;;  %v249_v33 = vmul.f32 %v4565_v8, %v200_v23  ;;  %v4430_v14 = vld [vmem:[%s5952_s1 + $0x40] sm:$0xff]   ;;  %v224_v23 = vld [vmem:[%s4553_s26 + $0xc8] sm:$0xff] }
  0x17   : > { %v358_v34 = vmax.f32 %v316_v25, 0.0  ;;  %v359_v35 = vmax.f32 %v317_v26, 0.0  ;;  %v360_v36 = vmax.f32 %v318_v27, 0.0  ;;  %v250_v37 = vmul.f32 %v4565_v8, %v201_v24  ;;  %v4431_v24 = vld [vmem:[%s5952_s1 + $0x38] sm:$0xff]  }
  0x18   : > { %v4599_v39 = vpack.c.bf16 %v356_v31, %v355_v30  ;;  %v251_v40 = vmul.f32 %v4565_v8, %v202_v28  ;;  %v297_v41 = vadd.f32 %v4570_v9, %v248_v29  ;;  %v298_v44 = vadd.f32 %v4570_v9, %v249_v33  ;;  %v4433_v31 = vld [vmem:[%s5952_s1 + $0xb8] sm:$0xff]   ;;  %v205_v33 = vld [vmem:[%s4553_s26 + $0x30] sm:$0xff] }
  0x19   : > { %4408 = vmatpush3.bf16.msra.mxu1 %v4426_v3  ;;  %3936 = vmatpush3.bf16.msra.mxu0 %v4426_v3  ;;  %v4603_v42 = vpack.c.bf16 %v358_v34, %v357_v32  ;;  %v4605_v43 = vpack.c.bf16 %v360_v36, %v359_v35  ;;  %v299_v45 = vadd.f32 %v4570_v9, %v250_v37  ;;  %v206_v34 = vld [vmem:[%s4553_s26 + $0x38] sm:$0xff] }
  0x1a   : > { %4401 = vmatprep.subr.bf16.mxu1 %v4427_v19  ;;  %3937 = vmatprep.subr.bf16.mxu0 %v4427_v19  ;;  %6024 = vst [vmem:[#allocation2_spill] sm:$0xff] %v4599_v39  ;;  %v4612_v48 = vshll.u32 %v4599_v39, 16  ;;  %v4615_v49 = vshrl.u32 %v4599_v39, 16  ;;  %v300_v50 = vadd.f32 %v4570_v9, %v251_v40  ;;  %v339_v51 = vmax.f32 %v297_v41, 0.0  ;;  %v207_v41 = vld [vmem:[%s4553_s26 + $0x40] sm:$0xff] }
  0x1b   : > { %6025 = vst [vmem:[#allocation3_spill] sm:$0xff] %v4603_v42  ;;  %6026 = vst [vmem:[#allocation4_spill] sm:$0xff] %v4605_v43  ;;  %v4620_v53 = vshll.u32 %v4603_v42, 16  ;;  %v4623_v54 = vshrl.u32 %v4603_v42, 16  ;;  %v4626_v55 = vshll.u32 %v4605_v43, 16  ;;  %v340_v56 = vmax.f32 %v298_v44, 0.0 }
  0x1c   : > { %v5958_v58 = vrot.slane %v4612_v48, 1  ;;  %v341_v59 = vmax.f32 %v299_v45, 0.0  ;;  %v342_v60 = vmax.f32 %v300_v50, 0.0  ;;  %v252_v61 = vmul.f32 %v4565_v8, %v203_v46  ;;  %v208_v50 = vld [vmem:[%s4553_s26 + $0x48] sm:$0xff] }
  0x1d   : > { %4409 = vmatpush3.bf16.msra.mxu1 %v4427_v19  ;;  %3938 = vmatpush3.bf16.msra.mxu0 %v4427_v19  ;;  %6027 = vst [vmem:[#allocation5_spill] sm:$0xff] %v4626_v55  ;;  %v510_v62 = vrot.slane %v4620_v53, 1  ;;  %v518_v63 = vrot.slane %v4626_v55, 1  ;;  %v4635_v0 = vpack.c.bf16 %v340_v56, %v339_v51  ;;  %v253_v1 = vmul.f32 %v4565_v8, %v204_v47 }
  0x1e   : > { %4402 = vmatprep.subr.bf16.mxu1 %v4428_v38  ;;  %3939 = vmatprep.subr.bf16.mxu0 %v4428_v38  ;;  %v506_v2 = vor.u32 %v4615_v49, %v5958_v58  ;;  %v4641_v3 = vpack.c.bf16 %v342_v60, %v341_v59  ;;  %v301_v4 = vadd.f32 %v4570_v9, %v252_v61  ;;  %v4667_v27 = vshrl.u32 %v4605_v43, 16  ;;  %v4432_v60 = vld [vmem:[%s5952_s1 + $0x30] sm:$0xff]   ;;  %v235_v58 = vld [vmem:[%s4553_s26 + $0x120] sm:$0xff] }
  0x1f   : > { %v270_v6 = vmul.f32 %v4565_v8, %v221_v52  ;;  %v514_v7 = vor.u32 %v4623_v54, %v510_v62  ;;  %v437_v10 = vshrl.u32 %v4635_v0, 16  ;;  %v439_v11 = vshll.u32 %v4635_v0, 16 }
  0x20   : > { %6028 = vst [vmem:[#allocation6_spill] sm:$0xff] %v4641_v3  ;;  %v302_v12 = vadd.f32 %v4570_v9, %v253_v1  ;;  %v511_v15 = vsel %vm435_vm0, %v506_v2, %v510_v62  ;;  %v5956_v16 = vshll.u32 %v4641_v3, 16  ;;  %v343_v17 = vmax.f32 %v301_v4, 0.0  ;;  %6029 = vst [vmem:[#allocation7_spill] sm:$0xff] %v4667_v27  ;;  %v225_v2 = vld [vmem:[%s4553_s26 + $0xd0] sm:$0xff] }
  0x21   : > { %4410 = vmatpush3.bf16.msra.mxu1 %v4428_v38  ;;  %3940 = vmatpush3.bf16.msra.mxu0 %v4428_v38  ;;  %v5957_v18 = vshrl.u32 %v4641_v3, 16  ;;  %v519_v19 = vsel %vm435_vm0, %v514_v7, %v518_v63  ;;  %v441_v20 = vrot.slane %v439_v11, 1  ;;  %v271_v22 = vmul.f32 %v4565_v8, %v222_v5 }
  0x22   : > { %4403 = vmatprep.subr.bf16.mxu1 %v4429_v57  ;;  %3941 = vmatprep.subr.bf16.mxu0 %v4429_v57  ;;  %v344_v21 = vmax.f32 %v302_v12, 0.0  ;;  %v446_v25 = vrot.slane %v5956_v16, 1  ;;  %v319_v26 = vadd.f32 %v4570_v9, %v270_v6  ;;  %v272_v28 = vmul.f32 %v4565_v8, %v223_v13 }
  0x23   : > { %3961 = vmatprep.mubr.bf16.mxu1 %v511_v15  ;;  %v442_v29 = vor.u32 %v441_v20, %v437_v10  ;;  %v320_v32 = vadd.f32 %v4570_v9, %v271_v22  ;;  %v522_v38 = vor.u32 %v4667_v27, %v518_v63  ;;  %v273_v40 = vmul.f32 %v4565_v8, %v224_v23  ;;  %v4434_v63 = vld [vmem:[%s5952_s1 + $0xb0] sm:$0xff]   ;;  %v226_v10 = vld [vmem:[%s4553_s26 + $0xd8] sm:$0xff]  ;;  %v4436_v23 = vld [vmem:[%s5952_s1 + $0xa8] sm:$0xff]  }
  0x24   : > { %v4670_v30 = vpack.c.bf16 %v344_v21, %v343_v17  ;;  %v450_v36 = vor.u32 %v5957_v18, %v446_v25  ;;  %v361_v37 = vmax.f32 %v319_v26, 0.0  ;;  %v321_v47 = vadd.f32 %v4570_v9, %v272_v28  ;;  %v4435_v17 = vld [vmem:[%s5952_s1 + $0x28] sm:$0xff]  }
  0x25   : > { %4411 = vmatpush3.bf16.msra.mxu1 %v4429_v57  ;;  %3942 = vmatpush3.bf16.msra.mxu0 %v4429_v57  ;;  %v447_v44 = vsel %vm435_vm0, %v442_v29, %v446_v25  ;;  %v362_v46 = vmax.f32 %v320_v32, 0.0  ;;  %v322_v51 = vadd.f32 %v4570_v9, %v273_v40  ;;  %v254_v52 = vmul.f32 %v4565_v8, %v205_v33  ;;  %v227_v29 = vld [vmem:[%s4553_s26 + $0xe0] sm:$0xff] }
  0x26   : > { %6030 = vst [vmem:[#allocation8_spill] sm:$0xff] %v4670_v30  ;;  %4404 = vmatprep.subr.bf16.mxu1 %v4430_v14  ;;  %3943 = vmatprep.subr.bf16.mxu0 %v4430_v14  ;;  %v4686_v45 = vshll.u32 %v4670_v30, 16  ;;  %v255_v56 = vmul.f32 %v4565_v8, %v206_v34  ;;  %v4694_v57 = vshrl.u32 %v4670_v30, 16  ;;  %v363_v62 = vmax.f32 %v321_v47, 0.0 }
  0x27   : > { %3945 = vmatprep.mubr.bf16.mxu0 %v447_v44  ;;  %v4700_v61 = vpack.c.bf16 %v362_v46, %v361_v37  ;;  %v256_v1 = vmul.f32 %v4565_v8, %v207_v41  ;;  %v364_v4 = vmax.f32 %v322_v51, 0.0  ;;  %v303_v5 = vadd.f32 %v4570_v9, %v254_v52  ;;  %v209_v51 = vld [vmem:[%s4553_s26 + $0x50] sm:$0xff] }
  0x28   : > { %6031 = vst [vmem:[#allocation9_spill] sm:$0xff] %v4686_v45  ;;  %6032 = vst [vmem:[#allocation10_spill] sm:$0xff] %v4694_v57  ;;  %v454_v59 = vrot.slane %v4686_v45, 1  ;;  %v304_v6 = vadd.f32 %v4570_v9, %v255_v56  ;;  %v257_v7 = vmul.f32 %v4565_v8, %v208_v50  ;;  %v274_v26 = vmul.f32 %v4565_v8, %v225_v2  ;;  %v210_v2 = vld [vmem:[%s4553_s26 + $0x58] sm:$0xff] }
  0x29   : > { %4412 = vmatpush3.bf16.msra.mxu1 %v4430_v14  ;;  %3944 = vmatpush3.bf16.msra.mxu0 %v4430_v14  ;;  %6033 = vst [vmem:[#allocation11_spill] sm:$0xff] %v4700_v61  ;;  %v4713_v12 = vshll.u32 %v4700_v61, 16  ;;  %v4716_v13 = vshrl.u32 %v4700_v61, 16  ;;  %v4719_v15 = vpack.c.bf16 %v364_v4, %v363_v62  ;;  %v345_v20 = vmax.f32 %v303_v5, 0.0 }
  0x2a   : > { %3981 = vmatprep.subr.bf16.mxu1 %v4431_v24  ;;  %4033 = vmatprep.subr.bf16.mxu0 %v4433_v31  ;;  %v455_v11 = vsel %vm435_vm0, %v450_v36, %v454_v59  ;;  %v458_v14 = vor.u32 %v4694_v57, %v454_v59  ;;  %v346_v21 = vmax.f32 %v304_v6, 0.0  ;;  %v305_v22 = vadd.f32 %v4570_v9, %v256_v1  ;;  %v4438_v1 = vld [vmem:[%s5952_s1 + $0xa0] sm:$0xff]  }
  0x2b   : > { %6034 = vst [vmem:[#allocation12_spill] sm:$0xff] %v4713_v12  ;;  %6035 = vst [vmem:[#allocation13_spill] sm:$0xff] %v4716_v13  ;;  %v306_v25 = vadd.f32 %v4570_v9, %v257_v7  ;;  %v275_v28 = vmul.f32 %v4565_v8, %v226_v10  ;;  %v4734_v32 = vshll.u32 %v4719_v15, 16  ;;  %v323_v41 = vadd.f32 %v4570_v9, %v274_v26  ;;  %v4439_v26 = vld [vmem:[%s5952_s1 + $0x18] sm:$0xff]  }
  0x2c   : > { %3962 = vmatmul.mubr.bf16.vlgmr.msra.gmra.mxu1 %v519_v19  ;;  %3946 = vmatmul.mubr.bf16.vlgmr.msra.gmra.mxu0 %v455_v11  ;;  %6036 = vst [vmem:[#allocation14_spill] sm:$0xff] %v4719_v15  ;;  %v526_v19 = vrot.slane %v4713_v12, 1  ;;  %v4736_v33 = vpack.c.bf16 %v346_v21, %v345_v20  ;;  %v347_v34 = vmax.f32 %v305_v22, 0.0  ;;  %v276_v59 = vmul.f32 %v4565_v8, %v227_v29  ;;  %v211_v20 = vld [vmem:[%s4553_s26 + $0x60] sm:$0xff] }
  0x2d   : > { %3982 = vmatpush3.bf16.msra.mxu1 %v4431_v24  ;;  %4034 = vmatpush3.bf16.msra.mxu0 %v4433_v31  ;;  %6037 = vst [vmem:[#allocation15_spill] sm:$0xff] %v4734_v32  ;;  %v4739_v24 = vshrl.u32 %v4719_v15, 16  ;;  %v228_v31 = vld [vmem:[%s4553_s26 + $0xe8] sm:$0xff]  ;;  %v348_v40 = vmax.f32 %v306_v25, 0.0  ;;  %v534_v44 = vrot.slane %v4734_v32, 1  ;;  %v324_v50 = vadd.f32 %v4570_v9, %v275_v28 }
  0x2e   : > { %3983 = vmatprep.subr.bf16.mxu1 %v4432_v60  ;;  %4035 = vmatprep.subr.bf16.mxu0 %v4434_v63  ;;  %6038 = vst [vmem:[#allocation16_spill] sm:$0xff] %v4736_v33  ;;  %v527_v36 = vsel %vm435_vm0, %v522_v38, %v526_v19  ;;  %v530_v37 = vor.u32 %v4716_v13, %v526_v19  ;;  %v4747_v46 = vshll.u32 %v4736_v33, 16  ;;  %v4750_v47 = vshrl.u32 %v4736_v33, 16  ;;  %v4437_v38 = vld [vmem:[%s5952_s1 + $0x20] sm:$0xff]   ;;  %v212_v28 = vld [vmem:[%s4553_s26 + $0x68] sm:$0xff] }
  0x2f   : > { %6039 = vst [vmem:[#allocation17_spill] sm:$0xff] %v4739_v24  ;;  %3965 = vmatprep.mubr.bf16.mxu1 %v527_v36  ;;  %v4757_v52 = vpack.c.bf16 %v348_v40, %v347_v34  ;;  %v365_v56 = vmax.f32 %v323_v41, 0.0  ;;  %v277_v62 = vmul.f32 %v4565_v8, %v228_v31  ;;  %v538_v5 = vor.u32 %v4739_v24, %v534_v44  ;;  %v4440_v36 = vld [vmem:[%s5952_s1 + $0x98] sm:$0xff]  }
  0x30   : > { %v535_v4 = vsel %vm435_vm0, %v530_v37, %v534_v44  ;;  %v325_v7 = vadd.f32 %v4570_v9, %v276_v59  ;;  %v258_v11 = vmul.f32 %v4565_v8, %v209_v51  ;;  %v259_v25 = vmul.f32 %v4565_v8, %v210_v2  ;;  %v229_v37 = vld [vmem:[%s4553_s26 + $0xf0] sm:$0xff] }
  0x31   : > { %3984 = vmatpush3.bf16.msra.mxu1 %v4432_v60  ;;  %4036 = vmatpush3.bf16.msra.mxu0 %v4434_v63  ;;  %6040 = vst [vmem:[#allocation18_spill] sm:$0xff] %v4757_v52  ;;  %v462_v60 = vrot.slane %v4747_v46, 1  ;;  %v366_v63 = vmax.f32 %v324_v50, 0.0  ;;  %v4769_v6 = vshll.u32 %v4757_v52, 16  ;;  %v326_v10 = vadd.f32 %v4570_v9, %v277_v62  ;;  %v230_v50 = vld [vmem:[%s4553_s26 + $0xf8] sm:$0xff]  ;;  %v231_v62 = vld [vmem:[%s4553_s26 + $0x100] sm:$0xff] }
  0x32   : > { %3985 = vmatprep.subr.bf16.mxu1 %v4435_v17  ;;  %4037 = vmatprep.subr.bf16.mxu0 %v4436_v23  ;;  %v367_v34 = vmax.f32 %v325_v7, 0.0  ;;  %v308_v41 = vadd.f32 %v4570_v9, %v259_v25  ;;  %v4798_v44 = vshrl.u32 %v4757_v52, 16  ;;  %v260_v59 = vmul.f32 %v4565_v8, %v211_v20  ;;  %v232_v20 = vld [vmem:[%s4553_s26 + $0x108] sm:$0xff] }
  0x33   : > { %6041 = vst [vmem:[#allocation19_spill] sm:$0xff] %v4769_v6  ;;  %v463_v21 = vsel %vm435_vm0, %v458_v14, %v462_v60  ;;  %v466_v22 = vor.u32 %v4750_v47, %v462_v60  ;;  %v4777_v19 = vpack.c.bf16 %v366_v63, %v365_v56  ;;  %v470_v29 = vrot.slane %v4769_v6, 1 }
  0x34   : > { %3966 = vmatmul.mubr.bf16.gmra.mxu1 %v535_v4  ;;  %3949 = vmatprep.mubr.bf16.mxu0 %v463_v21  ;;  %v368_v31 = vmax.f32 %v326_v10, 0.0  ;;  %v307_v14 = vadd.f32 %v4570_v9, %v258_v11  ;;  %v350_v4 = vmax.f32 %v308_v41, 0.0  ;;  %v261_v63 = vmul.f32 %v4565_v8, %v212_v28 }
  0x35   : > { %6042 = vst [vmem:[#allocation20_spill] sm:$0xff] %v4777_v19  ;;  %3986 = vmatpush3.bf16.msra.mxu1 %v4435_v17  ;;  %4038 = vmatpush3.bf16.msra.mxu0 %v4436_v23  ;;  %v4791_v40 = vshll.u32 %v4777_v19, 16  ;;  %v4794_v17 = vshrl.u32 %v4777_v19, 16  ;;  %v471_v51 = vsel %vm435_vm0, %v466_v22, %v470_v29  ;;  %v474_v60 = vor.u32 %v4798_v44, %v470_v29  ;;  %v4441_v22 = vld [vmem:[%s5952_s1 + $0x10] sm:$0xff]  }
  0x36   : > { %3987 = vmatprep.subr.bf16.mxu1 %v4437_v38  ;;  %v4802_v56 = vpack.c.bf16 %v368_v31, %v367_v34  ;;  %4039 = vmatprep.subr.bf16.mxu0 %v4438_v1  ;;  %v349_v23 = vmax.f32 %v307_v14, 0.0  ;;  %v309_v10 = vadd.f32 %v4570_v9, %v260_v59  ;;  %v278_v11 = vmul.f32 %v4565_v8, %v229_v37  ;;  %v4442_v34 = vld [vmem:[%s5952_s1 + $0x90] sm:$0xff]   ;;  %v214_v59 = vld [vmem:[%s4553_s26 + $0x78] sm:$0xff] }
  0x37   : > { %6043 = vst [vmem:[#allocation21_spill] sm:$0xff] %v4791_v40  ;;  %6044 = vst [vmem:[#allocation22_spill] sm:$0xff] %v4794_v17  ;;  %3950 = vmatmul.mubr.bf16.gmra.mxu0 %v471_v51  ;;  %v542_v2 = vrot.slane %v4791_v40, 1  ;;  %v279_v21 = vmul.f32 %v4565_v8, %v230_v50  ;;  %v280_v51 = vmul.f32 %v4565_v8, %v231_v62 }
  0x38   : > { %6045 = vst [vmem:[#allocation23_spill] sm:$0xff] %v4802_v56  ;;  %v4810_v7 = vshll.u32 %v4802_v56, 16  ;;  %v4821_v28 = vpack.c.bf16 %v350_v4, %v349_v23  ;;  %v351_v14 = vmax.f32 %v309_v10, 0.0  ;;  %v213_v23 = vld [vmem:[%s4553_s26 + $0x70] sm:$0xff] }
  0x39   : > { %3988 = vmatpush3.bf16.msra.mxu1 %v4437_v38  ;;  %v543_v25 = vsel %vm435_vm0, %v538_v5, %v542_v2  ;;  %v546_v29 = vor.u32 %v4794_v17, %v542_v2  ;;  %4040 = vmatpush3.bf16.msra.mxu0 %v4438_v1  ;;  %v4824_v38 = vshrl.u32 %v4802_v56, 16  ;;  %v310_v5 = vadd.f32 %v4570_v9, %v261_v63 }
  0x3a   : > { %6046 = vst [vmem:[#allocation24_spill] sm:$0xff] %v4810_v7  ;;  %3989 = vmatprep.subr.bf16.mxu1 %v4439_v26  ;;  %3969 = vmatprep.mubr.bf16.mxu1 %v543_v25  ;;  %v550_v31 = vrot.slane %v4810_v7, 1  ;;  %v327_v1 = vadd.f32 %v4570_v9, %v278_v11  ;;  %v4833_v37 = vshll.u32 %v4821_v28, 16  ;;  %v4836_v41 = vshrl.u32 %v4821_v28, 16  ;;  %v4443_v11 = vld [vmem:[%s5952_s1 + $0x88] sm:$0xff]   ;;  %v4445_v7 = vld [vmem:[%s5952_s1 + $0x80] sm:$0xff]  }
  0x3b   : > { %6047 = vst [vmem:[#allocation25_spill] sm:$0xff] %v4824_v38  ;;  %4041 = vmatprep.subr.bf16.mxu0 %v4440_v36  ;;  %v328_v50 = vadd.f32 %v4570_v9, %v279_v21  ;;  %v352_v4 = vmax.f32 %v310_v5, 0.0  ;;  %v281_v25 = vmul.f32 %v4565_v8, %v232_v20  ;;  %v329_v16 = vadd.f32 %v4570_v9, %v280_v51 }
  0x3c   : > { %v551_v2 = vsel %vm435_vm0, %v546_v29, %v550_v31  ;;  %v369_v63 = vmax.f32 %v327_v1, 0.0  ;;  %v554_v10 = vor.u32 %v4824_v38, %v550_v31  ;;  %v478_v21 = vrot.slane %v4833_v37, 1  ;;  %v233_v29 = vld [vmem:[%s4553_s26 + $0x110] sm:$0xff] }
  0x3d   : > { %3990 = vmatpush3.bf16.msra.mxu1 %v4439_v26  ;;  %4042 = vmatpush3.bf16.msra.mxu0 %v4440_v36  ;;  %v370_v62 = vmax.f32 %v328_v50, 0.0  ;;  %v4444_v26 = vld [vmem:[%s5952_s1 + $0x8] sm:$0xff]   ;;  %v4854_v5 = vpack.c.bf16 %v352_v4, %v351_v14  ;;  %v262_v31 = vmul.f32 %v4565_v8, %v213_v23  ;;  %v263_v1 = vmul.f32 %v4565_v8, %v214_v59  ;;  %v234_v36 = vld [vmem:[%s4553_s26 + $0x118] sm:$0xff] }
  0x3e   : > { %3970 = vmatmul.mubr.bf16.gmra.mxu1 %v551_v2  ;;  %3991 = vmatprep.subr.bf16.mxu1 %v4441_v22  ;;  %v479_v20 = vsel %vm435_vm0, %v474_v60, %v478_v21  ;;  %v482_v51 = vor.u32 %v4836_v41, %v478_v21  ;;  %v330_v18 = vadd.f32 %v4570_v9, %v281_v25  ;;  %v371_v4 = vmax.f32 %v329_v16, 0.0  ;;  %v4446_v60 = vld [vmem:[%s5952_s1] sm:$0xff]  }
  0x3f   : > { %4043 = vmatprep.subr.bf16.mxu0 %v4442_v34  ;;  %v4862_v2 = vpack.c.bf16 %v370_v62, %v369_v63  ;;  %3953 = vmatprep.mubr.bf16.mxu0 %v479_v20  ;;  %v4866_v14 = vshll.u32 %v4854_v5, 16  ;;  %v311_v23 = vadd.f32 %v4570_v9, %v262_v31  ;;  %v312_v59 = vadd.f32 %v4570_v9, %v263_v1  ;;  %v236_v20 = vld [vmem:[%s4553_s26 + $0x128] sm:$0xff] }
  0x40   : > { %v372_v21 = vmax.f32 %v330_v18, 0.0  ;;  %v4881_v16 = vshrl.u32 %v4854_v5, 16  ;;  %v282_v1 = vmul.f32 %v4565_v8, %v233_v29  ;;  %v283_v18 = vmul.f32 %v4565_v8, %v234_v36 }
  0x41   : > { %6048 = vst [vmem:[#allocation26_spill] sm:$0xff] %v4862_v2  ;;  %3992 = vmatpush3.bf16.msra.mxu1 %v4441_v22  ;;  %v4875_v63 = vshll.u32 %v4862_v2, 16  ;;  %v4878_v62 = vshrl.u32 %v4862_v2, 16  ;;  %4044 = vmatpush3.bf16.msra.mxu0 %v4442_v34  ;;  %v486_v22 = vrot.slane %v4866_v14, 1  ;;  %v353_v25 = vmax.f32 %v311_v23, 0.0 }
  0x42   : > { %3993 = vmatprep.subr.bf16.mxu1 %v4444_v26  ;;  %v354_v31 = vmax.f32 %v312_v59, 0.0  ;;  %4045 = vmatprep.subr.bf16.mxu0 %v4443_v11  ;;  %v4887_v50 = vpack.c.bf16 %v372_v21, %v371_v4  ;;  %v284_v34 = vmul.f32 %v4565_v8, %v235_v58  ;;  %v331_v29 = vadd.f32 %v4570_v9, %v282_v1 }
  0x43   : > { %6049 = vst [vmem:[#allocation27_spill] sm:$0xff] %v4875_v63  ;;  %6050 = vst [vmem:[#allocation28_spill] sm:$0xff] %v4878_v62  ;;  %v558_v35 = vrot.slane %v4875_v63, 1  ;;  %v487_v38 = vsel %vm435_vm0, %v482_v51, %v486_v22  ;;  %v490_v59 = vor.u32 %v4881_v16, %v486_v22  ;;  %v332_v21 = vadd.f32 %v4570_v9, %v283_v18  ;;  %v4908_v51 = vld [vmem:[%s5952_s1 + $0xf8] sm:$0xff]  }
  0x44   : > { %6051 = vst [vmem:[#allocation29_spill] sm:$0xff] %v4887_v50  ;;  %v4895_v23 = vpack.c.bf16 %v354_v31, %v353_v25  ;;  %3954 = vmatmul.mubr.bf16.gmra.mxu0 %v487_v38  ;;  %v4902_v58 = vshll.u32 %v4887_v50, 16  ;;  %v285_v31 = vmul.f32 %v4565_v8, %v236_v20  ;;  %v333_v1 = vadd.f32 %v4570_v9, %v284_v34  ;;  %v4448_v18 = vld [vmem:[%s5952_s1 + $0x138] sm:$0xff]  }
  0x45   : > { %3994 = vmatpush3.bf16.msra.mxu1 %v4444_v26  ;;  %v559_v4 = vsel %vm435_vm0, %v554_v10, %v558_v35  ;;  %v562_v36 = vor.u32 %v4878_v62, %v558_v35  ;;  %4046 = vmatpush3.bf16.msra.mxu0 %v4443_v11  ;;  %v373_v35 = vmax.f32 %v331_v29, 0.0  ;;  %v4917_v10 = vshrl.u32 %v4887_v50, 16 }
  0x46   : > { %6052 = vst [vmem:[#allocation30_spill] sm:$0xff] %v4902_v58  ;;  %3995 = vmatprep.subr.bf16.mxu1 %v4446_v60  ;;  %3973 = vmatprep.mubr.bf16.mxu1 %v559_v4  ;;  %v4911_v22 = vshll.u32 %v4895_v23, 16  ;;  %v4914_v38 = vshrl.u32 %v4895_v23, 16  ;;  %v566_v26 = vrot.slane %v4902_v58, 1  ;;  %v374_v25 = vmax.f32 %v332_v21, 0.0 }
  0x47   : > { %6053 = vst [vmem:[#allocation31_spill] sm:$0xff] %v4917_v10  ;;  %4047 = vmatprep.subr.bf16.mxu0 %v4445_v7  ;;  %v334_v63 = vadd.f32 %v4570_v9, %v285_v31  ;;  %v375_v34 = vmax.f32 %v333_v1, 0.0  ;;  %v6055_v21 = vrot.slane %v4641_v3, 1  ;;  %v6056_v58 = vrot.slane %v4635_v0, 1 }
  0x48   : > { %v494_v4 = vrot.slane %v4911_v22, 1  ;;  %v567_v11 = vsel %vm435_vm0, %v562_v36, %v566_v26  ;;  %v4927_v29 = vpack.c.bf16 %v374_v25, %v373_v35  ;;  %v570_v36 = vor.u32 %v4917_v10, %v566_v26 }
  0x49   : > { %3996 = vmatpush3.bf16.msra.mxu1 %v4446_v60  ;;  %4048 = vmatpush3.bf16.msra.mxu0 %v4445_v7  ;;  %v1091_v60 = vsel %vm1088_vm1, %v6056_v58, %v6055_v21  ;;  %v376_v35 = vmax.f32 %v334_v63, 0.0  ;;  %v1092_v58 = vrot.slane %v4670_v30, 1 }
  0x4a   : > { %6054 = vst [vmem:[#allocation32_spill] sm:$0xff] %v4927_v29  ;;  %4085 = vmatprep.subr.bf16.mxu1 %v4908_v51  ;;  %3974 = vmatmul.mubr.bf16.gmra.mxu1 %v567_v11  ;;  %v495_v8 = vsel %vm435_vm0, %v490_v59, %v494_v4  ;;  %v498_v20 = vor.u32 %v4914_v38, %v494_v4  ;;  %v4940_v9 = vshll.u32 %v4927_v29, 16  ;;  %v4943_v25 = vshrl.u32 %v4927_v29, 16 }
  0x4b   : > { %3957 = vmatprep.mubr.bf16.mxu0 %v495_v8  ;;  %4137 = vmatprep.subr.bf16.mxu0 %v4448_v18  ;;  %v6059_v59 = vrot.slane %v4612_v48, 1  ;;  %v4949_v1 = vpack.c.bf16 %v376_v35, %v375_v34  ;;  %v1094_v11 = vrot.slane %v4736_v33, 1  ;;  %v6063_v35 = vshrl.u32 %v4641_v3, 16 }
  0x4c   : > { %6057 = vst [vmem:[#allocation33_spill] sm:$0xff] %v4940_v9  ;;  %6058 = vst [vmem:[#allocation34_spill] sm:$0xff] %v4943_v25  ;;  %v574_v31 = vrot.slane %v4940_v9, 1 }
  0x4d   : > { %v503_v7 = vsel %vm435_vm0, %v498_v20, %v6059_v59  ;;  %6060 = vst [vmem:[#allocation35_spill] sm:$0xff] %v4949_v1  ;;  %v4955_v4 = vshll.u32 %v4949_v1, 16  ;;  %v6062_v20 = vmov %v6055_v21  ;;  %v4450_v21 = vld [vmem:[%s5952_s1 + $0x130] sm:$0xff]   ;;  %v4975_v59 = vrot.slane %v6063_v35, 1 }
  0x4e   : > { %3958 = vmatmul.mubr.bf16.gmra.mxu0 %v503_v7  ;;  %v575_v26 = vsel %vm435_vm0, %v570_v36, %v574_v31  ;;  %v578_v63 = vor.u32 %v4943_v25, %v574_v31  ;;  %v4962_v34 = vsel %vm1088_vm1, %v6062_v20, %v1092_v58  ;;  %v4969_v36 = vsel %vm1088_vm1, %v1092_v58, %v1094_v11  ;;  %v4452_v58 = vld [vmem:[%s5952_s1 + $0x128] sm:$0xff]  }
  0x4f   : > { %4049 = vmatprep.mubr.bf16.mxu0 %v1091_v60  ;;  %6061 = vst [vmem:[#allocation36_spill] sm:$0xff] %v4955_v4  ;;  %3977 = vmatprep.mubr.bf16.mxu1 %v575_v26  ;;  %v582_v8 = vrot.slane %v4955_v4, 1  ;;  %v6064_v7 = vshll.u32 %v4641_v3, 16  ;;  %v1096_v26 = vrot.slane %v4757_v52, 1  ;;  %v1102_v35 = vrot.slane %v4895_v23, 1 }
  0x50   : > { %v5050_v4 = vld [vmem:[%s5954_s3] ss:$0 sm:$0xff] }
  0x51   : > { %v583_v60 = vsel %vm435_vm0, %v578_v63, %v582_v8  ;;  %v4979_v31 = vrot.slane %v6064_v7, 2  ;;  %v1098_v63 = vrot.slane %v4821_v28, 1  ;;  %v4990_v8 = vsel %vm1088_vm1, %v1094_v11, %v1096_v26  ;;  %6066 = vst [vmem:[#allocation38_spill] sm:$0xff] %v5050_v4 }
  0x52   : > { %3978 = vmatmul.mubr.bf16.gmra.mxu1 %v583_v60  ;;  %v4454_v60 = vld [vmem:[%s5952_s1 + $0x120] sm:$0xff]   ;;  %v1100_v11 = vrot.slane %v4854_v5, 1 }
  0x53   : > { %3997 = vmatprep.mubr.bf16.mxu1 %v4635_v0  ;;  %v4997_v20 = vsel %vm1088_vm1, %v1096_v26, %v1098_v63  ;;  %v4453_v26 = vld [vmem:[%s5952_s1 + $0xe0] sm:$0xff]   ;;  %v4458_v0 = vld [vmem:[%s5952_s1 + $0x110] sm:$0xff]  }
  0x54   : > { %v5015_v7 = vsel %vm1088_vm1, %v1098_v63, %v1100_v11  ;;  %v1104_v63 = vrot.slane %v4599_v39, 1 }
  0x56   : > { %4050 = vmatmul.mubr.bf16.vlgmr.msra.gmra.mxu0 %v4962_v34  ;;  %v5055_v25 = vsel %vm1088_vm1, %v1102_v35, %v1104_v63 }
  0x57   : > { %4138 = vmatpush3.bf16.msra.mxu0 %v4448_v18  ;;  %4053 = vmatprep.mubr.bf16.mxu0 %v4969_v36  ;;  %v4449_v18 = vld [vmem:[%s5952_s1 + $0xf0] sm:$0xff]  }
  0x58   : > { %4139 = vmatprep.subr.bf16.mxu0 %v4450_v21 }
  0x5a   : > { %3998 = vmatmul.mubr.bf16.vlgmr.msra.gmra.mxu1 %v4641_v3  ;;  %v237_v3 = vld [vmem:[%s4553_s26 + $0x130] sm:$0xff] }
  0x5b   : > { %4140 = vmatpush3.bf16.msra.mxu0 %v4450_v21  ;;  %4086 = vmatpush3.bf16.msra.mxu1 %v4908_v51  ;;  %v4451_v21 = vld [vmem:[%s5952_s1 + $0xe8] sm:$0xff]   ;;  %v4456_v51 = vld [vmem:[%s5952_s1 + $0x118] sm:$0xff]  }
  0x5c   : > { %4141 = vmatprep.subr.bf16.mxu0 %v4452_v58  ;;  %4001 = vmatprep.mubr.bf16.mxu1 %v4670_v30  ;;  %v4455_v30 = vld [vmem:[%s5952_s1 + $0xd8] sm:$0xff]  }
  0x5d   : > { %4087 = vmatprep.subr.bf16.mxu1 %v4449_v18 }
  0x5e   : > { %4054 = vmatmul.mubr.bf16.gmra.mxu0 %v4990_v8 }
  0x5f   : > { %4057 = vmatprep.mubr.bf16.mxu0 %v4997_v20  ;;  %4142 = vmatpush3.bf16.msra.mxu0 %v4452_v58  ;;  %v5024_v58 = vsel %vm1088_vm1, %v1100_v11, %v1102_v35  ;;  %v5036_v11 = vld [vmem:[%s5953_s2] ss:$0 sm:$0xff] }
  0x60   : > { %4143 = vmatprep.subr.bf16.mxu0 %v4454_v60  ;;  %4088 = vmatpush3.bf16.msra.mxu1 %v4449_v18  ;;  %v238_v18 = vld [vmem:[%s4553_s26 + $0x138] sm:$0xff]  ;;  %6065 = vst [vmem:[#allocation37_spill] sm:$0xff] %v5036_v11  ;;  %v4462_v35 = vld [vmem:[%s5952_s1 + $0x100] sm:$0xff]  }
  0x61   : > { %4089 = vmatprep.subr.bf16.mxu1 %v4451_v21 }
  0x62   : > { %4002 = vmatmul.mubr.bf16.gmra.mxu1 %v4736_v33  ;;  %v1106_v33 = vrot.slane %v4603_v42, 1 }
  0x63   : > { %4144 = vmatpush3.bf16.msra.mxu0 %v4454_v60  ;;  %4005 = vmatprep.mubr.bf16.mxu1 %v4757_v52  ;;  %v286_v60 = vmul.f32 %v5036_v11, %v237_v3  ;;  %v4460_v52 = vld [vmem:[%s5952_s1 + $0x108] sm:$0xff]  }
  0x64   : > { %4145 = vmatprep.subr.bf16.mxu0 %v4456_v51  ;;  %4090 = vmatpush3.bf16.msra.mxu1 %v4451_v21  ;;  %v287_v21 = vmul.f32 %v5036_v11, %v238_v18  ;;  %v5058_v18 = vsel %vm1088_vm1, %v1104_v63, %v1106_v33  ;;  %v4457_v11 = vld [vmem:[%s5952_s1 + $0xd0] sm:$0xff]   ;;  %v1108_v63 = vrot.slane %v4605_v43, 1 }
  0x65   : > { %4091 = vmatprep.subr.bf16.mxu1 %v4453_v26  ;;  %v335_v3 = vadd.f32 %v5050_v4, %v286_v60  ;;  %v1124_v60 = vrot.slane %v4949_v1, 1 }
  0x66   : > { %4058 = vmatmul.mubr.bf16.gmra.mxu0 %v5015_v7  ;;  %v336_v9 = vadd.f32 %v5050_v4, %v287_v21  ;;  %v1118_v4 = vrot.slane %v4862_v2, 1 }
  0x67   : > { %4061 = vmatprep.mubr.bf16.mxu0 %v5024_v58  ;;  %4146 = vmatpush3.bf16.msra.mxu0 %v4456_v51  ;;  %v377_v51 = vmax.f32 %v335_v3, 0.0  ;;  %v5088_v3 = vsel %vm1088_vm1, %v1106_v33, %v1108_v63  ;;  %v1112_v33 = vrot.slane %v4719_v15, 1 }
  0x68   : > { %4147 = vmatprep.subr.bf16.mxu0 %v4458_v0  ;;  %4092 = vmatpush3.bf16.msra.mxu1 %v4453_v26  ;;  %v378_v10 = vmax.f32 %v336_v9, 0.0  ;;  %v1110_v9 = vrot.slane %v4700_v61, 1 }
  0x69   : > { %4093 = vmatprep.subr.bf16.mxu1 %v4455_v30 }
  0x6a   : > { %4006 = vmatmul.mubr.bf16.gmra.mxu1 %v4821_v28  ;;  %v5069_v26 = vpack.c.bf16 %v378_v10, %v377_v51  ;;  %v5082_v10 = vld [vmem:[%s5952_s1 + $0x1b8] sm:$0xff]   ;;  %v5091_v51 = vsel %vm1088_vm1, %v1108_v63, %v1110_v9  ;;  %v5109_v63 = vsel %vm1088_vm1, %v1110_v9, %v1112_v33 }
  0x6b   : > { %4148 = vmatpush3.bf16.msra.mxu0 %v4458_v0  ;;  %4009 = vmatprep.mubr.bf16.mxu1 %v4854_v5  ;;  %v4459_v0 = vld [vmem:[%s5952_s1 + $0xc8] sm:$0xff]  }
  0x6c   : > { %4149 = vmatprep.subr.bf16.mxu0 %v4460_v52  ;;  %6067 = vst [vmem:[#allocation39_spill] sm:$0xff] %v5069_v26  ;;  %4094 = vmatpush3.bf16.msra.mxu1 %v4455_v30  ;;  %v1423_v21 = vrot.slane %v5069_v26, 1 }
  0x6d   : > { %4095 = vmatprep.subr.bf16.mxu1 %v4457_v11 }
  0x6e   : > { %4062 = vmatmul.mubr.bf16.gmra.mxu0 %v5055_v25  ;;  %v5085_v30 = vsel %vm1088_vm1, %v1124_v60, %v1423_v21 }
  0x6f   : > { %4065 = vmatprep.mubr.bf16.mxu0 %v5058_v18  ;;  %4150 = vmatpush3.bf16.msra.mxu0 %v4460_v52  ;;  %v4461_v52 = vld [vmem:[%s5952_s1 + $0xc0] sm:$0xff]  }
  0x70   : > { %4151 = vmatprep.subr.bf16.mxu0 %v4462_v35  ;;  %4096 = vmatpush3.bf16.msra.mxu1 %v4457_v11  ;;  %v1114_v11 = vrot.slane %v4777_v19, 1 }
  0x71   : > { %4097 = vmatprep.subr.bf16.mxu1 %v4459_v0 }
  0x72   : > { %4010 = vmatmul.mubr.bf16.gmra.mxu1 %v4895_v23  ;;  %v5112_v21 = vsel %vm1088_vm1, %v1112_v33, %v1114_v11  ;;  %v1120_v33 = vrot.slane %v4887_v50, 1 }
  0x73   : > { %4152 = vmatpush3.bf16.msra.mxu0 %v4462_v35  ;;  %4013 = vmatprep.mubr.bf16.mxu1 %v4599_v39  ;;  %v5106_v35 = vld [vmem:[%s5952_s1 + $0x178] sm:$0xff]   ;;  %v1713_v39 = vrot.slane %v4747_v46, 2 }
  0x74   : > { %4241 = vmatprep.subr.bf16.mxu0 %v5082_v10  ;;  %4098 = vmatpush3.bf16.msra.mxu1 %v4459_v0  ;;  %v1116_v0 = vrot.slane %v4802_v56, 1 }
  0x75   : > { %4099 = vmatprep.subr.bf16.mxu1 %v4461_v52 }
  0x76   : > { %4066 = vmatmul.mubr.bf16.gmra.mxu0 %v5088_v3  ;;  %v5122_v9 = vsel %vm1088_vm1, %v1114_v11, %v1116_v0 }
  0x77   : > { %4069 = vmatprep.mubr.bf16.mxu0 %v5091_v51 }
  0x78   : > { %4100 = vmatpush3.bf16.msra.mxu1 %v4461_v52  ;;  %v5125_v52 = vsel %vm1088_vm1, %v1116_v0, %v1118_v4  ;;  %v1708_v0 = vrot.slane %v4694_v57, 1 }
  0x79   : > { %4189 = vmatprep.subr.bf16.mxu1 %v5106_v35 }
  0x7a   : > { %4014 = vmatmul.mubr.bf16.gmra.mxu1 %v4603_v42  ;;  %v5134_v42 = vsel %vm1088_vm1, %v1118_v4, %v1120_v33 }
  0x7b   : > { %4017 = vmatprep.mubr.bf16.mxu1 %v4605_v43  ;;  %v1122_v43 = vrot.slane %v4927_v29, 1 }
  0x7d   : > { %v5137_v11 = vsel %vm1088_vm1, %v1120_v33, %v1122_v43  ;;  %v5146_v4 = vsel %vm1088_vm1, %v1122_v43, %v1124_v60  ;;  %v1712_v33 = vrot.slane %v4750_v47, 1 }
  0x7e   : > { %4070 = vmatmul.mubr.bf16.gmra.mxu0 %v5109_v63 }
  0x7f   : > { %4073 = vmatprep.mubr.bf16.mxu0 %v5112_v21  ;;  %v1714_v43 = vor.u32 %v1713_v39, %v1712_v33  ;;  %v4465_v33 = vld [vmem:[%s5952_s1 + $0x170] sm:$0xff]  }
  0x82   : > { %4018 = vmatmul.mubr.bf16.gmra.mxu1 %v4700_v61  ;;  %v1709_v61 = vrot.slane %v4686_v45, 2  ;;  %v6068_v45 = vor.u32 %v4979_v31, %v4975_v59  ;;  %v1721_v59 = vrot.slane %v4833_v37, 2  ;;  %v4466_v31 = vld [vmem:[%s5952_s1 + $0x1b0] sm:$0xff]  }
  0x83   : > { %4021 = vmatprep.mubr.bf16.mxu1 %v4719_v15 }
  0x84   : > { %v1710_v15 = vor.u32 %v1709_v61, %v1708_v0  ;;  %v1720_v0 = vrot.slane %v4836_v41, 1 }
  0x86   : > { %4074 = vmatmul.mubr.bf16.gmra.mxu0 %v5122_v9  ;;  %v1711_v57 = vsel %vm1704_vm2, %v6068_v45, %v1710_v15  ;;  %v1715_v60 = vsel %vm1704_vm2, %v1710_v15, %v1714_v43  ;;  %v1722_v39 = vor.u32 %v1721_v59, %v1720_v0  ;;  %v4468_v15 = vld [vmem:[%s5952_s1 + $0x1a8] sm:$0xff]  }
  0x87   : > { %4077 = vmatprep.mubr.bf16.mxu0 %v5125_v52  ;;  %v4467_v59 = vld [vmem:[%s5952_s1 + $0x168] sm:$0xff]  }
  0x8a   : > { %4022 = vmatmul.mubr.bf16.gmra.mxu1 %v4777_v19  ;;  %v1716_v19 = vrot.slane %v4798_v44, 1 }
  0x8b   : > { %4025 = vmatprep.mubr.bf16.mxu1 %v4802_v56  ;;  %v1717_v56 = vrot.slane %v4769_v6, 2  ;;  %v1724_v6 = vrot.slane %v4881_v16, 1 }
  0x8d   : > { %v1718_v61 = vor.u32 %v1717_v56, %v1716_v19 }
  0x8e   : > { %4078 = vmatmul.mubr.bf16.gmra.mxu0 %v5134_v42 }
  0x8f   : > { %4081 = vmatprep.mubr.bf16.mxu0 %v5137_v11  ;;  %v1719_v45 = vsel %vm1704_vm2, %v1714_v43, %v1718_v61  ;;  %v1723_v56 = vsel %vm1704_vm2, %v1718_v61, %v1722_v39  ;;  %v1728_v43 = vrot.slane %v4914_v38, 1  ;;  %v4470_v61 = vld [vmem:[%s5952_s1 + $0x1a0] sm:$0xff]  }
  0x92   : > { %4026 = vmatmul.mubr.bf16.gmra.mxu1 %v4862_v2 }
  0x93   : > { %4029 = vmatprep.mubr.bf16.mxu1 %v4887_v50 }
  0x96   : > { %4082 = vmatmul.mubr.bf16.gmra.mxu0 %v5146_v4 }
  0x97   : > { %4153 = vmatprep.mubr.bf16.mxu0 %v1711_v57  ;;  %v1725_v57 = vrot.slane %v4866_v14, 2 }
  0x99   : > { %v1726_v19 = vor.u32 %v1725_v57, %v1724_v6 }
  0x9a   : > { %4030 = vmatmul.mubr.bf16.gmra.mxu1 %v4927_v29 }
  0x9b   : > { %4101 = vmatprep.mubr.bf16.mxu1 %v4962_v34  ;;  %v1729_v34 = vrot.slane %v4911_v22, 2  ;;  %v1727_v6 = vsel %vm1704_vm2, %v1722_v39, %v1726_v19  ;;  %v4469_v39 = vld [vmem:[%s5952_s1 + $0x160] sm:$0xff]  }
  0x9d   : > { %v1730_v0 = vor.u32 %v1729_v34, %v1728_v43  ;;  %v4471_v34 = vld [vmem:[%s5952_s1 + $0x158] sm:$0xff]  }
  0x9e   : > { %4154 = vmatmul.mubr.bf16.vlgmr.msra.gmra.mxu0 %v1715_v60  ;;  %v1733_v60 = vrot.slane %v4612_v48, 2 }
  0x9f   : > { %4242 = vmatpush3.bf16.msra.mxu0 %v5082_v10  ;;  %4157 = vmatprep.mubr.bf16.mxu0 %v1719_v45  ;;  %v1732_v10 = vrot.slane %v4615_v49, 1 }
  0xa0   : > { %4243 = vmatprep.subr.bf16.mxu0 %v4466_v31 }
  0xa1   : > { %v1734_v45 = vor.u32 %v1733_v60, %v1732_v10  ;;  %v1745_v60 = vrot.slane %v4713_v12, 2 }
  0xa2   : > { %4102 = vmatmul.mubr.bf16.vlgmr.msra.gmra.mxu1 %v4969_v36  ;;  %v4472_v36 = vld [vmem:[%s5952_s1 + $0x198] sm:$0xff]  }
  0xa3   : > { %4244 = vmatpush3.bf16.msra.mxu0 %v4466_v31  ;;  %4190 = vmatpush3.bf16.msra.mxu1 %v5106_v35  ;;  %v1731_v35 = vsel %vm1704_vm2, %v1726_v19, %v1730_v0  ;;  %v1737_v31 = vrot.slane %v4620_v53, 2  ;;  %v1735_v57 = vsel %vm1704_vm2, %v1730_v0, %v1734_v45  ;;  %v4474_v19 = vld [vmem:[%s5952_s1 + $0x190] sm:$0xff]   ;;  %v1749_v0 = vrot.slane %v4734_v32, 2 }
  0xa4   : > { %4245 = vmatprep.subr.bf16.mxu0 %v4468_v15  ;;  %4105 = vmatprep.mubr.bf16.mxu1 %v4990_v8  ;;  %v1736_v8 = vrot.slane %v4623_v54, 1 }
  0xa5   : > { %4191 = vmatprep.subr.bf16.mxu1 %v4465_v33 }
  0xa6   : > { %4158 = vmatmul.mubr.bf16.gmra.mxu0 %v1723_v56  ;;  %v1741_v56 = vrot.slane %v4626_v55, 2 }
  0xa7   : > { %4161 = vmatprep.mubr.bf16.mxu0 %v1727_v6  ;;  %4246 = vmatpush3.bf16.msra.mxu0 %v4468_v15  ;;  %v1740_v15 = vrot.slane %v4667_v27, 1  ;;  %v6110_v27 = vld [vmem:[#allocation10_spill] sm:$0xff] }
  0xa8   : > { %4247 = vmatprep.subr.bf16.mxu0 %v4470_v61  ;;  %4192 = vmatpush3.bf16.msra.mxu1 %v4465_v33  ;;  %v1738_v33 = vor.u32 %v1737_v31, %v1736_v8  ;;  %v4475_v8 = vld [vmem:[%s5952_s1 + $0x148] sm:$0xff]  }
  0xa9   : > { %4193 = vmatprep.subr.bf16.mxu1 %v4467_v59  ;;  %v1742_v43 = vor.u32 %v1741_v56, %v1740_v15  ;;  %v6069_v15 = vld [vmem:[#allocation25_spill] sm:$0xff] }
  0xaa   : > { %4106 = vmatmul.mubr.bf16.gmra.mxu1 %v4997_v20  ;;  %v4476_v20 = vld [vmem:[%s5952_s1 + $0x188] sm:$0xff]   ;;  %v1739_v10 = vsel %vm1704_vm2, %v1734_v45, %v1738_v33  ;;  %v4478_v45 = vld [vmem:[%s5952_s1 + $0x180] sm:$0xff]   ;;  %v1756_v56 = vrot.slane %v6069_v15, 1  ;;  %v4489_v15 = vld [vmem:[%s5952_s1 + $0x1d0] sm:$0xff]  }
  0xab   : > { %4248 = vmatpush3.bf16.msra.mxu0 %v4470_v61  ;;  %4109 = vmatprep.mubr.bf16.mxu1 %v5015_v7  ;;  %v1744_v7 = vrot.slane %v4716_v13, 1  ;;  %v1743_v6 = vsel %vm1704_vm2, %v1738_v33, %v1742_v43  ;;  %v1748_v61 = vrot.slane %v4739_v24, 1 }
  0xac   : > { %4249 = vmatprep.subr.bf16.mxu0 %v4472_v36  ;;  %4194 = vmatpush3.bf16.msra.mxu1 %v4467_v59  ;;  %v4473_v59 = vld [vmem:[%s5952_s1 + $0x150] sm:$0xff]  }
  0xad   : > { %4195 = vmatprep.subr.bf16.mxu1 %v4469_v39 }
  0xae   : > { %4162 = vmatmul.mubr.bf16.gmra.mxu0 %v1731_v35  ;;  %v1750_v35 = vor.u32 %v1749_v0, %v1748_v61 }
  0xaf   : > { %4165 = vmatprep.mubr.bf16.mxu0 %v1735_v57  ;;  %4250 = vmatpush3.bf16.msra.mxu0 %v4472_v36  ;;  %v1746_v36 = vor.u32 %v1745_v60, %v1744_v7  ;;  %v1753_v57 = vrot.slane %v4791_v40, 2  ;;  %v1760_v60 = vrot.slane %v4878_v62, 1 }
  0xb0   : > { %4251 = vmatprep.subr.bf16.mxu0 %v4474_v19  ;;  %4196 = vmatpush3.bf16.msra.mxu1 %v4469_v39 }
  0xb1   : > { %4197 = vmatprep.subr.bf16.mxu1 %v4471_v34  ;;  %v1747_v31 = vsel %vm1704_vm2, %v1742_v43, %v1746_v36  ;;  %v1751_v39 = vsel %vm1704_vm2, %v1746_v36, %v1750_v35 }
  0xb2   : > { %4110 = vmatmul.mubr.bf16.gmra.mxu1 %v5024_v58  ;;  %v5235_v58 = vld [vmem:[%s5952_s1 + $0x238] sm:$0xff]  }
  0xb3   : > { %4252 = vmatpush3.bf16.msra.mxu0 %v4474_v19  ;;  %4113 = vmatprep.mubr.bf16.mxu1 %v5055_v25  ;;  %v1752_v25 = vrot.slane %v4794_v17, 1  ;;  %v6070_v19 = vld [vmem:[#allocation24_spill] sm:$0xff] }
  0xb4   : > { %4253 = vmatprep.subr.bf16.mxu0 %v4476_v20  ;;  %4198 = vmatpush3.bf16.msra.mxu1 %v4471_v34  ;;  %v1757_v33 = vrot.slane %v6070_v19, 2  ;;  %v4477_v34 = vld [vmem:[%s5952_s1 + $0x140] sm:$0xff]   ;;  %v6094_v17 = vld [vmem:[#allocation20_spill] sm:$0xff] }
  0xb5   : > { %4199 = vmatprep.subr.bf16.mxu1 %v4473_v59  ;;  %v1754_v43 = vor.u32 %v1753_v57, %v1752_v25  ;;  %v6074_v25 = vld [vmem:[#allocation34_spill] sm:$0xff] }
  0xb6   : > { %4166 = vmatmul.mubr.bf16.gmra.mxu0 %v1739_v10  ;;  %v5252_v10 = vld [vmem:[%s5952_s1 + $0x1f8] sm:$0xff]   ;;  %v1768_v57 = vrot.slane %v6074_v25, 1 }
  0xb7   : > { %4169 = vmatprep.mubr.bf16.mxu0 %v1743_v6  ;;  %4254 = vmatpush3.bf16.msra.mxu0 %v4476_v20  ;;  %v1758_v20 = vor.u32 %v1757_v33, %v1756_v56  ;;  %v1755_v7 = vsel %vm1704_vm2, %v1750_v35, %v1754_v43 }
  0xb8   : > { %4255 = vmatprep.subr.bf16.mxu0 %v4478_v45  ;;  %4200 = vmatpush3.bf16.msra.mxu1 %v4473_v59  ;;  %v6073_v59 = vld [vmem:[#allocation30_spill] sm:$0xff] }
  0xb9   : > { %4201 = vmatprep.subr.bf16.mxu1 %v4475_v8  ;;  %v1759_v61 = vsel %vm1704_vm2, %v1754_v43, %v1758_v20 }
  0xba   : > { %4114 = vmatmul.mubr.bf16.gmra.mxu1 %v5058_v18  ;;  %v6071_v18 = vld [vmem:[#allocation27_spill] sm:$0xff] }
  0xbb   : > { %4256 = vmatpush3.bf16.msra.mxu0 %v4478_v45  ;;  %4117 = vmatprep.mubr.bf16.mxu1 %v5088_v3  ;;  %v1761_v6 = vrot.slane %v6071_v18, 2  ;;  %v6072_v3 = vld [vmem:[#allocation31_spill] sm:$0xff]  ;;  %v1765_v45 = vrot.slane %v6073_v59, 2 }
  0xbc   : > { %4345 = vmatprep.subr.bf16.mxu0 %v5235_v58  ;;  %4202 = vmatpush3.bf16.msra.mxu1 %v4475_v8  ;;  %v1764_v0 = vrot.slane %v6072_v3, 1  ;;  %v6005_v8 = vshrl.u32 %v4949_v1, 16  ;;  %v4487_v3 = vld [vmem:[%s5952_s1 + $0x1d8] sm:$0xff]  }
  0xbd   : > { %4203 = vmatprep.subr.bf16.mxu1 %v4477_v34  ;;  %v1762_v36 = vor.u32 %v1761_v6, %v1760_v60 }
  0xbe   : > { %4170 = vmatmul.mubr.bf16.gmra.mxu0 %v1747_v31  ;;  %v1766_v35 = vor.u32 %v1765_v45, %v1764_v0  ;;  %v6077_v45 = vld [vmem:[#allocation8_spill] sm:$0xff] }
  0xbf   : > { %4173 = vmatprep.mubr.bf16.mxu0 %v1751_v39  ;;  %v1763_v31 = vsel %vm1704_vm2, %v1758_v20, %v1762_v36  ;;  %v6075_v39 = vld [vmem:[#allocation33_spill] sm:$0xff]  ;;  %v6004_v20 = vshrl.u32 %v5069_v26, 16 }
  0xc0   : > { %4204 = vmatpush3.bf16.msra.mxu1 %v4477_v34  ;;  %v1769_v56 = vrot.slane %v6075_v39, 2  ;;  %v1767_v33 = vsel %vm1704_vm2, %v1762_v36, %v1766_v35  ;;  %v1774_v34 = vrot.slane %v6005_v8, 1  ;;  %v2085_v36 = vrot.slane %v6077_v45, 2  ;;  %v6087_v39 = vld [vmem:[#allocation4_spill] sm:$0xff] }
  0xc1   : > { %4293 = vmatprep.subr.bf16.mxu1 %v5252_v10  ;;  %v2101_v25 = vrot.slane %v6087_v39, 2 }
  0xc2   : > { %4118 = vmatmul.mubr.bf16.gmra.mxu1 %v5091_v51  ;;  %v6076_v51 = vld [vmem:[#allocation36_spill] sm:$0xff] }
  0xc3   : > { %4121 = vmatprep.mubr.bf16.mxu1 %v5109_v63  ;;  %v1775_v43 = vrot.slane %v6076_v51, 2  ;;  %v1770_v63 = vor.u32 %v1769_v56, %v1768_v57 }
  0xc5   : > { %v1776_v60 = vor.u32 %v1775_v43, %v1774_v34  ;;  %v1771_v6 = vsel %vm1704_vm2, %v1766_v35, %v1770_v63  ;;  %v2091_v43 = vrot.slane %v4821_v28, 2 }
  0xc6   : > { %4174 = vmatmul.mubr.bf16.gmra.mxu0 %v1755_v7  ;;  %v6003_v7 = vshll.u32 %v5069_v26, 16 }
  0xc7   : > { %4177 = vmatprep.mubr.bf16.mxu0 %v1759_v61  ;;  %v1781_v61 = vrot.slane %v6004_v20, 1 }
  0xc8   : > { %v1784_v0 = vrot.slane %v6003_v7, 2 }
  0xca   : > { %4122 = vmatmul.mubr.bf16.gmra.mxu1 %v5112_v21  ;;  %v1777_v21 = vsel %vm1704_vm2, %v1770_v63, %v1776_v60 }
  0xcb   : > { %4125 = vmatprep.mubr.bf16.mxu1 %v5122_v9  ;;  %v1785_v9 = vor.u32 %v1784_v0, %v1781_v61  ;;  %v4484_v61 = vld [vmem:[%s5952_s1 + $0x228] sm:$0xff]   ;;  %v2095_v0 = vrot.slane %v4895_v23, 2 }
  0xcd   : > { %v1786_v35 = vsel %vm1704_vm2, %v1776_v60, %v1785_v9 }
  0xce   : > { %4178 = vmatmul.mubr.bf16.gmra.mxu0 %v1763_v31  ;;  %v6078_v31 = vld [vmem:[#allocation16_spill] sm:$0xff] }
  0xcf   : > { %4181 = vmatprep.mubr.bf16.mxu0 %v1767_v33  ;;  %v2087_v57 = vrot.slane %v6078_v31, 2 }
  0xd1   : > { %v2088_v56 = vsel %vm2083_vm3, %v2085_v36, %v2087_v57 }
  0xd2   : > { %4126 = vmatmul.mubr.bf16.gmra.mxu1 %v5125_v52  ;;  %v6079_v52 = vld [vmem:[#allocation18_spill] sm:$0xff] }
  0xd3   : > { %4129 = vmatprep.mubr.bf16.mxu1 %v5134_v42  ;;  %v2089_v33 = vrot.slane %v6079_v52, 2  ;;  %v6080_v42 = vld [vmem:[#allocation6_spill] sm:$0xff] }
  0xd4   : > { %v2084_v34 = vrot.slane %v6080_v42, 2  ;;  %v6081_v42 = vld [vmem:[#allocation2_spill] sm:$0xff] }
  0xd5   : > { %v2090_v63 = vsel %vm2083_vm3, %v2087_v57, %v2089_v33  ;;  %v2092_v60 = vsel %vm2083_vm3, %v2089_v33, %v2091_v43  ;;  %v4486_v57 = vld [vmem:[%s5952_s1 + $0x220] sm:$0xff]  }
  0xd6   : > { %4182 = vmatmul.mubr.bf16.gmra.mxu0 %v1771_v6  ;;  %v2086_v6 = vsel %vm2083_vm3, %v2084_v34, %v2085_v36  ;;  %v2097_v34 = vrot.slane %v6081_v42, 2 }
  0xd7   : > { %4185 = vmatprep.mubr.bf16.mxu0 %v1777_v21 }
  0xd8   : > { %v2098_v7 = vsel %vm2083_vm3, %v2095_v0, %v2097_v34 }
  0xda   : > { %4130 = vmatmul.mubr.bf16.gmra.mxu1 %v5137_v11  ;;  %v4482_v11 = vld [vmem:[%s5952_s1 + $0x230] sm:$0xff]  }
  0xdb   : > { %4133 = vmatprep.mubr.bf16.mxu1 %v5146_v4  ;;  %v2093_v4 = vrot.slane %v4854_v5, 2 }
  0xdd   : > { %v2094_v21 = vsel %vm2083_vm3, %v2091_v43, %v2093_v4  ;;  %v2096_v36 = vsel %vm2083_vm3, %v2093_v4, %v2095_v0 }
  0xde   : > { %4186 = vmatmul.mubr.bf16.gmra.mxu0 %v1786_v35 }
  0xdf   : > { %4257 = vmatprep.mubr.bf16.mxu0 %v2088_v56 }
  0xe2   : > { %4134 = vmatmul.mubr.bf16.gmra.mxu1 %v5085_v30  ;;  %v4481_v30 = vld [vmem:[%s5952_s1 + $0x1f0] sm:$0xff]  }
  0xe3   : > { %4205 = vmatprep.mubr.bf16.mxu1 %v2086_v6 }
  0xe6   : > { %4258 = vmatmul.mubr.bf16.vlgmr.msra.gmra.mxu0 %v2090_v63 }
  0xe7   : > { %4346 = vmatpush3.bf16.msra.mxu0 %v5235_v58  ;;  %4261 = vmatprep.mubr.bf16.mxu0 %v2092_v60 }
  0xe8   : > { %4347 = vmatprep.subr.bf16.mxu0 %v4482_v11 }
  0xea   : > { %4206 = vmatmul.mubr.bf16.vlgmr.msra.gmra.mxu1 %v2088_v56  ;;  %v4483_v56 = vld [vmem:[%s5952_s1 + $0x1e8] sm:$0xff]  }
  0xeb   : > { %4348 = vmatpush3.bf16.msra.mxu0 %v4482_v11  ;;  %4294 = vmatpush3.bf16.msra.mxu1 %v5252_v10  ;;  %v6083_v11 = vld [vmem:[#allocation3_spill] sm:$0xff] }
  0xec   : > { %v5309_v9 = vpop.f32.mrf.mxu1  ;;  %v5311_v58 = vpop.f32.mrf.mxu0  ;;  %4349 = vmatprep.subr.bf16.mxu0 %v4484_v61  ;;  %4209 = vmatprep.mubr.bf16.mxu1 %v2090_v63  ;;  %v2099_v10 = vrot.slane %v6083_v11, 2  ;;  %v4488_v63 = vld [vmem:[%s5952_s1 + $0x218] sm:$0xff]  }
  0xed   : > { %4295 = vmatprep.subr.bf16.mxu1 %v4481_v30 }
  0xee   : > { %4262 = vmatmul.mubr.bf16.gmra.mxu0 %v2094_v21  ;;  %v5318_v35 = vpop.f32.mrf.mxu1  ;;  %v5320_v33 = vpop.f32.mrf.mxu0  ;;  %v2100_v51 = vsel %vm2083_vm3, %v2097_v34, %v2099_v10  ;;  %v2102_v62 = vsel %vm2083_vm3, %v2099_v10, %v2101_v25 }
  0xef   : > { %4265 = vmatprep.mubr.bf16.mxu0 %v2096_v36  ;;  %4350 = vmatpush3.bf16.msra.mxu0 %v4484_v61  ;;  %v4485_v61 = vld [vmem:[%s5952_s1 + $0x1e0] sm:$0xff]  }
  0xf0   : > { %v5326_v43 = vpop.f32.mrf.mxu1  ;;  %v5328_v6 = vpop.f32.mrf.mxu0  ;;  %4351 = vmatprep.subr.bf16.mxu0 %v4486_v57  ;;  %4296 = vmatpush3.bf16.msra.mxu1 %v4481_v30  ;;  %v4490_v30 = vld [vmem:[%s5952_s1 + $0x210] sm:$0xff]  }
  0xf1   : > { %6082 = vst [vmem:[#allocation8_spill] sm:$0xff] %v5326_v43  ;;  %4297 = vmatprep.subr.bf16.mxu1 %v4483_v56 }
  0xf2   : > { %v5334_v4 = vpop.f32.mrf.mxu1  ;;  %v5339_v8 = vpop.f32.mrf.mxu0  ;;  %4210 = vmatmul.mubr.bf16.gmra.mxu1 %v2092_v60 }
  0xf3   : > { %6084 = vst [vmem:[#allocation16_spill] sm:$0xff] %v5334_v4  ;;  %4352 = vmatpush3.bf16.msra.mxu0 %v4486_v57  ;;  %4213 = vmatprep.mubr.bf16.mxu1 %v2094_v21  ;;  %v6089_v57 = vld [vmem:[#allocation11_spill] sm:$0xff]  ;;  %v6103_v4 = vld [vmem:[#allocation38_spill] sm:$0xff] }
  0xf4   : > { %v5337_v20 = vpop.f32.mrf.mxu1  ;;  %4353 = vmatprep.subr.bf16.mxu0 %v4488_v63  ;;  %4298 = vmatpush3.bf16.msra.mxu1 %v4483_v56  ;;  %v2103_v60 = vrot.slane %v6089_v57, 2  ;;  %v4492_v21 = vld [vmem:[%s5952_s1 + $0x208] sm:$0xff]   ;;  %v2700_v57 = vrot.slane %v6110_v27, 2 }
  0xf5   : > { %6085 = vst [vmem:[#allocation18_spill] sm:$0xff] %v5337_v20  ;;  %4299 = vmatprep.subr.bf16.mxu1 %v4485_v61 }
  0xf6   : > { %4266 = vmatmul.mubr.bf16.gmra.mxu0 %v2098_v7  ;;  %v5348_v0 = vpop.f32.mrf.mxu1  ;;  %v2104_v19 = vsel %vm2083_vm3, %v2101_v25, %v2103_v60  ;;  %v6092_v25 = vld [vmem:[#allocation14_spill] sm:$0xff] }
  0xf7   : > { %6086 = vst [vmem:[#allocation6_spill] sm:$0xff] %v5348_v0  ;;  %4269 = vmatprep.mubr.bf16.mxu0 %v2100_v51  ;;  %v5353_v59 = vpop.f32.mrf.mxu0  ;;  %4354 = vmatpush3.bf16.msra.mxu0 %v4488_v63  ;;  %v4494_v63 = vld [vmem:[%s5952_s1 + $0x200] sm:$0xff]   ;;  %v240_v0 = vld [vmem:[%s4553_s26 + $0x148] sm:$0xff] }
  0xf8   : > { %v5351_v34 = vpop.f32.mrf.mxu1  ;;  %4355 = vmatprep.subr.bf16.mxu0 %v4490_v30  ;;  %4300 = vmatpush3.bf16.msra.mxu1 %v4485_v61  ;;  %v2105_v61 = vrot.slane %v6092_v25, 2 }
  0xf9   : > { %6088 = vst [vmem:[#allocation2_spill] sm:$0xff] %v5351_v34  ;;  %v5364_v18 = vpop.f32.mrf.mxu0  ;;  %4301 = vmatprep.subr.bf16.mxu1 %v4487_v3 }
  0xfa   : > { %v5362_v56 = vpop.f32.mrf.mxu1  ;;  %4214 = vmatmul.mubr.bf16.gmra.mxu1 %v2096_v36  ;;  %v4491_v36 = vld [vmem:[%s5952_s1 + $0x1c8] sm:$0xff]   ;;  %v2106_v32 = vsel %vm2083_vm3, %v2103_v60, %v2105_v61 }
  0xfb   : > { %6090 = vst [vmem:[#allocation3_spill] sm:$0xff] %v5362_v56  ;;  %4356 = vmatpush3.bf16.msra.mxu0 %v4490_v30  ;;  %4217 = vmatprep.mubr.bf16.mxu1 %v2098_v7  ;;  %v5376_v10 = vpop.f32.mrf.mxu0  ;;  %v2107_v30 = vrot.slane %v6094_v17, 2  ;;  %v6097_v60 = vld [vmem:[#allocation23_spill] sm:$0xff]  ;;  %v239_v17 = vld [vmem:[%s4553_s26 + $0x140] sm:$0xff]  ;;  %s4414_s26 = smul.u32 288, %s6163_s16 }
  0xfc   : > { %4357 = vmatprep.subr.bf16.mxu0 %v4492_v21  ;;  %4302 = vmatpush3.bf16.msra.mxu1 %v4487_v3 }
  0xfd   : > { %4303 = vmatprep.subr.bf16.mxu1 %v4489_v15  ;;  %v5385_v7 = vpop.f32.mrf.mxu0  ;;  %v2108_v3 = vsel %vm2083_vm3, %v2105_v61, %v2107_v30  ;;  %s5875_s11 = scalar_lea.vmem %s5955_s4, %s4414_s26 }
  0xfe   : > { %4270 = vmatmul.mubr.bf16.gmra.mxu0 %v2102_v62  ;;  %v5374_v56 = vpop.f32.mrf.mxu1 }
  0xff   : > { %6091 = vst [vmem:[#allocation4_spill] sm:$0xff] %v5374_v56  ;;  %4273 = vmatprep.mubr.bf16.mxu0 %v2104_v19  ;;  %4358 = vmatpush3.bf16.msra.mxu0 %v4492_v21 }
 0x100   : > { %v5379_v40 = vpop.f32.mrf.mxu1  ;;  %4359 = vmatprep.subr.bf16.mxu0 %v4494_v63  ;;  %4304 = vmatpush3.bf16.msra.mxu1 %v4489_v15  ;;  %v2109_v15 = vrot.slane %v6097_v60, 2 }
 0x101   : > { %6093 = vst [vmem:[#allocation40_spill] sm:$0xff] %v5379_v40  ;;  %4305 = vmatprep.subr.bf16.mxu1 %v4491_v36  ;;  %v4493_v40 = vld [vmem:[%s5952_s1 + $0x1c0] sm:$0xff]  }
 0x102   : > { %v5387_v56 = vpop.f32.mrf.mxu1  ;;  %4218 = vmatmul.mubr.bf16.gmra.mxu1 %v2100_v51  ;;  %v2110_v51 = vsel %vm2083_vm3, %v2107_v30, %v2109_v15 }
 0x103   : > { %6095 = vst [vmem:[#allocation41_spill] sm:$0xff] %v5387_v56  ;;  %4360 = vmatpush3.bf16.msra.mxu0 %v4494_v63  ;;  %4221 = vmatprep.mubr.bf16.mxu1 %v2102_v62  ;;  %v2111_v56 = vrot.slane %v4862_v2, 2  ;;  %v6100_v2 = vld [vmem:[#allocation37_spill] sm:$0xff] }
 0x104   : > { %v5394_v21 = vpop.f32.mrf.mxu0  ;;  %v5396_v24 = vpop.f32.mrf.mxu1  ;;  %4306 = vmatpush3.bf16.msra.mxu1 %v4491_v36  ;;  %v288_v25 = vmul.f32 %v6100_v2, %v239_v17 }
 0x105   : > { %6096 = vst [vmem:[#allocation42_spill] sm:$0xff] %v5396_v24  ;;  %4307 = vmatprep.subr.bf16.mxu1 %v4493_v40  ;;  %v2112_v24 = vsel %vm2083_vm3, %v2109_v15, %v2111_v56  ;;  %v2115_v15 = vrot.slane %v4927_v29, 2 }
 0x106   : > { %4274 = vmatmul.mubr.bf16.gmra.mxu0 %v2106_v32  ;;  %v5399_v61 = vpop.f32.mrf.mxu0  ;;  %v337_v12 = vadd.f32 %v6103_v4, %v288_v25  ;;  %v2117_v25 = vrot.slane %v4949_v1, 2 }
 0x107   : > { %4277 = vmatprep.mubr.bf16.mxu0 %v2108_v3 }
 0x108   : > { %v5402_v34 = vpop.f32.mrf.mxu0  ;;  %4308 = vmatpush3.bf16.msra.mxu1 %v4493_v40  ;;  %v2113_v40 = vrot.slane %v4887_v50, 2  ;;  %v379_v29 = vmax.f32 %v337_v12, 0.0 }
 0x10a   : > { %v5404_v63 = vpop.f32.mrf.mxu1  ;;  %v5409_v62 = vpop.f32.mrf.mxu0  ;;  %4222 = vmatmul.mubr.bf16.gmra.mxu1 %v2104_v19  ;;  %v2114_v17 = vsel %vm2083_vm3, %v2111_v56, %v2113_v40  ;;  %v2119_v56 = vrot.slane %v5069_v26, 2 }
 0x10b   : > { %6098 = vst [vmem:[#allocation43_spill] sm:$0xff] %v5404_v63  ;;  %4225 = vmatprep.mubr.bf16.mxu1 %v2106_v32  ;;  %v289_v63 = vmul.f32 %v6100_v2, %v240_v0  ;;  %v2116_v0 = vsel %vm2083_vm3, %v2113_v40, %v2115_v15 }
 0x10c   : > { %v5412_v36 = vpop.f32.mrf.mxu1  ;;  %v2120_v12 = vsel %vm2083_vm3, %v2117_v25, %v2119_v56 }
 0x10d   : > { %6099 = vst [vmem:[#allocation44_spill] sm:$0xff] %v5412_v36  ;;  %v338_v32 = vadd.f32 %v6103_v4, %v289_v63 }
 0x10e   : > { %v5414_v60 = vpop.f32.mrf.mxu0  ;;  %4278 = vmatmul.mubr.bf16.gmra.mxu0 %v2110_v51  ;;  %v5418_v20 = vpop.f32.mrf.mxu1 }
 0x10f   : > { %6101 = vst [vmem:[#allocation37_spill] sm:$0xff] %v5418_v20  ;;  %4281 = vmatprep.mubr.bf16.mxu0 %v2112_v24 }
 0x110   : > { %v5421_v30 = vpop.f32.mrf.mxu0  ;;  %v5424_v19 = vpop.f32.mrf.mxu1 }
 0x111   : > { %6102 = vst [vmem:[#allocation45_spill] sm:$0xff] %v5424_v19  ;;  %v380_v19 = vmax.f32 %v338_v32, 0.0 }
 0x112   : > { %v5426_v36 = vpop.f32.mrf.mxu0  ;;  %v5434_v20 = vpop.f32.mrf.mxu1  ;;  %4226 = vmatmul.mubr.bf16.gmra.mxu1 %v2108_v3  ;;  %v2118_v3 = vsel %vm2083_vm3, %v2115_v15, %v2117_v25  ;;  %v3078_v15 = vrot.slane %v6078_v31, 3  ;;  %v2704_v31 = vrot.slane %v4747_v46, 3  ;;  %v3080_v46 = vrot.slane %v6079_v52, 3 }
 0x113   : > { %6104 = vst [vmem:[#allocation38_spill] sm:$0xff] %v5434_v20  ;;  %4229 = vmatprep.mubr.bf16.mxu1 %v2110_v51  ;;  %v5442_v40 = vpack.c.bf16 %v380_v19, %v379_v29 }
 0x114   : > { %v5431_v2 = vpop.f32.mrf.mxu0  ;;  %v5436_v13 = vpop.f32.mrf.mxu1 }
 0x115   : > { %6105 = vst [vmem:[#allocation46_spill] sm:$0xff] %v5436_v13  ;;  %6107 = vst [vmem:[#allocation48_spill] sm:$0xff] %v5442_v40  ;;  %v2418_v26 = vrot.slane %v5442_v40, 2 }
 0x116   : > { %v4051_v50 = vpop.f32.mrf.mxu0  ;;  %4282 = vmatmul.mubr.bf16.gmra.mxu0 %v2114_v17  ;;  %v5440_v63 = vpop.f32.mrf.mxu1 }
 0x117   : > { %4285 = vmatprep.mubr.bf16.mxu0 %v2116_v0  ;;  %6106 = vst [vmem:[#allocation47_spill] sm:$0xff] %v5440_v63 }
 0x118   : > { %v1226_v4 = vpop.f32.mrf.mxu0  ;;  %v5444_v20 = vpop.f32.mrf.mxu1 }
 0x119   : > { %6108 = vst [vmem:[#allocation49_spill] sm:$0xff] %v5444_v20  ;;  %v3077_v20 = vrot.slane %v6077_v45, 3  ;;  %v2703_v45 = vrot.slane %v4750_v47, 2 }
 0x11a   : > { %v4052_v43 = vpop.f32.mrf.mxu0  ;;  %v3999_v32 = vpop.f32.mrf.mxu1  ;;  %4230 = vmatmul.mubr.bf16.gmra.mxu1 %v2112_v24 }
 0x11b   : > { %v918_v13 = vadd.f32 %v3999_v32, %v5311_v58  ;;  %4233 = vmatprep.mubr.bf16.mxu1 %v2114_v17  ;;  %v2419_v17 = vsel %vm2083_vm3, %v2119_v56, %v2418_v26 }
 0x11c   : > { %v1229_v51 = vpop.f32.mrf.mxu0  ;;  %v909_v63 = vpop.f32.mrf.mxu1 }
 0x11d   : > { %v910_v29 = vadd.f32 %v909_v63, %v5320_v33  ;;  %v5453_v55 = vadd.f32 %v4051_v50, %v918_v13  ;;  %v6111_v33 = vld [vmem:[#allocation9_spill] sm:$0xff] }
 0x11e   : > { %v4055_v1 = vpop.f32.mrf.mxu0  ;;  %4286 = vmatmul.mubr.bf16.gmra.mxu0 %v2118_v3  ;;  %v4000_v25 = vpop.f32.mrf.mxu1  ;;  %v2701_v63 = vrot.slane %v6111_v33, 3  ;;  %v2711_v33 = vrot.slane %v4836_v41, 2 }
 0x11f   : > { %4289 = vmatprep.mubr.bf16.mxu0 %v2120_v12  ;;  %6109 = vst [vmem:[#allocation50_spill] sm:$0xff] %v5453_v55  ;;  %v921_v24 = vadd.f32 %v4000_v25, %v5328_v6  ;;  %v5457_v32 = vadd.f32 %v1226_v4, %v910_v29  ;;  %v3079_v55 = vsel %vm3076_vm4, %v3077_v20, %v3078_v15 }
 0x120   : > { %v1242_v19 = vpop.f32.mrf.mxu0  ;;  %v912_v40 = vpop.f32.mrf.mxu1  ;;  %v2702_v47 = vor.u32 %v2701_v63, %v2700_v57  ;;  %v3081_v57 = vsel %vm3076_vm4, %v3078_v15, %v3080_v46 }
 0x121   : > { %v913_v13 = vadd.f32 %v912_v40, %v5339_v8  ;;  %v5465_v6 = vadd.f32 %v4052_v43, %v921_v24  ;;  %v2705_v8 = vor.u32 %v2704_v31, %v2703_v45  ;;  %v3082_v43 = vrot.slane %v4821_v28, 3  ;;  %v6112_v24 = vld [vmem:[#allocation19_spill] sm:$0xff] }
 0x122   : > { %v4056_v58 = vpop.f32.mrf.mxu0  ;;  %v4003_v25 = vpop.f32.mrf.mxu1  ;;  %4234 = vmatmul.mubr.bf16.gmra.mxu1 %v2116_v0  ;;  %v2712_v28 = vrot.slane %v4833_v37, 3  ;;  %v3084_v37 = vrot.slane %v4854_v5, 3 }
 0x123   : > { %v934_v26 = vadd.f32 %v4003_v25, %v5353_v59  ;;  %4237 = vmatprep.mubr.bf16.mxu1 %v2118_v3  ;;  %v5468_v27 = vadd.f32 %v1229_v51, %v913_v13  ;;  %v2707_v51 = vrot.slane %v4798_v44, 2 }
 0x124   : > { %v1245_v50 = vpop.f32.mrf.mxu0  ;;  %v925_v56 = vpop.f32.mrf.mxu1 }
 0x125   : > { %v926_v40 = vadd.f32 %v925_v56, %v5364_v18  ;;  %v5473_v0 = vadd.f32 %v4055_v1, %v934_v26  ;;  %v2706_v18 = vsel %vm2699_vm5, %v2702_v47, %v2705_v8 }
 0x126   : > { %v4059_v4 = vpop.f32.mrf.mxu0  ;;  %4290 = vmatmul.mubr.bf16.gmra.mxu0 %v2419_v17  ;;  %v4004_v59 = vpop.f32.mrf.mxu1 }
 0x127   : > { %4361 = vmatprep.mubr.bf16.mxu0 %v3079_v55  ;;  %v937_v29 = vadd.f32 %v4004_v59, %v5376_v10  ;;  %v2708_v55 = vrot.slane %v6112_v24, 3  ;;  %v5478_v17 = vadd.f32 %v1242_v19, %v926_v40  ;;  %v3083_v10 = vsel %vm3076_vm4, %v3080_v46, %v3082_v43 }
 0x128   : > { %v1258_v20 = vpop.f32.mrf.mxu0  ;;  %v928_v52 = vpop.f32.mrf.mxu1  ;;  %v2716_v46 = vrot.slane %v4866_v14, 3 }
 0x129   : > { %v929_v1 = vadd.f32 %v928_v52, %v5385_v7  ;;  %v5486_v45 = vadd.f32 %v4056_v58, %v937_v29  ;;  %v2709_v15 = vor.u32 %v2708_v55, %v2707_v51  ;;  %v2713_v7 = vor.u32 %v2712_v28, %v2711_v33 }
 0x12a   : > { %v4060_v3 = vpop.f32.mrf.mxu0  ;;  %v4007_v44 = vpop.f32.mrf.mxu1  ;;  %4238 = vmatmul.mubr.bf16.gmra.mxu1 %v2120_v12  ;;  %v3086_v58 = vrot.slane %v4895_v23, 3  ;;  %v2719_v23 = vrot.slane %v4914_v38, 2 }
 0x12b   : > { %v950_v19 = vadd.f32 %v4007_v44, %v5394_v21  ;;  %4309 = vmatprep.mubr.bf16.mxu1 %v2706_v18  ;;  %v5489_v13 = vadd.f32 %v1245_v50, %v929_v1  ;;  %v2715_v21 = vrot.slane %v4881_v16, 2  ;;  %v2710_v47 = vsel %vm2699_vm5, %v2705_v8, %v2709_v15 }
 0x12c   : > { %v1261_v63 = vpop.f32.mrf.mxu0  ;;  %v941_v41 = vpop.f32.mrf.mxu1  ;;  %v2714_v29 = vsel %vm2699_vm5, %v2709_v15, %v2713_v7  ;;  %v3087_v14 = vsel %vm3076_vm4, %v3084_v37, %v3086_v58 }
 0x12d   : > { %v942_v25 = vadd.f32 %v941_v41, %v5399_v61  ;;  %v5494_v56 = vadd.f32 %v4059_v4, %v950_v19  ;;  %v3085_v61 = vsel %vm3076_vm4, %v3082_v43, %v3084_v37  ;;  %v2720_v4 = vrot.slane %v4911_v22, 3 }
 0x12e   : > { %v4063_v31 = vpop.f32.mrf.mxu0  ;;  %4362 = vmatmul.mubr.bf16.vlgmr.msra.gmra.mxu0 %v3081_v57  ;;  %v4008_v12 = vpop.f32.mrf.mxu1  ;;  %v3088_v22 = vrot.slane %v6081_v42, 3 }
 0x12f   : > { %4365 = vmatprep.mubr.bf16.mxu0 %v3083_v10  ;;  %v953_v50 = vadd.f32 %v4008_v12, %v5402_v34  ;;  %v5500_v59 = vadd.f32 %v1258_v20, %v942_v25  ;;  %v2717_v20 = vor.u32 %v2716_v46, %v2715_v21  ;;  %v2724_v10 = vrot.slane %v4612_v48, 3  ;;  %v6113_v21 = vld [vmem:[#allocation11_spill] sm:$0xff] }
 0x130   : > { %v1274_v26 = vpop.f32.mrf.mxu0  ;;  %v944_v5 = vpop.f32.mrf.mxu1  ;;  %v3094_v46 = vrot.slane %v6113_v21, 3 }
 0x131   : > { %v945_v16 = vadd.f32 %v944_v5, %v5409_v62  ;;  %v5508_v34 = vadd.f32 %v4060_v3, %v953_v50  ;;  %v2721_v62 = vor.u32 %v2720_v4, %v2719_v23  ;;  %v3090_v3 = vrot.slane %v6083_v11, 3  ;;  %v6115_v5 = vld [vmem:[#allocation5_spill] sm:$0xff] }
 0x132   : > { %v4064_v40 = vpop.f32.mrf.mxu0  ;;  %v4011_v8 = vpop.f32.mrf.mxu1  ;;  %4310 = vmatmul.mubr.bf16.vlgmr.msra.gmra.mxu1 %v2710_v47  ;;  %v2727_v11 = vrot.slane %v4623_v54, 2 }
 0x133   : > { %v966_v24 = vadd.f32 %v4011_v8, %v5414_v60  ;;  %4313 = vmatprep.mubr.bf16.mxu1 %v2714_v29  ;;  %v5511_v43 = vadd.f32 %v1261_v63, %v945_v16  ;;  %v2718_v60 = vsel %vm2699_vm5, %v2713_v7, %v2717_v20  ;;  %v2723_v63 = vrot.slane %v4615_v49, 2  ;;  %v6116_v29 = vld [vmem:[#allocation8_spill] sm:$0xff]  ;;  %v6117_v8 = vld [vmem:[#allocation13_spill] sm:$0xff] }
 0x134   : > { %v1277_v51 = vpop.f32.mrf.mxu0  ;;  %v957_v38 = vpop.f32.mrf.mxu1  ;;  %v2722_v19 = vsel %vm2699_vm5, %v2717_v20, %v2721_v62  ;;  %v2735_v20 = vrot.slane %v6117_v8, 2 }
 0x135   : > { %v958_v52 = vadd.f32 %v957_v38, %v5421_v30  ;;  %v5516_v18 = vadd.f32 %v4063_v31, %v966_v24  ;;  %v3089_v30 = vsel %vm3076_vm4, %v3086_v58, %v3088_v22  ;;  %v2728_v31 = vrot.slane %v4620_v53, 3  ;;  %v6118_v24 = vld [vmem:[#allocation12_spill] sm:$0xff] }
 0x136   : > { %v4067_v55 = vpop.f32.mrf.mxu0  ;;  %4366 = vmatmul.mubr.bf16.gmra.mxu0 %v3085_v61  ;;  %v4012_v33 = vpop.f32.mrf.mxu1  ;;  %v2725_v25 = vor.u32 %v2724_v10, %v2723_v63  ;;  %v3092_v53 = vrot.slane %v6087_v39, 3  ;;  %v2732_v61 = vrot.slane %v6115_v5, 3  ;;  %v6119_v38 = vld [vmem:[#allocation16_spill] sm:$0xff] }
 0x137   : > { %4369 = vmatprep.mubr.bf16.mxu0 %v3087_v14  ;;  %v969_v28 = vadd.f32 %v4012_v33, %v5426_v36  ;;  %v5522_v44 = vadd.f32 %v1274_v26, %v958_v52  ;;  %v3091_v36 = vsel %vm3076_vm4, %v3088_v22, %v3090_v3 }
 0x138   : > { %v1290_v57 = vpop.f32.mrf.mxu0  ;;  %v960_v42 = vpop.f32.mrf.mxu1  ;;  %v2726_v4 = vsel %vm2699_vm5, %v2721_v62, %v2725_v25  ;;  %v3095_v33 = vsel %vm3076_vm4, %v3092_v53, %v3094_v46 }
 0x139   : > { %v961_v15 = vadd.f32 %v960_v42, %v5431_v2  ;;  %v5530_v37 = vadd.f32 %v4064_v40, %v969_v28  ;;  %v2729_v2 = vor.u32 %v2728_v31, %v2727_v11  ;;  %v6120_v28 = vld [vmem:[#allocation18_spill] sm:$0xff] }
 0x13a   : > { %v4068_v1 = vpop.f32.mrf.mxu0  ;;  %v4015_v49 = vpop.f32.mrf.mxu1  ;;  %4314 = vmatmul.mubr.bf16.gmra.mxu1 %v2718_v60  ;;  %v6122_v31 = vld [vmem:[#allocation6_spill] sm:$0xff] }
 0x13b   : > { %v982_v48 = vadd.f32 %v4015_v49, %v5309_v9  ;;  %4317 = vmatprep.mubr.bf16.mxu1 %v2722_v19  ;;  %v5533_v26 = vadd.f32 %v1277_v51, %v961_v15  ;;  %v6114_v9 = vld [vmem:[#allocation7_spill] sm:$0xff]  ;;  %v2730_v14 = vsel %vm2699_vm5, %v2725_v25, %v2729_v2 }
 0x13c   : > { %v1293_v41 = vpop.f32.mrf.mxu0  ;;  %v973_v54 = vpop.f32.mrf.mxu1  ;;  %v2731_v40 = vrot.slane %v6114_v9, 2  ;;  %v6126_v9 = vld [vmem:[#allocation15_spill] sm:$0xff] }
 0x13d   : > { %v974_v58 = vadd.f32 %v973_v54, %v5318_v35  ;;  %v5538_v50 = vadd.f32 %v4067_v55, %v982_v48  ;;  %v3093_v35 = vsel %vm3076_vm4, %v3090_v3, %v3092_v53  ;;  %v2736_v55 = vrot.slane %v6118_v24, 3  ;;  %v6124_v53 = vld [vmem:[#allocation2_spill] sm:$0xff] }
 0x13e   : > { %v4071_v7 = vpop.f32.mrf.mxu0  ;;  %4370 = vmatmul.mubr.bf16.gmra.mxu0 %v3089_v30  ;;  %v4016_v47 = vpop.f32.mrf.mxu1  ;;  %v6121_v30 = vld [vmem:[#allocation14_spill] sm:$0xff] }
 0x13f   : > { %4373 = vmatprep.mubr.bf16.mxu0 %v3091_v36  ;;  %v985_v23 = vadd.f32 %v4016_v47, %v6116_v29  ;;  %v5544_v51 = vadd.f32 %v1290_v57, %v974_v58  ;;  %v2733_v57 = vor.u32 %v2732_v61, %v2731_v40  ;;  %v3096_v19 = vrot.slane %v6121_v30, 3 }
 0x140   : > { %v1306_v12 = vpop.f32.mrf.mxu0  ;;  %v976_v39 = vpop.f32.mrf.mxu1  ;;  %v2737_v11 = vor.u32 %v2736_v55, %v2735_v20  ;;  %v2740_v40 = vrot.slane %v6126_v9, 3 }
 0x141   : > { %v977_v22 = vadd.f32 %v976_v39, %v6119_v38  ;;  %v5552_v60 = vadd.f32 %v4068_v1, %v985_v23  ;;  %v6123_v1 = vld [vmem:[#allocation20_spill] sm:$0xff]  ;;  %v2734_v54 = vsel %vm2699_vm5, %v2729_v2, %v2733_v57  ;;  %v3097_v29 = vsel %vm3076_vm4, %v3094_v46, %v3096_v19  ;;  %v6128_v39 = vld [vmem:[#allocation21_spill] sm:$0xff] }
 0x142   : > { %v4072_v16 = vpop.f32.mrf.mxu0  ;;  %v4019_v62 = vpop.f32.mrf.mxu1  ;;  %4318 = vmatmul.mubr.bf16.gmra.mxu1 %v2726_v4  ;;  %v3098_v49 = vrot.slane %v6123_v1, 3  ;;  %v2738_v23 = vsel %vm2699_vm5, %v2733_v57, %v2737_v11  ;;  %v6127_v4 = vld [vmem:[#allocation22_spill] sm:$0xff]  ;;  %v6131_v57 = vld [vmem:[#allocation23_spill] sm:$0xff] }
 0x143   : > { %v998_v63 = vadd.f32 %v4019_v62, %v6120_v28  ;;  %4321 = vmatprep.mubr.bf16.mxu1 %v2730_v14  ;;  %v5555_v3 = vadd.f32 %v1293_v41, %v977_v22  ;;  %v6125_v41 = vld [vmem:[#allocation17_spill] sm:$0xff]  ;;  %v6129_v14 = vld [vmem:[#allocation3_spill] sm:$0xff]  ;;  %v3100_v28 = vrot.slane %v6131_v57, 3 }
 0x144   : > { %v1309_v52 = vpop.f32.mrf.mxu0  ;;  %v989_v42 = vpop.f32.mrf.mxu1  ;;  %v2739_v47 = vrot.slane %v6125_v41, 2  ;;  %v3099_v20 = vsel %vm3076_vm4, %v3096_v19, %v3098_v49  ;;  %v6136_v41 = vld [vmem:[#allocation41_spill] sm:$0xff] }
 0x145   : > { %v990_v15 = vadd.f32 %v989_v42, %v6122_v31  ;;  %v5560_v48 = vadd.f32 %v4071_v7, %v998_v63  ;;  %v2743_v7 = vrot.slane %v6127_v4, 2  ;;  %v6132_v42 = vld [vmem:[#allocation40_spill] sm:$0xff]  ;;  %v6141_v57 = vld [vmem:[#allocation29_spill] sm:$0xff] }
 0x146   : > { %v4075_v10 = vpop.f32.mrf.mxu0  ;;  %4374 = vmatmul.mubr.bf16.gmra.mxu0 %v3093_v35  ;;  %v4020_v25 = vpop.f32.mrf.mxu1  ;;  %v2744_v35 = vrot.slane %v6128_v39, 3  ;;  %v2741_v46 = vor.u32 %v2740_v40, %v2739_v47  ;;  %v6137_v4 = vld [vmem:[#allocation28_spill] sm:$0xff] }
 0x147   : > { %4377 = vmatprep.mubr.bf16.mxu0 %v3095_v33  ;;  %v1001_v58 = vadd.f32 %v4020_v25, %v6124_v53  ;;  %v5566_v5 = vadd.f32 %v1306_v12, %v990_v15  ;;  %v6130_v12 = vld [vmem:[#allocation4_spill] sm:$0xff]  ;;  %v6134_v25 = vld [vmem:[#allocation25_spill] sm:$0xff] }
 0x148   : > { %v1322_v36 = vpop.f32.mrf.mxu0  ;;  %v992_v61 = vpop.f32.mrf.mxu1  ;;  %v2745_v63 = vor.u32 %v2744_v35, %v2743_v7  ;;  %v6135_v53 = vld [vmem:[#allocation24_spill] sm:$0xff]  ;;  %v2742_v47 = vsel %vm2699_vm5, %v2737_v11, %v2741_v46  ;;  %v6138_v7 = vld [vmem:[#allocation27_spill] sm:$0xff]  ;;  %v6139_v35 = vld [vmem:[#allocation42_spill] sm:$0xff] }
 0x149   : > { %v993_v2 = vadd.f32 %v992_v61, %v6129_v14  ;;  %v5574_v24 = vadd.f32 %v4072_v16, %v1001_v58  ;;  %v6133_v16 = vld [vmem:[#allocation26_spill] sm:$0xff]  ;;  %v2748_v58 = vrot.slane %v6135_v53, 3  ;;  %v2752_v39 = vrot.slane %v6138_v7, 3 }
 0x14a   : > { %v4076_v21 = vpop.f32.mrf.mxu0  ;;  %v4023_v55 = vpop.f32.mrf.mxu1  ;;  %4322 = vmatmul.mubr.bf16.gmra.mxu1 %v2734_v54  ;;  %v3102_v31 = vrot.slane %v6133_v16, 3  ;;  %v2747_v54 = vrot.slane %v6134_v25, 2  ;;  %v6142_v16 = vld [vmem:[#allocation44_spill] sm:$0xff] }
 0x14b   : > { %v1014_v38 = vadd.f32 %v4023_v55, %v6130_v12  ;;  %4325 = vmatprep.mubr.bf16.mxu1 %v2738_v23  ;;  %v5577_v33 = vadd.f32 %v1309_v52, %v993_v2  ;;  %v2746_v23 = vsel %vm2699_vm5, %v2741_v46, %v2745_v63  ;;  %v6140_v12 = vld [vmem:[#allocation43_spill] sm:$0xff] }
 0x14c   : > { %v1325_v8 = vpop.f32.mrf.mxu0  ;;  %v1005_v62 = vpop.f32.mrf.mxu1 }
 0x14d   : > { %v1006_v30 = vadd.f32 %v1005_v62, %v6132_v42  ;;  %v5582_v15 = vadd.f32 %v4075_v10, %v1014_v38  ;;  %v2751_v10 = vrot.slane %v6137_v4, 2  ;;  %v3104_v42 = vrot.slane %v6141_v57, 3 }
 0x14e   : > { %v4079_v22 = vpop.f32.mrf.mxu0  ;;  %4378 = vmatmul.mubr.bf16.gmra.mxu0 %v3097_v29  ;;  %v4024_v1 = vpop.f32.mrf.mxu1  ;;  %v3101_v29 = vsel %vm3076_vm4, %v3098_v49, %v3100_v28 }
 0x14f   : > { %4381 = vmatprep.mubr.bf16.mxu0 %v3099_v20  ;;  %v1017_v52 = vadd.f32 %v4024_v1, %v6136_v41  ;;  %v5588_v40 = vadd.f32 %v1322_v36, %v1006_v30  ;;  %v3103_v20 = vsel %vm3076_vm4, %v3100_v28, %v3102_v31  ;;  %v2749_v36 = vor.u32 %v2748_v58, %v2747_v54  ;;  %v6144_v41 = vld [vmem:[#allocation37_spill] sm:$0xff] }
 0x150   : > { %v1338_v19 = vpop.f32.mrf.mxu0  ;;  %v1008_v61 = vpop.f32.mrf.mxu1  ;;  %v2753_v30 = vor.u32 %v2752_v39, %v2751_v10  ;;  %v3105_v7 = vsel %vm3076_vm4, %v3102_v31, %v3104_v42 }
 0x151   : > { %v1009_v14 = vadd.f32 %v1008_v61, %v6139_v35  ;;  %v5596_v55 = vadd.f32 %v4076_v21, %v1017_v52  ;;  %v6143_v21 = vld [vmem:[#allocation32_spill] sm:$0xff]  ;;  %v2750_v58 = vsel %vm2699_vm5, %v2745_v63, %v2749_v36  ;;  %v6147_v35 = vld [vmem:[#allocation34_spill] sm:$0xff] }
 0x152   : > { %v4080_v9 = vpop.f32.mrf.mxu0  ;;  %v4027_v11 = vpop.f32.mrf.mxu1  ;;  %4326 = vmatmul.mubr.bf16.gmra.mxu1 %v2742_v47  ;;  %v3106_v25 = vrot.slane %v6143_v21, 3  ;;  %v2754_v39 = vsel %vm2699_vm5, %v2749_v36, %v2753_v30 }
 0x153   : > { %v1030_v38 = vadd.f32 %v4027_v11, %v6140_v12  ;;  %4329 = vmatprep.mubr.bf16.mxu1 %v2746_v23  ;;  %v5599_v49 = vadd.f32 %v1325_v8, %v1009_v14  ;;  %v6145_v8 = vld [vmem:[#allocation31_spill] sm:$0xff]  ;;  %v6148_v14 = vld [vmem:[#allocation33_spill] sm:$0xff] }
 0x154   : > { %v1341_v2 = vpop.f32.mrf.mxu0  ;;  %v1021_v46 = vpop.f32.mrf.mxu1  ;;  %v2755_v61 = vrot.slane %v6145_v8, 2  ;;  %v6149_v11 = vld [vmem:[#allocation45_spill] sm:$0xff] }
 0x155   : > { %v1022_v1 = vadd.f32 %v1021_v46, %v6142_v16  ;;  %v5604_v53 = vadd.f32 %v4079_v22, %v1030_v38  ;;  %v2759_v22 = vrot.slane %v6147_v35, 2  ;;  %v3107_v38 = vsel %vm3076_vm4, %v3104_v42, %v3106_v25 }
 0x156   : > { %v4083_v62 = vpop.f32.mrf.mxu0  ;;  %4382 = vmatmul.mubr.bf16.gmra.mxu0 %v3101_v29  ;;  %v4028_v54 = vpop.f32.mrf.mxu1  ;;  %v6146_v29 = vld [vmem:[#allocation30_spill] sm:$0xff] }
 0x157   : > { %4385 = vmatprep.mubr.bf16.mxu0 %v3103_v20  ;;  %v1033_v52 = vadd.f32 %v4028_v54, %v6144_v41  ;;  %v2756_v23 = vrot.slane %v6146_v29, 3  ;;  %v5610_v4 = vadd.f32 %v1338_v19, %v1022_v1  ;;  %v2760_v20 = vrot.slane %v6148_v14, 3  ;;  %v6150_v19 = vld [vmem:[#allocation38_spill] sm:$0xff]  ;;  %v6151_v54 = vld [vmem:[#allocation35_spill] sm:$0xff] }
 0x158   : > { %v1354_v28 = vpop.f32.mrf.mxu0  ;;  %v1024_v10 = vpop.f32.mrf.mxu1  ;;  %v3108_v41 = vrot.slane %v6151_v54, 3  ;;  %v6152_v29 = vld [vmem:[#allocation46_spill] sm:$0xff]  ;;  %v6154_v14 = vshrl.u32 %v6151_v54, 16  ;;  %v6159_v54 = vld [vmem:[#allocation49_spill] sm:$0xff] }
 0x159   : > { %v1025_v63 = vadd.f32 %v1024_v10, %v6149_v11  ;;  %v5618_v46 = vadd.f32 %v4080_v9, %v1033_v52  ;;  %v2757_v31 = vor.u32 %v2756_v23, %v2755_v61  ;;  %v2761_v8 = vor.u32 %v2760_v20, %v2759_v22  ;;  %v6153_v9 = vld [vmem:[#allocation39_spill] sm:$0xff] }
 0x15a   : > { %v4084_v47 = vpop.f32.mrf.mxu0  ;;  %v4031_v57 = vpop.f32.mrf.mxu1  ;;  %4330 = vmatmul.mubr.bf16.gmra.mxu1 %v2750_v58  ;;  %v3110_v52 = vrot.slane %v6153_v9, 3  ;;  %v3109_v20 = vsel %vm3076_vm4, %v3106_v25, %v3108_v41 }
 0x15b   : > { %v1046_v16 = vadd.f32 %v4031_v57, %v6150_v19  ;;  %4333 = vmatprep.mubr.bf16.mxu1 %v2754_v39  ;;  %v5621_v36 = vadd.f32 %v1341_v2, %v1025_v63  ;;  %v6155_v39 = vld [vmem:[#allocation36_spill] sm:$0xff]  ;;  %v6156_v2 = vld [vmem:[#allocation47_spill] sm:$0xff]  ;;  %v2758_v11 = vsel %vm2699_vm5, %v2753_v30, %v2757_v31  ;;  %v2762_v57 = vsel %vm2699_vm5, %v2757_v31, %v2761_v8 }
 0x15c   : > { %v1357_v12 = vpop.f32.mrf.mxu0  ;;  %v1037_v21 = vpop.f32.mrf.mxu1  ;;  %v2764_v61 = vrot.slane %v6155_v39, 3  ;;  %v6160_v39 = vld [vmem:[#allocation50_spill] sm:$0xff]  ;;  %v6161_v31 = vld [vmem:[#allocation48_spill] sm:$0xff] }
 0x15d   : > { %v1038_v10 = vadd.f32 %v1037_v21, %v6152_v29  ;;  %v5626_v35 = vadd.f32 %v4083_v62, %v1046_v16  ;;  %v6157_v62 = vshrl.u32 %v6153_v9, 16  ;;  %v6158_v16 = vshll.u32 %v6153_v9, 16 }
 0x15e   : > { %v4155_v1 = vpop.f32.mrf.mxu0  ;;  %4386 = vmatmul.mubr.bf16.gmra.mxu0 %v3105_v7  ;;  %v4032_v58 = vpop.f32.mrf.mxu1  ;;  %v2763_v7 = vrot.slane %v6154_v14, 2  ;;  %v2775_v9 = vshll.u32 %v6161_v31, 16 }
 0x15f   : > { %4389 = vmatprep.mubr.bf16.mxu0 %v3107_v38  ;;  %v1049_v23 = vadd.f32 %v4032_v58, %v6156_v2  ;;  %v5633_v38 = vadd.f32 %v1354_v28, %v1038_v10  ;;  %v2767_v19 = vrot.slane %v6157_v62, 2  ;;  %v2768_v21 = vrot.slane %v6158_v16, 3 }
 0x160   : > { %v1887_v42 = vpop.f32.mrf.mxu0  ;;  %v1040_v22 = vpop.f32.mrf.mxu1  ;;  %v3111_v58 = vsel %vm3076_vm4, %v3108_v41, %v3110_v52  ;;  %v2765_v10 = vor.u32 %v2764_v61, %v2763_v7  ;;  %v2772_v62 = vshrl.u32 %v6161_v31, 16  ;;  %v3112_v41 = vrot.slane %v6161_v31, 3 }
 0x161   : > { %v1041_v29 = vadd.f32 %v1040_v22, %v6159_v54  ;;  %v5643_v30 = vadd.f32 %v4084_v47, %v1049_v23  ;;  %v2769_v47 = vor.u32 %v2768_v21, %v2767_v19 }
 0x162   : > { %v4156_v63 = vpop.f32.mrf.mxu0  ;;  %v4103_v28 = vpop.f32.mrf.mxu1  ;;  %4334 = vmatmul.mubr.bf16.gmra.mxu1 %v2758_v11 }
 0x163   : > { %v1653_v25 = vadd.f32 %v4103_v28, %v6160_v39  ;;  %4337 = vmatprep.mubr.bf16.mxu1 %v2762_v57  ;;  %v5648_v16 = vadd.f32 %v1357_v12, %v1041_v29  ;;  %v2774_v28 = vrot.slane %v2772_v62, 2  ;;  %v2777_v39 = vrot.slane %v2775_v9, 3 }
 0x164   : > { %v1890_v14 = vpop.f32.mrf.mxu0  ;;  %v1508_v22 = vpop.f32.mrf.mxu1  ;;  %v2770_v19 = vsel %vm2699_vm5, %v2765_v10, %v2769_v47 }
 0x165   : > { %v1651_v23 = vadd.f32 %v1508_v22, %v5457_v32  ;;  %v5652_v7 = vadd.f32 %v4155_v1, %v1653_v25  ;;  %v2778_v31 = vor.u32 %v2777_v39, %v2774_v28 }
 0x166   : > { %v4159_v2 = vpop.f32.mrf.mxu0  ;;  %4390 = vmatmul.mubr.bf16.gmra.mxu0 %v3109_v20  ;;  %v4104_v61 = vpop.f32.mrf.mxu1  ;;  %v2766_v20 = vsel %vm2699_vm5, %v2761_v8, %v2765_v10 }
 0x167   : > { %4393 = vmatprep.mubr.bf16.mxu0 %v3111_v58  ;;  %v1654_v57 = vadd.f32 %v4104_v61, %v5465_v6  ;;  %v5656_v12 = vadd.f32 %v1887_v42, %v1651_v23  ;;  %v3113_v58 = vsel %vm3076_vm4, %v3110_v52, %v3112_v41  ;;  %v2779_v22 = vsel %vm2699_vm5, %v2769_v47, %v2778_v31 }
 0x168   : > { %v1903_v11 = vpop.f32.mrf.mxu0  ;;  %v1511_v29 = vpop.f32.mrf.mxu1 }
 0x169   : > { %v1652_v32 = vadd.f32 %v1511_v29, %v5468_v27  ;;  %v5661_v1 = vadd.f32 %v4156_v63, %v1654_v57 }
 0x16a   : > { %v4160_v54 = vpop.f32.mrf.mxu0  ;;  %v4107_v25 = vpop.f32.mrf.mxu1  ;;  %4338 = vmatmul.mubr.bf16.gmra.mxu1 %v2766_v20 }
 0x16b   : > { %v1657_v8 = vadd.f32 %v4107_v25, %v5473_v0  ;;  %4341 = vmatprep.mubr.bf16.mxu1 %v2770_v19  ;;  %v5664_v42 = vadd.f32 %v1890_v14, %v1652_v32 }
 0x16c   : > { %v1906_v21 = vpop.f32.mrf.mxu0  ;;  %v1524_v62 = vpop.f32.mrf.mxu1 }
 0x16d   : > { %v1655_v52 = vadd.f32 %v1524_v62, %v5478_v17  ;;  %v5667_v10 = vadd.f32 %v4159_v2, %v1657_v8 }
 0x16e   : > { %v4163_v6 = vpop.f32.mrf.mxu0  ;;  %4394 = vmatmul.mubr.bf16.gmra.mxu0 %v3113_v58  ;;  %v4108_v27 = vpop.f32.mrf.mxu1 }
 0x16f   : > { %v1658_v63 = vadd.f32 %v4108_v27, %v5486_v45  ;;  %v5671_v23 = vadd.f32 %v1903_v11, %v1655_v52 }
 0x170   : > { %v1919_v9 = vpop.f32.mrf.mxu0  ;;  %v1527_v0 = vpop.f32.mrf.mxu1 }
 0x171   : > { %v1656_v61 = vadd.f32 %v1527_v0, %v5489_v13  ;;  %v5674_v14 = vadd.f32 %v4160_v54, %v1658_v63 }
 0x172   : > { %v4164_v41 = vpop.f32.mrf.mxu0  ;;  %v4111_v57 = vpop.f32.mrf.mxu1  ;;  %4342 = vmatmul.mubr.bf16.gmra.mxu1 %v2779_v22 }
 0x173   : > { %v1661_v17 = vadd.f32 %v4111_v57, %v5494_v56  ;;  %v5677_v28 = vadd.f32 %v1906_v21, %v1656_v61 }
 0x174   : > { %v1922_v20 = vpop.f32.mrf.mxu0  ;;  %v1540_v39 = vpop.f32.mrf.mxu1 }
 0x175   : > { %v1659_v45 = vadd.f32 %v1540_v39, %v5500_v59  ;;  %v5680_v29 = vadd.f32 %v4163_v6, %v1661_v17 }
 0x176   : > { %v4167_v2 = vpop.f32.mrf.mxu0  ;;  %v4112_v11 = vpop.f32.mrf.mxu1 }
 0x177   : > { %v1662_v58 = vadd.f32 %v4112_v11, %v5508_v34  ;;  %v5683_v19 = vadd.f32 %v1919_v9, %v1659_v45 }
 0x178   : > { %v1935_v47 = vpop.f32.mrf.mxu0  ;;  %v1543_v54 = vpop.f32.mrf.mxu1 }
 0x179   : > { %v1660_v32 = vadd.f32 %v1543_v54, %v5511_v43  ;;  %v5686_v56 = vadd.f32 %v4164_v41, %v1662_v58 }
 0x17a   : > { %v4168_v13 = vpop.f32.mrf.mxu0  ;;  %v4115_v21 = vpop.f32.mrf.mxu1 }
 0x17b   : > { %v1665_v8 = vadd.f32 %v4115_v21, %v5516_v18  ;;  %v5689_v59 = vadd.f32 %v1922_v20, %v1660_v32 }
 0x17c   : > { %v1938_v25 = vpop.f32.mrf.mxu0  ;;  %v1556_v6 = vpop.f32.mrf.mxu1 }
 0x17d   : > { %v1663_v62 = vadd.f32 %v1556_v6, %v5522_v44  ;;  %v5692_v34 = vadd.f32 %v4167_v2, %v1665_v8 }
 0x17e   : > { %v4171_v31 = vpop.f32.mrf.mxu0  ;;  %v4116_v9 = vpop.f32.mrf.mxu1 }
 0x17f   : > { %v1666_v27 = vadd.f32 %v4116_v9, %v5530_v37  ;;  %v5695_v43 = vadd.f32 %v1935_v47, %v1663_v62 }
 0x180   : > { %v1951_v52 = vpop.f32.mrf.mxu0  ;;  %v1559_v22 = vpop.f32.mrf.mxu1 }
 0x181   : > { %v1664_v41 = vadd.f32 %v1559_v22, %v5533_v26  ;;  %v5698_v18 = vadd.f32 %v4168_v13, %v1666_v27 }
 0x182   : > { %v4172_v63 = vpop.f32.mrf.mxu0  ;;  %v4119_v61 = vpop.f32.mrf.mxu1 }
 0x183   : > { %v1669_v20 = vadd.f32 %v4119_v61, %v5538_v50  ;;  %v5701_v44 = vadd.f32 %v1938_v25, %v1664_v41 }
 0x184   : > { %v1954_v0 = vpop.f32.mrf.mxu0  ;;  %v1572_v17 = vpop.f32.mrf.mxu1 }
 0x185   : > { %v1667_v2 = vadd.f32 %v1572_v17, %v5544_v51  ;;  %v5704_v37 = vadd.f32 %v4171_v31, %v1669_v20 }
 0x186   : > { %v4175_v57 = vpop.f32.mrf.mxu0  ;;  %v4120_v45 = vpop.f32.mrf.mxu1 }
 0x187   : > { %v1670_v47 = vadd.f32 %v4120_v45, %v5552_v60  ;;  %v5707_v26 = vadd.f32 %v1951_v52, %v1667_v2 }
 0x188   : > { %v1967_v39 = vpop.f32.mrf.mxu0  ;;  %v1575_v58 = vpop.f32.mrf.mxu1 }
 0x189   : > { %v1668_v13 = vadd.f32 %v1575_v58, %v5555_v3  ;;  %v5710_v50 = vadd.f32 %v4172_v63, %v1670_v47 }
 0x18a   : > { %v4176_v11 = vpop.f32.mrf.mxu0  ;;  %v4123_v32 = vpop.f32.mrf.mxu1 }
 0x18b   : > { %v1673_v25 = vadd.f32 %v4123_v32, %v5560_v48  ;;  %v5713_v51 = vadd.f32 %v1954_v0, %v1668_v13 }
 0x18c   : > { %v1970_v54 = vpop.f32.mrf.mxu0  ;;  %v1588_v8 = vpop.f32.mrf.mxu1 }
 0x18d   : > { %v1671_v31 = vadd.f32 %v1588_v8, %v5566_v5  ;;  %v5716_v60 = vadd.f32 %v4175_v57, %v1673_v25 }
 0x18e   : > { %v4179_v21 = vpop.f32.mrf.mxu0  ;;  %v4124_v62 = vpop.f32.mrf.mxu1 }
 0x18f   : > { %v1674_v52 = vadd.f32 %v4124_v62, %v5574_v24  ;;  %v5719_v3 = vadd.f32 %v1967_v39, %v1671_v31 }
 0x190   : > { %v1983_v6 = vpop.f32.mrf.mxu0  ;;  %v1591_v27 = vpop.f32.mrf.mxu1 }
 0x191   : > { %v1672_v63 = vadd.f32 %v1591_v27, %v5577_v33  ;;  %v5722_v48 = vadd.f32 %v4176_v11, %v1674_v52 }
 0x192   : > { %v4180_v9 = vpop.f32.mrf.mxu0  ;;  %v4127_v41 = vpop.f32.mrf.mxu1 }
 0x193   : > { %v1677_v0 = vadd.f32 %v4127_v41, %v5582_v15  ;;  %v5725_v5 = vadd.f32 %v1970_v54, %v1672_v63 }
 0x194   : > { %v1986_v22 = vpop.f32.mrf.mxu0  ;;  %v1604_v20 = vpop.f32.mrf.mxu1 }
 0x195   : > { %v1675_v57 = vadd.f32 %v1604_v20, %v5588_v40  ;;  %v5728_v24 = vadd.f32 %v4179_v21, %v1677_v0 }
 0x196   : > { %v4183_v61 = vpop.f32.mrf.mxu0  ;;  %v4128_v2 = vpop.f32.mrf.mxu1 }
 0x197   : > { %v1678_v39 = vadd.f32 %v4128_v2, %v5596_v55  ;;  %v5731_v33 = vadd.f32 %v1983_v6, %v1675_v57 }
 0x198   : > { %v1999_v17 = vpop.f32.mrf.mxu0  ;;  %v1607_v47 = vpop.f32.mrf.mxu1 }
 0x199   : > { %v1676_v11 = vadd.f32 %v1607_v47, %v5599_v49  ;;  %v5734_v15 = vadd.f32 %v4180_v9, %v1678_v39 }
 0x19a   : > { %v4184_v45 = vpop.f32.mrf.mxu0  ;;  %v4131_v13 = vpop.f32.mrf.mxu1 }
 0x19b   : > { %v1681_v54 = vadd.f32 %v4131_v13, %v5604_v53  ;;  %v5737_v40 = vadd.f32 %v1986_v22, %v1676_v11 }
 0x19c   : > { %v2002_v58 = vpop.f32.mrf.mxu0  ;;  %v1620_v25 = vpop.f32.mrf.mxu1 }
 0x19d   : > { %v1679_v21 = vadd.f32 %v1620_v25, %v5610_v4  ;;  %v5740_v55 = vadd.f32 %v4183_v61, %v1681_v54 }
 0x19e   : > { %v4187_v32 = vpop.f32.mrf.mxu0  ;;  %v4132_v31 = vpop.f32.mrf.mxu1 }
 0x19f   : > { %v1682_v6 = vadd.f32 %v4132_v31, %v5618_v46  ;;  %v5743_v49 = vadd.f32 %v1999_v17, %v1679_v21 }
 0x1a0   : > { %v2015_v8 = vpop.f32.mrf.mxu0  ;;  %v1623_v52 = vpop.f32.mrf.mxu1 }
 0x1a1   : > { %v1680_v9 = vadd.f32 %v1623_v52, %v5621_v36  ;;  %v5746_v53 = vadd.f32 %v4184_v45, %v1682_v6 }
 0x1a2   : > { %v4188_v62 = vpop.f32.mrf.mxu0  ;;  %v4135_v63 = vpop.f32.mrf.mxu1 }
 0x1a3   : > { %v1685_v22 = vadd.f32 %v4135_v63, %v5626_v35  ;;  %v5749_v4 = vadd.f32 %v2002_v58, %v1680_v9 }
 0x1a4   : > { %v2018_v27 = vpop.f32.mrf.mxu0  ;;  %v1636_v0 = vpop.f32.mrf.mxu1 }
 0x1a5   : > { %v1683_v61 = vadd.f32 %v1636_v0, %v5633_v38  ;;  %v5752_v46 = vadd.f32 %v4187_v32, %v1685_v22 }
 0x1a6   : > { %v4259_v41 = vpop.f32.mrf.mxu0  ;;  %v4136_v57 = vpop.f32.mrf.mxu1 }
 0x1a7   : > { %v1686_v17 = vadd.f32 %v4136_v57, %v5643_v30  ;;  %v5755_v36 = vadd.f32 %v2015_v8, %v1683_v61 }
 0x1a8   : > { %v2503_v20 = vpop.f32.mrf.mxu0  ;;  %v1639_v39 = vpop.f32.mrf.mxu1 }
 0x1a9   : > { %v1684_v45 = vadd.f32 %v1639_v39, %v5648_v16  ;;  %v5758_v35 = vadd.f32 %v4188_v62, %v1686_v17 }
 0x1aa   : > { %v4260_v2 = vpop.f32.mrf.mxu0  ;;  %v4207_v11 = vpop.f32.mrf.mxu1 }
 0x1ab   : > { %v2366_v58 = vadd.f32 %v4207_v11, %v5652_v7  ;;  %v5761_v38 = vadd.f32 %v2018_v27, %v1684_v45 }
 0x1ac   : > { %v2506_v47 = vpop.f32.mrf.mxu0  ;;  %v2221_v54 = vpop.f32.mrf.mxu1 }
 0x1ad   : > { %v2364_v32 = vadd.f32 %v2221_v54, %v5656_v12  ;;  %v5764_v30 = vadd.f32 %v4259_v41, %v2366_v58 }
 0x1ae   : > { %v4263_v13 = vpop.f32.mrf.mxu0  ;;  %v4208_v21 = vpop.f32.mrf.mxu1 }
 0x1af   : > { %v2367_v8 = vadd.f32 %v4208_v21, %v5661_v1  ;;  %v5767_v16 = vadd.f32 %v2503_v20, %v2364_v32 }
 0x1b0   : > { %v2519_v25 = vpop.f32.mrf.mxu0  ;;  %v2224_v6 = vpop.f32.mrf.mxu1 }
 0x1b1   : > { %v2365_v62 = vadd.f32 %v2224_v6, %v5664_v42  ;;  %v5770_v7 = vadd.f32 %v4260_v2, %v2367_v8 }
 0x1b2   : > { %v4264_v31 = vpop.f32.mrf.mxu0  ;;  %v4211_v9 = vpop.f32.mrf.mxu1 }
 0x1b3   : > { %v2370_v27 = vadd.f32 %v4211_v9, %v5667_v10  ;;  %v5773_v12 = vadd.f32 %v2506_v47, %v2365_v62 }
 0x1b4   : > { %v2522_v52 = vpop.f32.mrf.mxu0  ;;  %v2237_v22 = vpop.f32.mrf.mxu1 }
 0x1b5   : > { %v2368_v41 = vadd.f32 %v2237_v22, %v5671_v23  ;;  %v5776_v1 = vadd.f32 %v4263_v13, %v2370_v27 }
 0x1b6   : > { %v4267_v63 = vpop.f32.mrf.mxu0  ;;  %v4212_v61 = vpop.f32.mrf.mxu1 }
 0x1b7   : > { %v2371_v20 = vadd.f32 %v4212_v61, %v5674_v14  ;;  %v5779_v42 = vadd.f32 %v2519_v25, %v2368_v41 }
 0x1b8   : > { %v2535_v0 = vpop.f32.mrf.mxu0  ;;  %v2240_v17 = vpop.f32.mrf.mxu1 }
 0x1b9   : > { %v2369_v2 = vadd.f32 %v2240_v17, %v5677_v28  ;;  %v5782_v10 = vadd.f32 %v4264_v31, %v2371_v20 }
 0x1ba   : > { %v4268_v57 = vpop.f32.mrf.mxu0  ;;  %v4215_v45 = vpop.f32.mrf.mxu1 }
 0x1bb   : > { %v2374_v47 = vadd.f32 %v4215_v45, %v5680_v29  ;;  %v5785_v23 = vadd.f32 %v2522_v52, %v2369_v2 }
 0x1bc   : > { %v2538_v39 = vpop.f32.mrf.mxu0  ;;  %v2253_v58 = vpop.f32.mrf.mxu1 }
 0x1bd   : > { %v2372_v13 = vadd.f32 %v2253_v58, %v5683_v19  ;;  %v5788_v14 = vadd.f32 %v4267_v63, %v2374_v47 }
 0x1be   : > { %v4271_v11 = vpop.f32.mrf.mxu0  ;;  %v4216_v32 = vpop.f32.mrf.mxu1 }
 0x1bf   : > { %v2375_v25 = vadd.f32 %v4216_v32, %v5686_v56  ;;  %v5791_v28 = vadd.f32 %v2535_v0, %v2372_v13 }
 0x1c0   : > { %v2551_v54 = vpop.f32.mrf.mxu0  ;;  %v2256_v8 = vpop.f32.mrf.mxu1 }
 0x1c1   : > { %v2373_v31 = vadd.f32 %v2256_v8, %v5689_v59  ;;  %v5794_v29 = vadd.f32 %v4268_v57, %v2375_v25 }
 0x1c2   : > { %v4272_v21 = vpop.f32.mrf.mxu0  ;;  %v4219_v62 = vpop.f32.mrf.mxu1 }
 0x1c3   : > { %v2378_v52 = vadd.f32 %v4219_v62, %v5692_v34  ;;  %v5797_v19 = vadd.f32 %v2538_v39, %v2373_v31 }
 0x1c4   : > { %v2554_v6 = vpop.f32.mrf.mxu0  ;;  %v2269_v27 = vpop.f32.mrf.mxu1 }
 0x1c5   : > { %v2376_v63 = vadd.f32 %v2269_v27, %v5695_v43  ;;  %v5800_v56 = vadd.f32 %v4271_v11, %v2378_v52 }
 0x1c6   : > { %v4275_v9 = vpop.f32.mrf.mxu0  ;;  %v4220_v41 = vpop.f32.mrf.mxu1 }
 0x1c7   : > { %v2379_v0 = vadd.f32 %v4220_v41, %v5698_v18  ;;  %v5803_v59 = vadd.f32 %v2551_v54, %v2376_v63 }
 0x1c8   : > { %v2567_v22 = vpop.f32.mrf.mxu0  ;;  %v2272_v20 = vpop.f32.mrf.mxu1 }
 0x1c9   : > { %v2377_v57 = vadd.f32 %v2272_v20, %v5701_v44  ;;  %v5806_v34 = vadd.f32 %v4272_v21, %v2379_v0 }
 0x1ca   : > { %v4276_v61 = vpop.f32.mrf.mxu0  ;;  %v4223_v2 = vpop.f32.mrf.mxu1 }
 0x1cb   : > { %v2382_v39 = vadd.f32 %v4223_v2, %v5704_v37  ;;  %v5809_v43 = vadd.f32 %v2554_v6, %v2377_v57 }
 0x1cc   : > { %v2570_v17 = vpop.f32.mrf.mxu0  ;;  %v2285_v47 = vpop.f32.mrf.mxu1 }
 0x1cd   : > { %v2380_v11 = vadd.f32 %v2285_v47, %v5707_v26  ;;  %v5812_v18 = vadd.f32 %v4275_v9, %v2382_v39 }
 0x1ce   : > { %v4279_v45 = vpop.f32.mrf.mxu0  ;;  %v4224_v13 = vpop.f32.mrf.mxu1 }
 0x1cf   : > { %v2383_v54 = vadd.f32 %v4224_v13, %v5710_v50  ;;  %v5815_v44 = vadd.f32 %v2567_v22, %v2380_v11 }
 0x1d0   : > { %v2583_v58 = vpop.f32.mrf.mxu0  ;;  %v2288_v25 = vpop.f32.mrf.mxu1 }
 0x1d1   : > { %v2381_v21 = vadd.f32 %v2288_v25, %v5713_v51  ;;  %v5818_v37 = vadd.f32 %v4276_v61, %v2383_v54 }
 0x1d2   : > { %v4280_v32 = vpop.f32.mrf.mxu0  ;;  %v4227_v31 = vpop.f32.mrf.mxu1 }
 0x1d3   : > { %v2386_v6 = vadd.f32 %v4227_v31, %v5716_v60  ;;  %v5821_v26 = vadd.f32 %v2570_v17, %v2381_v21 }
 0x1d4   : > { %v2586_v8 = vpop.f32.mrf.mxu0  ;;  %v2301_v52 = vpop.f32.mrf.mxu1 }
 0x1d5   : > { %v2384_v9 = vadd.f32 %v2301_v52, %v5719_v3  ;;  %v5824_v50 = vadd.f32 %v4279_v45, %v2386_v6 }
 0x1d6   : > { %v4283_v62 = vpop.f32.mrf.mxu0  ;;  %v4228_v63 = vpop.f32.mrf.mxu1 }
 0x1d7   : > { %v2387_v22 = vadd.f32 %v4228_v63, %v5722_v48  ;;  %v5827_v51 = vadd.f32 %v2583_v58, %v2384_v9 }
 0x1d8   : > { %v2599_v27 = vpop.f32.mrf.mxu0  ;;  %v2304_v0 = vpop.f32.mrf.mxu1 }
 0x1d9   : > { %v2385_v61 = vadd.f32 %v2304_v0, %v5725_v5  ;;  %v5830_v60 = vadd.f32 %v4280_v32, %v2387_v22 }
 0x1da   : > { %v4284_v41 = vpop.f32.mrf.mxu0  ;;  %v4231_v57 = vpop.f32.mrf.mxu1 }
 0x1db   : > { %v2390_v17 = vadd.f32 %v4231_v57, %v5728_v24  ;;  %v5833_v3 = vadd.f32 %v2586_v8, %v2385_v61 }
 0x1dc   : > { %v2602_v20 = vpop.f32.mrf.mxu0  ;;  %v2317_v39 = vpop.f32.mrf.mxu1 }
 0x1dd   : > { %v2388_v45 = vadd.f32 %v2317_v39, %v5731_v33  ;;  %v5836_v48 = vadd.f32 %v4283_v62, %v2390_v17 }
 0x1de   : > { %v4287_v2 = vpop.f32.mrf.mxu0  ;;  %v4232_v11 = vpop.f32.mrf.mxu1 }
 0x1df   : > { %v2391_v58 = vadd.f32 %v4232_v11, %v5734_v15  ;;  %v5839_v5 = vadd.f32 %v2599_v27, %v2388_v45 }
 0x1e0   : > { %v2615_v47 = vpop.f32.mrf.mxu0  ;;  %v2320_v54 = vpop.f32.mrf.mxu1 }
 0x1e1   : > { %v2389_v32 = vadd.f32 %v2320_v54, %v5737_v40  ;;  %v5842_v24 = vadd.f32 %v4284_v41, %v2391_v58 }
 0x1e2   : > { %v4288_v13 = vpop.f32.mrf.mxu0  ;;  %v4235_v21 = vpop.f32.mrf.mxu1 }
 0x1e3   : > { %v2394_v8 = vadd.f32 %v4235_v21, %v5740_v55  ;;  %v5845_v33 = vadd.f32 %v2602_v20, %v2389_v32 }
 0x1e4   : > { %v2618_v25 = vpop.f32.mrf.mxu0  ;;  %v2333_v6 = vpop.f32.mrf.mxu1 }
 0x1e5   : > { %v2392_v62 = vadd.f32 %v2333_v6, %v5743_v49  ;;  %v5848_v15 = vadd.f32 %v4287_v2, %v2394_v8 }
 0x1e6   : > { %v4291_v31 = vpop.f32.mrf.mxu0  ;;  %v4236_v9 = vpop.f32.mrf.mxu1 }
 0x1e7   : > { %v2395_v27 = vadd.f32 %v4236_v9, %v5746_v53  ;;  %v5851_v40 = vadd.f32 %v2615_v47, %v2392_v62 }
 0x1e8   : > { %v2631_v52 = vpop.f32.mrf.mxu0  ;;  %v2336_v22 = vpop.f32.mrf.mxu1 }
 0x1e9   : > { %v2393_v41 = vadd.f32 %v2336_v22, %v5749_v4  ;;  %v5854_v0 = vadd.f32 %v4288_v13, %v2395_v27 }
 0x1ea   : > { %v4292_v63 = vpop.f32.mrf.mxu0  ;;  %v4239_v61 = vpop.f32.mrf.mxu1 }
 0x1eb   : > { %v2398_v20 = vadd.f32 %v4239_v61, %v5752_v46  ;;  %v5857_v57 = vadd.f32 %v2618_v25, %v2393_v41 }
 0x1ec   : > { %v2634_v55 = vpop.f32.mrf.mxu0  ;;  %v2349_v17 = vpop.f32.mrf.mxu1 }
 0x1ed   : > { %v2396_v2 = vadd.f32 %v2349_v17, %v5755_v36  ;;  %v5860_v39 = vadd.f32 %v4291_v31, %v2398_v20 }
 0x1ee   : > { %v4363_v49 = vpop.f32.mrf.mxu0  ;;  %v4240_v45 = vpop.f32.mrf.mxu1 }
 0x1ef   : > { %v2399_v47 = vadd.f32 %v4240_v45, %v5758_v35  ;;  %v5863_v11 = vadd.f32 %v2631_v52, %v2396_v2 }
 0x1f0   : > { %v3214_v53 = vpop.f32.mrf.mxu0  ;;  %v2352_v58 = vpop.f32.mrf.mxu1 }
 0x1f1   : > { %v2397_v13 = vadd.f32 %v2352_v58, %v5761_v38  ;;  %v5867_v54 = vadd.f32 %v4292_v63, %v2399_v47 }
 0x1f2   : > { %v4364_v4 = vpop.f32.mrf.mxu0  ;;  %v4311_v32 = vpop.f32.mrf.mxu1 }
 0x1f3   : > { %v3025_v25 = vadd.f32 %v4311_v32, %v5764_v30  ;;  %v5870_v21 = vadd.f32 %v2634_v55, %v2397_v13 }
 0x1f4   : > { %v3217_v46 = vpop.f32.mrf.mxu0  ;;  %v2880_v35 = vpop.f32.mrf.mxu1 }
 0x1f5   : > { %v3359_v8 = vadd.f32 %v4363_v49, %v3025_v25  ;;  %v3023_v38 = vadd.f32 %v2880_v35, %v5767_v16 }
 0x1f6   : > { %v4367_v36 = vpop.f32.mrf.mxu0  ;;  %v4312_v6 = vpop.f32.mrf.mxu1 }
 0x1f7   : > { %3395 = vst [vmem:[%s5875_s11 + $0x10] sm:$0xff] %v3359_v8  ;;  %v3357_v30 = vadd.f32 %v3214_v53, %v3023_v38  ;;  %v3026_v62 = vadd.f32 %v4312_v6, %v5770_v7 }
 0x1f8   : > { %v3230_v31 = vpop.f32.mrf.mxu0  ;;  %v2883_v9 = vpop.f32.mrf.mxu1 }
 0x1f9   : > { %3393 = vst [vmem:[%s5875_s11] sm:$0xff] %v3357_v30  ;;  %v3360_v27 = vadd.f32 %v4364_v4, %v3026_v62  ;;  %v3024_v63 = vadd.f32 %v2883_v9, %v5773_v12 }
 0x1fa   : > { %v4368_v52 = vpop.f32.mrf.mxu0  ;;  %v4315_v41 = vpop.f32.mrf.mxu1 }
 0x1fb   : > { %3396 = vst [vmem:[%s5875_s11 + $0x18] sm:$0xff] %v3360_v27  ;;  %v3358_v55 = vadd.f32 %v3217_v46, %v3024_v63  ;;  %v3029_v16 = vadd.f32 %v4315_v41, %v5776_v1 }
 0x1fc   : > { %v3233_v22 = vpop.f32.mrf.mxu0  ;;  %v2896_v20 = vpop.f32.mrf.mxu1 }
 0x1fd   : > { %3394 = vst [vmem:[%s5875_s11 + $0x8] sm:$0xff] %v3358_v55  ;;  %v3363_v49 = vadd.f32 %v4367_v36, %v3029_v16  ;;  %v3027_v7 = vadd.f32 %v2896_v20, %v5779_v42 }
 0x1fe   : > { %v4371_v61 = vpop.f32.mrf.mxu0  ;;  %v4316_v2 = vpop.f32.mrf.mxu1 }
 0x1ff   : > { %3399 = vst [vmem:[%s5875_s11 + $0x30] sm:$0xff] %v3363_v49  ;;  %v3361_v53 = vadd.f32 %v3230_v31, %v3027_v7  ;;  %v3030_v12 = vadd.f32 %v4316_v2, %v5782_v10 }
 0x200   : > { %v3246_v17 = vpop.f32.mrf.mxu0  ;;  %v2899_v47 = vpop.f32.mrf.mxu1 }
 0x201   : > { %3397 = vst [vmem:[%s5875_s11 + $0x20] sm:$0xff] %v3361_v53  ;;  %v3364_v4 = vadd.f32 %v4368_v52, %v3030_v12  ;;  %v3028_v1 = vadd.f32 %v2899_v47, %v5785_v23 }
 0x202   : > { %v4372_v45 = vpop.f32.mrf.mxu0  ;;  %v4319_v13 = vpop.f32.mrf.mxu1 }
 0x203   : > { %3400 = vst [vmem:[%s5875_s11 + $0x38] sm:$0xff] %v3364_v4  ;;  %v3362_v46 = vadd.f32 %v3233_v22, %v3028_v1  ;;  %v3033_v42 = vadd.f32 %v4319_v13, %v5788_v14 }
 0x204   : > { %v3249_v58 = vpop.f32.mrf.mxu0  ;;  %v2912_v25 = vpop.f32.mrf.mxu1 }
 0x205   : > { %3398 = vst [vmem:[%s5875_s11 + $0x28] sm:$0xff] %v3362_v46  ;;  %v3367_v36 = vadd.f32 %v4371_v61, %v3033_v42  ;;  %v3031_v10 = vadd.f32 %v2912_v25, %v5791_v28 }
 0x206   : > { %v4375_v32 = vpop.f32.mrf.mxu0  ;;  %v4320_v8 = vpop.f32.mrf.mxu1 }
 0x207   : > { %3403 = vst [vmem:[%s5875_s11 + $0x50] sm:$0xff] %v3367_v36  ;;  %v3365_v38 = vadd.f32 %v3246_v17, %v3031_v10  ;;  %v3034_v23 = vadd.f32 %v4320_v8, %v5794_v29 }
 0x208   : > { %v3262_v35 = vpop.f32.mrf.mxu0  ;;  %v2915_v6 = vpop.f32.mrf.mxu1 }
 0x209   : > { %3401 = vst [vmem:[%s5875_s11 + $0x40] sm:$0xff] %v3365_v38  ;;  %v3368_v30 = vadd.f32 %v4372_v45, %v3034_v23  ;;  %v3032_v14 = vadd.f32 %v2915_v6, %v5797_v19 }
 0x20a   : > { %v4376_v31 = vpop.f32.mrf.mxu0  ;;  %v4323_v52 = vpop.f32.mrf.mxu1 }
 0x20b   : > { %3404 = vst [vmem:[%s5875_s11 + $0x58] sm:$0xff] %v3368_v30  ;;  %v3366_v9 = vadd.f32 %v3249_v58, %v3032_v14  ;;  %v3037_v28 = vadd.f32 %v4323_v52, %v5800_v56 }
 0x20c   : > { %v3265_v62 = vpop.f32.mrf.mxu0  ;;  %v2928_v63 = vpop.f32.mrf.mxu1 }
 0x20d   : > { %3402 = vst [vmem:[%s5875_s11 + $0x48] sm:$0xff] %v3366_v9  ;;  %v3371_v22 = vadd.f32 %v4375_v32, %v3037_v28  ;;  %v3035_v29 = vadd.f32 %v2928_v63, %v5803_v59 }
 0x20e   : > { %v4379_v27 = vpop.f32.mrf.mxu0  ;;  %v4324_v55 = vpop.f32.mrf.mxu1 }
 0x20f   : > { %3407 = vst [vmem:[%s5875_s11 + $0x70] sm:$0xff] %v3371_v22  ;;  %v3369_v16 = vadd.f32 %v3262_v35, %v3035_v29  ;;  %v3038_v19 = vadd.f32 %v4324_v55, %v5806_v34 }
 0x210   : > { %v3278_v41 = vpop.f32.mrf.mxu0  ;;  %v2931_v20 = vpop.f32.mrf.mxu1 }
 0x211   : > { %3405 = vst [vmem:[%s5875_s11 + $0x60] sm:$0xff] %v3369_v16  ;;  %v3372_v49 = vadd.f32 %v4376_v31, %v3038_v19  ;;  %v3036_v56 = vadd.f32 %v2931_v20, %v5809_v43 }
 0x212   : > { %v4380_v61 = vpop.f32.mrf.mxu0  ;;  %v4327_v17 = vpop.f32.mrf.mxu1 }
 0x213   : > { %3408 = vst [vmem:[%s5875_s11 + $0x78] sm:$0xff] %v3372_v49  ;;  %v3370_v2 = vadd.f32 %v3265_v62, %v3036_v56  ;;  %v3041_v59 = vadd.f32 %v4327_v17, %v5812_v18 }
 0x214   : > { %v3281_v7 = vpop.f32.mrf.mxu0  ;;  %v2944_v12 = vpop.f32.mrf.mxu1 }
 0x215   : > { %3406 = vst [vmem:[%s5875_s11 + $0x68] sm:$0xff] %v3370_v2  ;;  %v3375_v45 = vadd.f32 %v4379_v27, %v3041_v59  ;;  %v3039_v34 = vadd.f32 %v2944_v12, %v5815_v44 }
 0x216   : > { %v4383_v53 = vpop.f32.mrf.mxu0  ;;  %v4328_v4 = vpop.f32.mrf.mxu1 }
 0x217   : > { %3411 = vst [vmem:[%s5875_s11 + $0x90] sm:$0xff] %v3375_v45  ;;  %v3373_v1 = vadd.f32 %v3278_v41, %v3039_v34  ;;  %v3042_v43 = vadd.f32 %v4328_v4, %v5818_v37 }
 0x218   : > { %v3294_v47 = vpop.f32.mrf.mxu0  ;;  %v2947_v13 = vpop.f32.mrf.mxu1 }
 0x219   : > { %3409 = vst [vmem:[%s5875_s11 + $0x80] sm:$0xff] %v3373_v1  ;;  %v3376_v46 = vadd.f32 %v4380_v61, %v3042_v43  ;;  %v3040_v18 = vadd.f32 %v2947_v13, %v5821_v26 }
 0x21a   : > { %v4384_v58 = vpop.f32.mrf.mxu0  ;;  %v4331_v32 = vpop.f32.mrf.mxu1 }
 0x21b   : > { %3412 = vst [vmem:[%s5875_s11 + $0x98] sm:$0xff] %v3376_v46  ;;  %v3374_v25 = vadd.f32 %v3281_v7, %v3040_v18  ;;  %v3045_v44 = vadd.f32 %v4331_v32, %v5824_v50 }
 0x21c   : > { %v3297_v42 = vpop.f32.mrf.mxu0  ;;  %v2960_v10 = vpop.f32.mrf.mxu1 }
 0x21d   : > { %3410 = vst [vmem:[%s5875_s11 + $0x88] sm:$0xff] %v3374_v25  ;;  %v3379_v35 = vadd.f32 %v4383_v53, %v3045_v44  ;;  %v3043_v37 = vadd.f32 %v2960_v10, %v5827_v51 }
 0x21e   : > { %v4387_v36 = vpop.f32.mrf.mxu0  ;;  %v4332_v38 = vpop.f32.mrf.mxu1 }
 0x21f   : > { %3415 = vst [vmem:[%s5875_s11 + $0xb0] sm:$0xff] %v3379_v35  ;;  %v3377_v23 = vadd.f32 %v3294_v47, %v3043_v37  ;;  %v3046_v26 = vadd.f32 %v4332_v38, %v5830_v60 }
 0x220   : > { %v3310_v8 = vpop.f32.mrf.mxu0  ;;  %v2963_v6 = vpop.f32.mrf.mxu1 }
 0x221   : > { %3413 = vst [vmem:[%s5875_s11 + $0xa0] sm:$0xff] %v3377_v23  ;;  %v3380_v30 = vadd.f32 %v4384_v58, %v3046_v26  ;;  %v3044_v50 = vadd.f32 %v2963_v6, %v5833_v3 }
 0x222   : > { %v4388_v31 = vpop.f32.mrf.mxu0  ;;  %v4335_v62 = vpop.f32.mrf.mxu1 }
 0x223   : > { %3416 = vst [vmem:[%s5875_s11 + $0xb8] sm:$0xff] %v3380_v30  ;;  %v3378_v52 = vadd.f32 %v3297_v42, %v3044_v50  ;;  %v3049_v51 = vadd.f32 %v4335_v62, %v5836_v48 }
 0x224   : > { %v3313_v14 = vpop.f32.mrf.mxu0  ;;  %v2976_v28 = vpop.f32.mrf.mxu1 }
 0x225   : > { %3414 = vst [vmem:[%s5875_s11 + $0xa8] sm:$0xff] %v3378_v52  ;;  %v3383_v27 = vadd.f32 %v4387_v36, %v3049_v51  ;;  %v3047_v60 = vadd.f32 %v2976_v28, %v5839_v5 }
 0x226   : > { %v4391_v9 = vpop.f32.mrf.mxu0  ;;  %v4336_v22 = vpop.f32.mrf.mxu1 }
 0x227   : > { %3419 = vst [vmem:[%s5875_s11 + $0xd0] sm:$0xff] %v3383_v27  ;;  %v3381_v29 = vadd.f32 %v3310_v8, %v3047_v60  ;;  %v3050_v3 = vadd.f32 %v4336_v22, %v5842_v24 }
 0x228   : > { %v3326_v63 = vpop.f32.mrf.mxu0  ;;  %v2979_v55 = vpop.f32.mrf.mxu1 }
 0x229   : > { %3417 = vst [vmem:[%s5875_s11 + $0xc0] sm:$0xff] %v3381_v29  ;;  %v3384_v16 = vadd.f32 %v4388_v31, %v3050_v3  ;;  %v3048_v48 = vadd.f32 %v2979_v55, %v5845_v33 }
 0x22a   : > { %v4392_v41 = vpop.f32.mrf.mxu0  ;;  %v4339_v19 = vpop.f32.mrf.mxu1 }
 0x22b   : > { %3420 = vst [vmem:[%s5875_s11 + $0xd8] sm:$0xff] %v3384_v16  ;;  %v3382_v20 = vadd.f32 %v3313_v14, %v3048_v48  ;;  %v3053_v5 = vadd.f32 %v4339_v19, %v5848_v15 }
 0x22c   : > { %v3329_v61 = vpop.f32.mrf.mxu0  ;;  %v2992_v49 = vpop.f32.mrf.mxu1 }
 0x22d   : > { %3418 = vst [vmem:[%s5875_s11 + $0xc8] sm:$0xff] %v3382_v20  ;;  %v3387_v56 = vadd.f32 %v4391_v9, %v3053_v5  ;;  %v3051_v24 = vadd.f32 %v2992_v49, %v5851_v40 }
 0x22e   : > { %v4340_v7 = vpop.f32.mrf.mxu1  ;;  %v4395_v17 = vpop.f32.mrf.mxu0 }
 0x22f   : > { %3423 = vst [vmem:[%s5875_s11 + $0xf0] sm:$0xff] %v3387_v56  ;;  %v3385_v2 = vadd.f32 %v3326_v63, %v3051_v24  ;;  %v3054_v33 = vadd.f32 %v4340_v7, %v5854_v0 }
 0x230   : > { %v2995_v59 = vpop.f32.mrf.mxu1  ;;  %v3342_v15 = vpop.f32.mrf.mxu0 }
 0x231   : > { %3421 = vst [vmem:[%s5875_s11 + $0xe0] sm:$0xff] %v3385_v2  ;;  %v3388_v53 = vadd.f32 %v4392_v41, %v3054_v33  ;;  %v3052_v12 = vadd.f32 %v2995_v59, %v5857_v57 }
 0x232   : > { %v4343_v45 = vpop.f32.mrf.mxu1  ;;  %v4396_v1 = vpop.f32.mrf.mxu0 }
 0x233   : > { %3424 = vst [vmem:[%s5875_s11 + $0xf8] sm:$0xff] %v3388_v53  ;;  %v3386_v34 = vadd.f32 %v3329_v61, %v3052_v12  ;;  %v3057_v40 = vadd.f32 %v4343_v45, %v5860_v39 }
 0x234   : > { %v3008_v47 = vpop.f32.mrf.mxu1  ;;  %v3345_v42 = vpop.f32.mrf.mxu0 }
 0x235   : > { %3422 = vst [vmem:[%s5875_s11 + $0xe8] sm:$0xff] %v3386_v34  ;;  %v3391_v4 = vadd.f32 %v4395_v17, %v3057_v40  ;;  %v3055_v0 = vadd.f32 %v3008_v47, %v5863_v11 }
 0x236   : > { %v4344_v43 = vpop.f32.mrf.mxu1 }
 0x237   : > { %3427 = vst [vmem:[%s5875_s11 + $0x110] sm:$0xff] %v3391_v4  ;;  %v3389_v58 = vadd.f32 %v3342_v15, %v3055_v0  ;;  %v3058_v57 = vadd.f32 %v4344_v43, %v5867_v54 }
 0x238   : > { %v3011_v13 = vpop.f32.mrf.mxu1 }
 0x239   : > { %3425 = vst [vmem:[%s5875_s11 + $0x100] sm:$0xff] %v3389_v58  ;;  %v3392_v46 = vadd.f32 %v4396_v1, %v3058_v57  ;;  %v3056_v18 = vadd.f32 %v3011_v13, %v5870_v21 }
 0x23b   : > { %3428 = vst [vmem:[%s5875_s11 + $0x118] sm:$0xff] %v3392_v46  ;;  %v3390_v39 = vadd.f32 %v3345_v42, %v3056_v18 }
 0x23d   : > { %3426 = vst [vmem:[%s5875_s11 + $0x108] sm:$0xff] %v3390_v39 }
 0x23e PF: > { %s14_s15 = sadd.s32 1, %s4503_s15  }
 0x23f   : > { %p11_p4 = scmp.ge.s32.totalorder %s14_s15, 4  }
 0x241   :  { %13 = sbr.rel (!%p11_p4) target bundleno = 1 (0x1), region = 74 }

// kernel: preact_block_forward.7
= control target key start
LH: loop header
LB: loop body
LE: loop exit
PB: predicated region body
PF: predicated region fallthrough
CT: control target
= control target key end

     0   :  { %s4667_s18 = smov 0   ;;  %s6133_s0 = inlined_call_operand.vmem [shape: f32[2,342,128], index: 0, kind: input, shape index: {}]   ;;  %s6134_s1 = inlined_call_operand.vmem [shape: bf16[9,128,128], index: 1, kind: input, shape index: {}]   ;;  %s6135_s2 = inlined_call_operand.vmem [shape: f32[1,128], index: 2, kind: input, shape index: {}]   ;;  %s6136_s3 = inlined_call_operand.vmem [shape: f32[1,128], index: 3, kind: input, shape index: {}]   ;;  %s6137_s4 = inlined_call_operand.vmem [shape: f32[2,342,128], index: 4, kind: input, shape index: {}]   ;;  %s6138_s5 = inlined_call_operand.vmem [shape: f32[2,288,128], index: 5, kind: output, shape index: {}]  }
   0x1 LB: > { %s3615_s19 = sadd.s32 4294967295, %s4635_s18   ;;  %p3619_p0 = scmp.ge.s32.totalorder %s4635_s18, 1  ;;  %s4635_s18 = sphi %s4667_s18, %s15_s18  }
   0x2   : > { %p197_p1 = scmp.lt.s32.totalorder %s4635_s18, 3 }
   0x4   : > { %p198_p2 = pnand %p3619_p0, %p197_p1 }
   0x6   : > { %201 = sbr.rel (%p198_p2) target bundleno = 576 (0x240), region = 40 }
   0xb   : > { %v4555_v0 = vld [vmem:[%s6134_s1 + $0x78] sm:$0xff]   ;;  %p230_p3 = scmp.lt.s32.totalorder %s3615_s19, 1  ;;  %v4556_v1 = vld [vmem:[%s6134_s1 + $0x70] sm:$0xff]   ;;  %v4557_v2 = vld [vmem:[%s6134_s1 + $0x68] sm:$0xff]   ;;  %vm482_vm0 = vsmask.f32 7424 }
   0xc   : > { %4529 = vmatprep.subr.bf16.mxu1 %v4555_v0  ;;  %4061 = vmatprep.subr.bf16.mxu0 %v4555_v0  ;;  %v4558_v3 = vld [vmem:[%s6134_s1 + $0x60] sm:$0xff]   ;;  %v4559_v19 = vld [vmem:[%s6134_s1 + $0x58] sm:$0xff]   ;;  %v4560_v38 = vld [vmem:[%s6134_s1 + $0x50] sm:$0xff]   ;;  %vm1135_vm1 = vcmask 1046528   ;;  %vm1751_vm2 = vsmask.f32 6400 }
   0xd   : > { %s6346_s19 = smov (!%p230_p3, %s3615_s19), 1  ;;  %4537 = vmatpush3.bf16.msra.mxu1 %v4555_v0  ;;  %4062 = vmatpush3.bf16.msra.mxu0 %v4555_v0  ;;  %v4704_v8 = vld [vmem:[%s6135_s2] ss:$0 sm:$0xff]  ;;  %v4561_v57 = vld [vmem:[%s6134_s1 + $0x48] sm:$0xff]   ;;  %vm2130_vm3 = vcmask 1045504   ;;  %vm3123_vm4 = vcmask 1044480  }
   0xe   : > { %4530 = vmatprep.subr.bf16.mxu1 %v4556_v1  ;;  %4063 = vmatprep.subr.bf16.mxu0 %v4556_v1  ;;  %s4545_s26 = smul.u32 344, %s6346_s19  ;;  %v4709_v9 = vld [vmem:[%s6136_s3] ss:$0 sm:$0xff]  ;;  %vm2746_vm5 = vsmask.f32 5376 }
   0xf   : > { %s4546_s6 = smul.u32 288, %s6346_s19 }
  0x10   : > { %s4692_s29 = scalar_lea.vmem %s6133_s0, %s4545_s26  ;;  %s6010_s30 = scalar_lea.vmem %s6137_s4, %s4545_s26 }
  0x11   : > { %4538 = vmatpush3.bf16.msra.mxu1 %v4556_v1  ;;  %4064 = vmatpush3.bf16.msra.mxu0 %v4556_v1  ;;  %v262_v4 = vld [vmem:[%s4692_s29 + $0x80] sm:$0xff]  ;;  %v263_v5 = vld [vmem:[%s4692_s29 + $0x88] sm:$0xff]  ;;  %v264_v6 = vld [vmem:[%s4692_s29 + $0x90] sm:$0xff]  ;;  %s6023_s8 = scalar_lea.vmem %s6138_s5, %s4546_s6 }
  0x12   : > { %4531 = vmatprep.subr.bf16.mxu1 %v4557_v2  ;;  %4065 = vmatprep.subr.bf16.mxu0 %v4557_v2  ;;  %v265_v7 = vld [vmem:[%s4692_s29 + $0x98] sm:$0xff]  ;;  %v311_v10 = vmul.f32 %v4704_v8, %v262_v4  ;;  %v312_v11 = vmul.f32 %v4704_v8, %v263_v5  ;;  %v313_v12 = vmul.f32 %v4704_v8, %v264_v6  ;;  %v266_v14 = vld [vmem:[%s4692_s29 + $0xa0] sm:$0xff]  ;;  %v267_v15 = vld [vmem:[%s4692_s29 + $0xa8] sm:$0xff] }
  0x13   : > { %v314_v13 = vmul.f32 %v4704_v8, %v265_v7  ;;  %v315_v16 = vmul.f32 %v4704_v8, %v266_v14  ;;  %v316_v17 = vmul.f32 %v4704_v8, %v267_v15  ;;  %v246_v18 = vld [vmem:[%s4692_s29] sm:$0xff]  ;;  %v247_v23 = vld [vmem:[%s4692_s29 + $0x8] sm:$0xff]  ;;  %v248_v24 = vld [vmem:[%s4692_s29 + $0x10] sm:$0xff] }
  0x14   : > { %v360_v20 = vadd.f32 %v4709_v9, %v311_v10  ;;  %v361_v21 = vadd.f32 %v4709_v9, %v312_v11  ;;  %v362_v22 = vadd.f32 %v4709_v9, %v313_v12  ;;  %v249_v28 = vld [vmem:[%s4692_s29 + $0x18] sm:$0xff]  ;;  %v295_v29 = vmul.f32 %v4704_v8, %v246_v18  ;;  %v250_v46 = vld [vmem:[%s4692_s29 + $0x20] sm:$0xff]  ;;  %v251_v47 = vld [vmem:[%s4692_s29 + $0x28] sm:$0xff] }
  0x15   : > { %4539 = vmatpush3.bf16.msra.mxu1 %v4557_v2  ;;  %4066 = vmatpush3.bf16.msra.mxu0 %v4557_v2  ;;  %v363_v25 = vadd.f32 %v4709_v9, %v314_v13  ;;  %v364_v26 = vadd.f32 %v4709_v9, %v315_v16  ;;  %v365_v27 = vadd.f32 %v4709_v9, %v316_v17  ;;  %v268_v52 = vld [vmem:[%s4692_s29 + $0xb0] sm:$0xff]  ;;  %v269_v5 = vld [vmem:[%s4692_s29 + $0xb8] sm:$0xff]  ;;  %v270_v13 = vld [vmem:[%s4692_s29 + $0xc0] sm:$0xff] }
  0x16   : > { %4532 = vmatprep.subr.bf16.mxu1 %v4558_v3  ;;  %4067 = vmatprep.subr.bf16.mxu0 %v4558_v3  ;;  %v402_v30 = vmax.f32 %v360_v20, 0.0  ;;  %v403_v31 = vmax.f32 %v361_v21, 0.0  ;;  %v404_v32 = vmax.f32 %v362_v22, 0.0  ;;  %v296_v33 = vmul.f32 %v4704_v8, %v247_v23  ;;  %v4562_v14 = vld [vmem:[%s6134_s1 + $0x40] sm:$0xff]   ;;  %v271_v23 = vld [vmem:[%s4692_s29 + $0xc8] sm:$0xff] }
  0x17   : > { %v405_v34 = vmax.f32 %v363_v25, 0.0  ;;  %v406_v35 = vmax.f32 %v364_v26, 0.0  ;;  %v407_v36 = vmax.f32 %v365_v27, 0.0  ;;  %v297_v37 = vmul.f32 %v4704_v8, %v248_v24  ;;  %v4563_v24 = vld [vmem:[%s6134_s1 + $0x38] sm:$0xff]  }
  0x18   : > { %v4738_v39 = vpack.c.bf16 %v403_v31, %v402_v30  ;;  %v298_v40 = vmul.f32 %v4704_v8, %v249_v28  ;;  %v344_v41 = vadd.f32 %v4709_v9, %v295_v29  ;;  %v345_v44 = vadd.f32 %v4709_v9, %v296_v33  ;;  %v4565_v31 = vld [vmem:[%s6134_s1 + $0xb8] sm:$0xff]   ;;  %v252_v33 = vld [vmem:[%s4692_s29 + $0x30] sm:$0xff] }
  0x19   : > { %4540 = vmatpush3.bf16.msra.mxu1 %v4558_v3  ;;  %4068 = vmatpush3.bf16.msra.mxu0 %v4558_v3  ;;  %v4742_v42 = vpack.c.bf16 %v405_v34, %v404_v32  ;;  %v4744_v43 = vpack.c.bf16 %v407_v36, %v406_v35  ;;  %v346_v45 = vadd.f32 %v4709_v9, %v297_v37  ;;  %v253_v34 = vld [vmem:[%s4692_s29 + $0x38] sm:$0xff] }
  0x1a   : > { %4533 = vmatprep.subr.bf16.mxu1 %v4559_v19  ;;  %4069 = vmatprep.subr.bf16.mxu0 %v4559_v19  ;;  %6207 = vst [vmem:[#allocation2_spill] sm:$0xff] %v4738_v39  ;;  %v4751_v48 = vshll.u32 %v4738_v39, 16  ;;  %v4754_v49 = vshrl.u32 %v4738_v39, 16  ;;  %v347_v50 = vadd.f32 %v4709_v9, %v298_v40  ;;  %v386_v51 = vmax.f32 %v344_v41, 0.0  ;;  %v254_v41 = vld [vmem:[%s4692_s29 + $0x40] sm:$0xff] }
  0x1b   : > { %6208 = vst [vmem:[#allocation3_spill] sm:$0xff] %v4742_v42  ;;  %6209 = vst [vmem:[#allocation4_spill] sm:$0xff] %v4744_v43  ;;  %v4759_v53 = vshll.u32 %v4742_v42, 16  ;;  %v4762_v54 = vshrl.u32 %v4742_v42, 16  ;;  %v4765_v55 = vshll.u32 %v4744_v43, 16  ;;  %v387_v56 = vmax.f32 %v345_v44, 0.0 }
  0x1c   : > { %v6141_v58 = vrot.slane %v4751_v48, 1  ;;  %v388_v59 = vmax.f32 %v346_v45, 0.0  ;;  %v389_v60 = vmax.f32 %v347_v50, 0.0  ;;  %v299_v61 = vmul.f32 %v4704_v8, %v250_v46  ;;  %v255_v50 = vld [vmem:[%s4692_s29 + $0x48] sm:$0xff] }
  0x1d   : > { %4541 = vmatpush3.bf16.msra.mxu1 %v4559_v19  ;;  %4070 = vmatpush3.bf16.msra.mxu0 %v4559_v19  ;;  %6210 = vst [vmem:[#allocation5_spill] sm:$0xff] %v4765_v55  ;;  %v557_v62 = vrot.slane %v4759_v53, 1  ;;  %v565_v63 = vrot.slane %v4765_v55, 1  ;;  %v4774_v0 = vpack.c.bf16 %v387_v56, %v386_v51  ;;  %v300_v1 = vmul.f32 %v4704_v8, %v251_v47 }
  0x1e   : > { %4534 = vmatprep.subr.bf16.mxu1 %v4560_v38  ;;  %4071 = vmatprep.subr.bf16.mxu0 %v4560_v38  ;;  %v553_v2 = vor.u32 %v4754_v49, %v6141_v58  ;;  %v4780_v3 = vpack.c.bf16 %v389_v60, %v388_v59  ;;  %v348_v4 = vadd.f32 %v4709_v9, %v299_v61  ;;  %v4806_v27 = vshrl.u32 %v4744_v43, 16  ;;  %v4564_v60 = vld [vmem:[%s6134_s1 + $0x30] sm:$0xff]   ;;  %v282_v58 = vld [vmem:[%s4692_s29 + $0x120] sm:$0xff] }
  0x1f   : > { %v317_v6 = vmul.f32 %v4704_v8, %v268_v52  ;;  %v561_v7 = vor.u32 %v4762_v54, %v557_v62  ;;  %v484_v10 = vshrl.u32 %v4774_v0, 16  ;;  %v486_v11 = vshll.u32 %v4774_v0, 16 }
  0x20   : > { %6211 = vst [vmem:[#allocation6_spill] sm:$0xff] %v4780_v3  ;;  %v349_v12 = vadd.f32 %v4709_v9, %v300_v1  ;;  %v558_v15 = vsel %vm482_vm0, %v553_v2, %v557_v62  ;;  %v6139_v16 = vshll.u32 %v4780_v3, 16  ;;  %v390_v17 = vmax.f32 %v348_v4, 0.0  ;;  %6212 = vst [vmem:[#allocation7_spill] sm:$0xff] %v4806_v27  ;;  %v272_v2 = vld [vmem:[%s4692_s29 + $0xd0] sm:$0xff] }
  0x21   : > { %4542 = vmatpush3.bf16.msra.mxu1 %v4560_v38  ;;  %4072 = vmatpush3.bf16.msra.mxu0 %v4560_v38  ;;  %v6140_v18 = vshrl.u32 %v4780_v3, 16  ;;  %v566_v19 = vsel %vm482_vm0, %v561_v7, %v565_v63  ;;  %v488_v20 = vrot.slane %v486_v11, 1  ;;  %v318_v22 = vmul.f32 %v4704_v8, %v269_v5 }
  0x22   : > { %4535 = vmatprep.subr.bf16.mxu1 %v4561_v57  ;;  %4073 = vmatprep.subr.bf16.mxu0 %v4561_v57  ;;  %v391_v21 = vmax.f32 %v349_v12, 0.0  ;;  %v493_v25 = vrot.slane %v6139_v16, 1  ;;  %v366_v26 = vadd.f32 %v4709_v9, %v317_v6  ;;  %v319_v28 = vmul.f32 %v4704_v8, %v270_v13 }
  0x23   : > { %4093 = vmatprep.mubr.bf16.mxu1 %v558_v15  ;;  %v489_v29 = vor.u32 %v488_v20, %v484_v10  ;;  %v367_v32 = vadd.f32 %v4709_v9, %v318_v22  ;;  %v569_v38 = vor.u32 %v4806_v27, %v565_v63  ;;  %v320_v40 = vmul.f32 %v4704_v8, %v271_v23  ;;  %v4566_v63 = vld [vmem:[%s6134_s1 + $0xb0] sm:$0xff]   ;;  %v273_v10 = vld [vmem:[%s4692_s29 + $0xd8] sm:$0xff]  ;;  %v4568_v23 = vld [vmem:[%s6134_s1 + $0xa8] sm:$0xff]  }
  0x24   : > { %v4809_v30 = vpack.c.bf16 %v391_v21, %v390_v17  ;;  %v497_v36 = vor.u32 %v6140_v18, %v493_v25  ;;  %v408_v37 = vmax.f32 %v366_v26, 0.0  ;;  %v368_v47 = vadd.f32 %v4709_v9, %v319_v28  ;;  %v4567_v17 = vld [vmem:[%s6134_s1 + $0x28] sm:$0xff]  }
  0x25   : > { %4543 = vmatpush3.bf16.msra.mxu1 %v4561_v57  ;;  %4074 = vmatpush3.bf16.msra.mxu0 %v4561_v57  ;;  %v494_v44 = vsel %vm482_vm0, %v489_v29, %v493_v25  ;;  %v409_v46 = vmax.f32 %v367_v32, 0.0  ;;  %v369_v51 = vadd.f32 %v4709_v9, %v320_v40  ;;  %v301_v52 = vmul.f32 %v4704_v8, %v252_v33  ;;  %v274_v29 = vld [vmem:[%s4692_s29 + $0xe0] sm:$0xff] }
  0x26   : > { %6213 = vst [vmem:[#allocation8_spill] sm:$0xff] %v4809_v30  ;;  %4536 = vmatprep.subr.bf16.mxu1 %v4562_v14  ;;  %4075 = vmatprep.subr.bf16.mxu0 %v4562_v14  ;;  %v4825_v45 = vshll.u32 %v4809_v30, 16  ;;  %v302_v56 = vmul.f32 %v4704_v8, %v253_v34  ;;  %v4833_v57 = vshrl.u32 %v4809_v30, 16  ;;  %v410_v62 = vmax.f32 %v368_v47, 0.0 }
  0x27   : > { %4077 = vmatprep.mubr.bf16.mxu0 %v494_v44  ;;  %v4839_v61 = vpack.c.bf16 %v409_v46, %v408_v37  ;;  %v303_v1 = vmul.f32 %v4704_v8, %v254_v41  ;;  %v411_v4 = vmax.f32 %v369_v51, 0.0  ;;  %v350_v5 = vadd.f32 %v4709_v9, %v301_v52  ;;  %v256_v51 = vld [vmem:[%s4692_s29 + $0x50] sm:$0xff] }
  0x28   : > { %6214 = vst [vmem:[#allocation9_spill] sm:$0xff] %v4825_v45  ;;  %6215 = vst [vmem:[#allocation10_spill] sm:$0xff] %v4833_v57  ;;  %v501_v59 = vrot.slane %v4825_v45, 1  ;;  %v351_v6 = vadd.f32 %v4709_v9, %v302_v56  ;;  %v304_v7 = vmul.f32 %v4704_v8, %v255_v50  ;;  %v321_v26 = vmul.f32 %v4704_v8, %v272_v2  ;;  %v257_v2 = vld [vmem:[%s4692_s29 + $0x58] sm:$0xff] }
  0x29   : > { %4544 = vmatpush3.bf16.msra.mxu1 %v4562_v14  ;;  %4076 = vmatpush3.bf16.msra.mxu0 %v4562_v14  ;;  %6216 = vst [vmem:[#allocation11_spill] sm:$0xff] %v4839_v61  ;;  %v4852_v12 = vshll.u32 %v4839_v61, 16  ;;  %v4855_v13 = vshrl.u32 %v4839_v61, 16  ;;  %v4858_v15 = vpack.c.bf16 %v411_v4, %v410_v62  ;;  %v392_v20 = vmax.f32 %v350_v5, 0.0 }
  0x2a   : > { %4113 = vmatprep.subr.bf16.mxu1 %v4563_v24  ;;  %4165 = vmatprep.subr.bf16.mxu0 %v4565_v31  ;;  %v502_v11 = vsel %vm482_vm0, %v497_v36, %v501_v59  ;;  %v505_v14 = vor.u32 %v4833_v57, %v501_v59  ;;  %v393_v21 = vmax.f32 %v351_v6, 0.0  ;;  %v352_v22 = vadd.f32 %v4709_v9, %v303_v1  ;;  %v4570_v1 = vld [vmem:[%s6134_s1 + $0xa0] sm:$0xff]  }
  0x2b   : > { %6217 = vst [vmem:[#allocation12_spill] sm:$0xff] %v4852_v12  ;;  %6218 = vst [vmem:[#allocation13_spill] sm:$0xff] %v4855_v13  ;;  %v353_v25 = vadd.f32 %v4709_v9, %v304_v7  ;;  %v322_v28 = vmul.f32 %v4704_v8, %v273_v10  ;;  %v4873_v32 = vshll.u32 %v4858_v15, 16  ;;  %v370_v41 = vadd.f32 %v4709_v9, %v321_v26  ;;  %v4571_v26 = vld [vmem:[%s6134_s1 + $0x18] sm:$0xff]  }
  0x2c   : > { %4094 = vmatmul.mubr.bf16.vlgmr.msra.gmra.mxu1 %v566_v19  ;;  %4078 = vmatmul.mubr.bf16.vlgmr.msra.gmra.mxu0 %v502_v11  ;;  %6219 = vst [vmem:[#allocation14_spill] sm:$0xff] %v4858_v15  ;;  %v573_v19 = vrot.slane %v4852_v12, 1  ;;  %v4875_v33 = vpack.c.bf16 %v393_v21, %v392_v20  ;;  %v394_v34 = vmax.f32 %v352_v22, 0.0  ;;  %v323_v59 = vmul.f32 %v4704_v8, %v274_v29  ;;  %v258_v20 = vld [vmem:[%s4692_s29 + $0x60] sm:$0xff] }
  0x2d   : > { %4114 = vmatpush3.bf16.msra.mxu1 %v4563_v24  ;;  %4166 = vmatpush3.bf16.msra.mxu0 %v4565_v31  ;;  %6220 = vst [vmem:[#allocation15_spill] sm:$0xff] %v4873_v32  ;;  %v4878_v24 = vshrl.u32 %v4858_v15, 16  ;;  %v275_v31 = vld [vmem:[%s4692_s29 + $0xe8] sm:$0xff]  ;;  %v395_v40 = vmax.f32 %v353_v25, 0.0  ;;  %v581_v44 = vrot.slane %v4873_v32, 1  ;;  %v371_v50 = vadd.f32 %v4709_v9, %v322_v28 }
  0x2e   : > { %4115 = vmatprep.subr.bf16.mxu1 %v4564_v60  ;;  %4167 = vmatprep.subr.bf16.mxu0 %v4566_v63  ;;  %6221 = vst [vmem:[#allocation16_spill] sm:$0xff] %v4875_v33  ;;  %v574_v36 = vsel %vm482_vm0, %v569_v38, %v573_v19  ;;  %v577_v37 = vor.u32 %v4855_v13, %v573_v19  ;;  %v4886_v46 = vshll.u32 %v4875_v33, 16  ;;  %v4889_v47 = vshrl.u32 %v4875_v33, 16  ;;  %v4569_v38 = vld [vmem:[%s6134_s1 + $0x20] sm:$0xff]   ;;  %v259_v28 = vld [vmem:[%s4692_s29 + $0x68] sm:$0xff] }
  0x2f   : > { %6222 = vst [vmem:[#allocation17_spill] sm:$0xff] %v4878_v24  ;;  %4097 = vmatprep.mubr.bf16.mxu1 %v574_v36  ;;  %v4896_v52 = vpack.c.bf16 %v395_v40, %v394_v34  ;;  %v412_v56 = vmax.f32 %v370_v41, 0.0  ;;  %v324_v62 = vmul.f32 %v4704_v8, %v275_v31  ;;  %v585_v5 = vor.u32 %v4878_v24, %v581_v44  ;;  %v4572_v36 = vld [vmem:[%s6134_s1 + $0x98] sm:$0xff]  }
  0x30   : > { %v582_v4 = vsel %vm482_vm0, %v577_v37, %v581_v44  ;;  %v372_v7 = vadd.f32 %v4709_v9, %v323_v59  ;;  %v305_v11 = vmul.f32 %v4704_v8, %v256_v51  ;;  %v306_v25 = vmul.f32 %v4704_v8, %v257_v2  ;;  %v276_v37 = vld [vmem:[%s4692_s29 + $0xf0] sm:$0xff] }
  0x31   : > { %4116 = vmatpush3.bf16.msra.mxu1 %v4564_v60  ;;  %4168 = vmatpush3.bf16.msra.mxu0 %v4566_v63  ;;  %6223 = vst [vmem:[#allocation18_spill] sm:$0xff] %v4896_v52  ;;  %v509_v60 = vrot.slane %v4886_v46, 1  ;;  %v413_v63 = vmax.f32 %v371_v50, 0.0  ;;  %v4908_v6 = vshll.u32 %v4896_v52, 16  ;;  %v373_v10 = vadd.f32 %v4709_v9, %v324_v62  ;;  %v277_v50 = vld [vmem:[%s4692_s29 + $0xf8] sm:$0xff]  ;;  %v278_v62 = vld [vmem:[%s4692_s29 + $0x100] sm:$0xff] }
  0x32   : > { %4117 = vmatprep.subr.bf16.mxu1 %v4567_v17  ;;  %4169 = vmatprep.subr.bf16.mxu0 %v4568_v23  ;;  %v414_v34 = vmax.f32 %v372_v7, 0.0  ;;  %v355_v41 = vadd.f32 %v4709_v9, %v306_v25  ;;  %v4937_v44 = vshrl.u32 %v4896_v52, 16  ;;  %v307_v59 = vmul.f32 %v4704_v8, %v258_v20  ;;  %v279_v20 = vld [vmem:[%s4692_s29 + $0x108] sm:$0xff] }
  0x33   : > { %6224 = vst [vmem:[#allocation19_spill] sm:$0xff] %v4908_v6  ;;  %v510_v21 = vsel %vm482_vm0, %v505_v14, %v509_v60  ;;  %v513_v22 = vor.u32 %v4889_v47, %v509_v60  ;;  %v4916_v19 = vpack.c.bf16 %v413_v63, %v412_v56  ;;  %v517_v29 = vrot.slane %v4908_v6, 1 }
  0x34   : > { %4098 = vmatmul.mubr.bf16.gmra.mxu1 %v582_v4  ;;  %4081 = vmatprep.mubr.bf16.mxu0 %v510_v21  ;;  %v415_v31 = vmax.f32 %v373_v10, 0.0  ;;  %v354_v14 = vadd.f32 %v4709_v9, %v305_v11  ;;  %v397_v4 = vmax.f32 %v355_v41, 0.0  ;;  %v308_v63 = vmul.f32 %v4704_v8, %v259_v28 }
  0x35   : > { %6225 = vst [vmem:[#allocation20_spill] sm:$0xff] %v4916_v19  ;;  %4118 = vmatpush3.bf16.msra.mxu1 %v4567_v17  ;;  %4170 = vmatpush3.bf16.msra.mxu0 %v4568_v23  ;;  %v4930_v40 = vshll.u32 %v4916_v19, 16  ;;  %v4933_v17 = vshrl.u32 %v4916_v19, 16  ;;  %v518_v51 = vsel %vm482_vm0, %v513_v22, %v517_v29  ;;  %v521_v60 = vor.u32 %v4937_v44, %v517_v29  ;;  %v4573_v22 = vld [vmem:[%s6134_s1 + $0x10] sm:$0xff]  }
  0x36   : > { %4119 = vmatprep.subr.bf16.mxu1 %v4569_v38  ;;  %v4941_v56 = vpack.c.bf16 %v415_v31, %v414_v34  ;;  %4171 = vmatprep.subr.bf16.mxu0 %v4570_v1  ;;  %v396_v23 = vmax.f32 %v354_v14, 0.0  ;;  %v356_v10 = vadd.f32 %v4709_v9, %v307_v59  ;;  %v325_v11 = vmul.f32 %v4704_v8, %v276_v37  ;;  %v4574_v34 = vld [vmem:[%s6134_s1 + $0x90] sm:$0xff]   ;;  %v261_v59 = vld [vmem:[%s4692_s29 + $0x78] sm:$0xff] }
  0x37   : > { %6226 = vst [vmem:[#allocation21_spill] sm:$0xff] %v4930_v40  ;;  %6227 = vst [vmem:[#allocation22_spill] sm:$0xff] %v4933_v17  ;;  %4082 = vmatmul.mubr.bf16.gmra.mxu0 %v518_v51  ;;  %v589_v2 = vrot.slane %v4930_v40, 1  ;;  %v326_v21 = vmul.f32 %v4704_v8, %v277_v50  ;;  %v327_v51 = vmul.f32 %v4704_v8, %v278_v62 }
  0x38   : > { %6228 = vst [vmem:[#allocation23_spill] sm:$0xff] %v4941_v56  ;;  %v4949_v7 = vshll.u32 %v4941_v56, 16  ;;  %v4960_v28 = vpack.c.bf16 %v397_v4, %v396_v23  ;;  %v398_v14 = vmax.f32 %v356_v10, 0.0  ;;  %v260_v23 = vld [vmem:[%s4692_s29 + $0x70] sm:$0xff] }
  0x39   : > { %4120 = vmatpush3.bf16.msra.mxu1 %v4569_v38  ;;  %v590_v25 = vsel %vm482_vm0, %v585_v5, %v589_v2  ;;  %v593_v29 = vor.u32 %v4933_v17, %v589_v2  ;;  %4172 = vmatpush3.bf16.msra.mxu0 %v4570_v1  ;;  %v4963_v38 = vshrl.u32 %v4941_v56, 16  ;;  %v357_v5 = vadd.f32 %v4709_v9, %v308_v63 }
  0x3a   : > { %6229 = vst [vmem:[#allocation24_spill] sm:$0xff] %v4949_v7  ;;  %4121 = vmatprep.subr.bf16.mxu1 %v4571_v26  ;;  %4101 = vmatprep.mubr.bf16.mxu1 %v590_v25  ;;  %v597_v31 = vrot.slane %v4949_v7, 1  ;;  %v374_v1 = vadd.f32 %v4709_v9, %v325_v11  ;;  %v4972_v37 = vshll.u32 %v4960_v28, 16  ;;  %v4975_v41 = vshrl.u32 %v4960_v28, 16  ;;  %v4575_v11 = vld [vmem:[%s6134_s1 + $0x88] sm:$0xff]   ;;  %v4577_v7 = vld [vmem:[%s6134_s1 + $0x80] sm:$0xff]  }
  0x3b   : > { %6230 = vst [vmem:[#allocation25_spill] sm:$0xff] %v4963_v38  ;;  %4173 = vmatprep.subr.bf16.mxu0 %v4572_v36  ;;  %v375_v50 = vadd.f32 %v4709_v9, %v326_v21  ;;  %v399_v4 = vmax.f32 %v357_v5, 0.0  ;;  %v328_v25 = vmul.f32 %v4704_v8, %v279_v20  ;;  %v376_v16 = vadd.f32 %v4709_v9, %v327_v51 }
  0x3c   : > { %v598_v2 = vsel %vm482_vm0, %v593_v29, %v597_v31  ;;  %v416_v63 = vmax.f32 %v374_v1, 0.0  ;;  %v601_v10 = vor.u32 %v4963_v38, %v597_v31  ;;  %v525_v21 = vrot.slane %v4972_v37, 1  ;;  %v280_v29 = vld [vmem:[%s4692_s29 + $0x110] sm:$0xff] }
  0x3d   : > { %4122 = vmatpush3.bf16.msra.mxu1 %v4571_v26  ;;  %4174 = vmatpush3.bf16.msra.mxu0 %v4572_v36  ;;  %v417_v62 = vmax.f32 %v375_v50, 0.0  ;;  %v4576_v26 = vld [vmem:[%s6134_s1 + $0x8] sm:$0xff]   ;;  %v4993_v5 = vpack.c.bf16 %v399_v4, %v398_v14  ;;  %v309_v31 = vmul.f32 %v4704_v8, %v260_v23  ;;  %v310_v1 = vmul.f32 %v4704_v8, %v261_v59  ;;  %v281_v36 = vld [vmem:[%s4692_s29 + $0x118] sm:$0xff] }
  0x3e   : > { %4102 = vmatmul.mubr.bf16.gmra.mxu1 %v598_v2  ;;  %4123 = vmatprep.subr.bf16.mxu1 %v4573_v22  ;;  %v526_v20 = vsel %vm482_vm0, %v521_v60, %v525_v21  ;;  %v529_v51 = vor.u32 %v4975_v41, %v525_v21  ;;  %v377_v18 = vadd.f32 %v4709_v9, %v328_v25  ;;  %v418_v4 = vmax.f32 %v376_v16, 0.0  ;;  %v4578_v60 = vld [vmem:[%s6134_s1] sm:$0xff]  }
  0x3f   : > { %4175 = vmatprep.subr.bf16.mxu0 %v4574_v34  ;;  %v5001_v2 = vpack.c.bf16 %v417_v62, %v416_v63  ;;  %4085 = vmatprep.mubr.bf16.mxu0 %v526_v20  ;;  %v5005_v14 = vshll.u32 %v4993_v5, 16  ;;  %v358_v23 = vadd.f32 %v4709_v9, %v309_v31  ;;  %v359_v59 = vadd.f32 %v4709_v9, %v310_v1  ;;  %v283_v20 = vld [vmem:[%s4692_s29 + $0x128] sm:$0xff] }
  0x40   : > { %v419_v21 = vmax.f32 %v377_v18, 0.0  ;;  %v5020_v16 = vshrl.u32 %v4993_v5, 16  ;;  %v329_v1 = vmul.f32 %v4704_v8, %v280_v29  ;;  %v330_v18 = vmul.f32 %v4704_v8, %v281_v36 }
  0x41   : > { %6231 = vst [vmem:[#allocation26_spill] sm:$0xff] %v5001_v2  ;;  %4124 = vmatpush3.bf16.msra.mxu1 %v4573_v22  ;;  %v5014_v63 = vshll.u32 %v5001_v2, 16  ;;  %v5017_v62 = vshrl.u32 %v5001_v2, 16  ;;  %4176 = vmatpush3.bf16.msra.mxu0 %v4574_v34  ;;  %v533_v22 = vrot.slane %v5005_v14, 1  ;;  %v400_v25 = vmax.f32 %v358_v23, 0.0 }
  0x42   : > { %4125 = vmatprep.subr.bf16.mxu1 %v4576_v26  ;;  %v401_v31 = vmax.f32 %v359_v59, 0.0  ;;  %4177 = vmatprep.subr.bf16.mxu0 %v4575_v11  ;;  %v5026_v50 = vpack.c.bf16 %v419_v21, %v418_v4  ;;  %v331_v34 = vmul.f32 %v4704_v8, %v282_v58  ;;  %v378_v29 = vadd.f32 %v4709_v9, %v329_v1 }
  0x43   : > { %6232 = vst [vmem:[#allocation27_spill] sm:$0xff] %v5014_v63  ;;  %6233 = vst [vmem:[#allocation28_spill] sm:$0xff] %v5017_v62  ;;  %v605_v35 = vrot.slane %v5014_v63, 1  ;;  %v534_v38 = vsel %vm482_vm0, %v529_v51, %v533_v22  ;;  %v537_v59 = vor.u32 %v5020_v16, %v533_v22  ;;  %v379_v21 = vadd.f32 %v4709_v9, %v330_v18  ;;  %v5047_v51 = vld [vmem:[%s6134_s1 + $0xf8] sm:$0xff]  }
  0x44   : > { %6234 = vst [vmem:[#allocation29_spill] sm:$0xff] %v5026_v50  ;;  %v5034_v23 = vpack.c.bf16 %v401_v31, %v400_v25  ;;  %4086 = vmatmul.mubr.bf16.gmra.mxu0 %v534_v38  ;;  %v5041_v58 = vshll.u32 %v5026_v50, 16  ;;  %v332_v31 = vmul.f32 %v4704_v8, %v283_v20  ;;  %v380_v1 = vadd.f32 %v4709_v9, %v331_v34  ;;  %v4580_v18 = vld [vmem:[%s6134_s1 + $0x138] sm:$0xff]  }
  0x45   : > { %4126 = vmatpush3.bf16.msra.mxu1 %v4576_v26  ;;  %v606_v4 = vsel %vm482_vm0, %v601_v10, %v605_v35  ;;  %v609_v36 = vor.u32 %v5017_v62, %v605_v35  ;;  %4178 = vmatpush3.bf16.msra.mxu0 %v4575_v11  ;;  %v420_v35 = vmax.f32 %v378_v29, 0.0  ;;  %v5056_v10 = vshrl.u32 %v5026_v50, 16 }
  0x46   : > { %6235 = vst [vmem:[#allocation30_spill] sm:$0xff] %v5041_v58  ;;  %4127 = vmatprep.subr.bf16.mxu1 %v4578_v60  ;;  %4105 = vmatprep.mubr.bf16.mxu1 %v606_v4  ;;  %v5050_v22 = vshll.u32 %v5034_v23, 16  ;;  %v5053_v38 = vshrl.u32 %v5034_v23, 16  ;;  %v613_v26 = vrot.slane %v5041_v58, 1  ;;  %v421_v25 = vmax.f32 %v379_v21, 0.0 }
  0x47   : > { %6236 = vst [vmem:[#allocation31_spill] sm:$0xff] %v5056_v10  ;;  %4179 = vmatprep.subr.bf16.mxu0 %v4577_v7  ;;  %v381_v63 = vadd.f32 %v4709_v9, %v332_v31  ;;  %v422_v34 = vmax.f32 %v380_v1, 0.0  ;;  %v6238_v21 = vrot.slane %v4780_v3, 1  ;;  %v6239_v58 = vrot.slane %v4774_v0, 1 }
  0x48   : > { %v541_v4 = vrot.slane %v5050_v22, 1  ;;  %v614_v11 = vsel %vm482_vm0, %v609_v36, %v613_v26  ;;  %v5066_v29 = vpack.c.bf16 %v421_v25, %v420_v35  ;;  %v617_v36 = vor.u32 %v5056_v10, %v613_v26 }
  0x49   : > { %4128 = vmatpush3.bf16.msra.mxu1 %v4578_v60  ;;  %4180 = vmatpush3.bf16.msra.mxu0 %v4577_v7  ;;  %v1138_v60 = vsel %vm1135_vm1, %v6239_v58, %v6238_v21  ;;  %v423_v35 = vmax.f32 %v381_v63, 0.0  ;;  %v1139_v58 = vrot.slane %v4809_v30, 1 }
  0x4a   : > { %6237 = vst [vmem:[#allocation32_spill] sm:$0xff] %v5066_v29  ;;  %4217 = vmatprep.subr.bf16.mxu1 %v5047_v51  ;;  %4106 = vmatmul.mubr.bf16.gmra.mxu1 %v614_v11  ;;  %v542_v8 = vsel %vm482_vm0, %v537_v59, %v541_v4  ;;  %v545_v20 = vor.u32 %v5053_v38, %v541_v4  ;;  %v5079_v9 = vshll.u32 %v5066_v29, 16  ;;  %v5082_v25 = vshrl.u32 %v5066_v29, 16 }
  0x4b   : > { %4089 = vmatprep.mubr.bf16.mxu0 %v542_v8  ;;  %4269 = vmatprep.subr.bf16.mxu0 %v4580_v18  ;;  %v6242_v59 = vrot.slane %v4751_v48, 1  ;;  %v5088_v1 = vpack.c.bf16 %v423_v35, %v422_v34  ;;  %v1141_v11 = vrot.slane %v4875_v33, 1  ;;  %v6246_v35 = vshrl.u32 %v4780_v3, 16 }
  0x4c   : > { %6240 = vst [vmem:[#allocation33_spill] sm:$0xff] %v5079_v9  ;;  %6241 = vst [vmem:[#allocation34_spill] sm:$0xff] %v5082_v25  ;;  %v621_v31 = vrot.slane %v5079_v9, 1 }
  0x4d   : > { %v550_v7 = vsel %vm482_vm0, %v545_v20, %v6242_v59  ;;  %6243 = vst [vmem:[#allocation35_spill] sm:$0xff] %v5088_v1  ;;  %v5094_v4 = vshll.u32 %v5088_v1, 16  ;;  %v6245_v20 = vmov %v6238_v21  ;;  %v4582_v21 = vld [vmem:[%s6134_s1 + $0x130] sm:$0xff]   ;;  %v5114_v59 = vrot.slane %v6246_v35, 1 }
  0x4e   : > { %4090 = vmatmul.mubr.bf16.gmra.mxu0 %v550_v7  ;;  %v622_v26 = vsel %vm482_vm0, %v617_v36, %v621_v31  ;;  %v625_v63 = vor.u32 %v5082_v25, %v621_v31  ;;  %v5101_v34 = vsel %vm1135_vm1, %v6245_v20, %v1139_v58  ;;  %v5108_v36 = vsel %vm1135_vm1, %v1139_v58, %v1141_v11  ;;  %v4584_v58 = vld [vmem:[%s6134_s1 + $0x128] sm:$0xff]  }
  0x4f   : > { %4181 = vmatprep.mubr.bf16.mxu0 %v1138_v60  ;;  %6244 = vst [vmem:[#allocation36_spill] sm:$0xff] %v5094_v4  ;;  %4109 = vmatprep.mubr.bf16.mxu1 %v622_v26  ;;  %v629_v8 = vrot.slane %v5094_v4, 1  ;;  %v6247_v7 = vshll.u32 %v4780_v3, 16  ;;  %v1143_v26 = vrot.slane %v4896_v52, 1  ;;  %v1149_v35 = vrot.slane %v5034_v23, 1 }
  0x50   : > { %v5189_v4 = vld [vmem:[%s6136_s3] ss:$0 sm:$0xff] }
  0x51   : > { %v630_v60 = vsel %vm482_vm0, %v625_v63, %v629_v8  ;;  %v5118_v31 = vrot.slane %v6247_v7, 2  ;;  %v1145_v63 = vrot.slane %v4960_v28, 1  ;;  %v5129_v8 = vsel %vm1135_vm1, %v1141_v11, %v1143_v26  ;;  %6249 = vst [vmem:[#allocation38_spill] sm:$0xff] %v5189_v4 }
  0x52   : > { %4110 = vmatmul.mubr.bf16.gmra.mxu1 %v630_v60  ;;  %v4586_v60 = vld [vmem:[%s6134_s1 + $0x120] sm:$0xff]   ;;  %v1147_v11 = vrot.slane %v4993_v5, 1 }
  0x53   : > { %4129 = vmatprep.mubr.bf16.mxu1 %v4774_v0  ;;  %v5136_v20 = vsel %vm1135_vm1, %v1143_v26, %v1145_v63  ;;  %v4585_v26 = vld [vmem:[%s6134_s1 + $0xe0] sm:$0xff]   ;;  %v4590_v0 = vld [vmem:[%s6134_s1 + $0x110] sm:$0xff]  }
  0x54   : > { %v5154_v7 = vsel %vm1135_vm1, %v1145_v63, %v1147_v11  ;;  %v1151_v63 = vrot.slane %v4738_v39, 1 }
  0x56   : > { %4182 = vmatmul.mubr.bf16.vlgmr.msra.gmra.mxu0 %v5101_v34  ;;  %v5194_v25 = vsel %vm1135_vm1, %v1149_v35, %v1151_v63 }
  0x57   : > { %4270 = vmatpush3.bf16.msra.mxu0 %v4580_v18  ;;  %4185 = vmatprep.mubr.bf16.mxu0 %v5108_v36  ;;  %v4581_v18 = vld [vmem:[%s6134_s1 + $0xf0] sm:$0xff]  }
  0x58   : > { %4271 = vmatprep.subr.bf16.mxu0 %v4582_v21 }
  0x5a   : > { %4130 = vmatmul.mubr.bf16.vlgmr.msra.gmra.mxu1 %v4780_v3  ;;  %v284_v3 = vld [vmem:[%s4692_s29 + $0x130] sm:$0xff] }
  0x5b   : > { %4272 = vmatpush3.bf16.msra.mxu0 %v4582_v21  ;;  %4218 = vmatpush3.bf16.msra.mxu1 %v5047_v51  ;;  %v4583_v21 = vld [vmem:[%s6134_s1 + $0xe8] sm:$0xff]   ;;  %v4588_v51 = vld [vmem:[%s6134_s1 + $0x118] sm:$0xff]  }
  0x5c   : > { %4273 = vmatprep.subr.bf16.mxu0 %v4584_v58  ;;  %4133 = vmatprep.mubr.bf16.mxu1 %v4809_v30  ;;  %v4587_v30 = vld [vmem:[%s6134_s1 + $0xd8] sm:$0xff]  }
  0x5d   : > { %4219 = vmatprep.subr.bf16.mxu1 %v4581_v18 }
  0x5e   : > { %4186 = vmatmul.mubr.bf16.gmra.mxu0 %v5129_v8 }
  0x5f   : > { %4189 = vmatprep.mubr.bf16.mxu0 %v5136_v20  ;;  %4274 = vmatpush3.bf16.msra.mxu0 %v4584_v58  ;;  %v5163_v58 = vsel %vm1135_vm1, %v1147_v11, %v1149_v35  ;;  %v5175_v11 = vld [vmem:[%s6135_s2] ss:$0 sm:$0xff] }
  0x60   : > { %4275 = vmatprep.subr.bf16.mxu0 %v4586_v60  ;;  %4220 = vmatpush3.bf16.msra.mxu1 %v4581_v18  ;;  %v285_v18 = vld [vmem:[%s4692_s29 + $0x138] sm:$0xff]  ;;  %6248 = vst [vmem:[#allocation37_spill] sm:$0xff] %v5175_v11  ;;  %v4594_v35 = vld [vmem:[%s6134_s1 + $0x100] sm:$0xff]  }
  0x61   : > { %4221 = vmatprep.subr.bf16.mxu1 %v4583_v21 }
  0x62   : > { %4134 = vmatmul.mubr.bf16.gmra.mxu1 %v4875_v33  ;;  %v1153_v33 = vrot.slane %v4742_v42, 1 }
  0x63   : > { %4276 = vmatpush3.bf16.msra.mxu0 %v4586_v60  ;;  %4137 = vmatprep.mubr.bf16.mxu1 %v4896_v52  ;;  %v333_v60 = vmul.f32 %v5175_v11, %v284_v3  ;;  %v4592_v52 = vld [vmem:[%s6134_s1 + $0x108] sm:$0xff]  }
  0x64   : > { %4277 = vmatprep.subr.bf16.mxu0 %v4588_v51  ;;  %4222 = vmatpush3.bf16.msra.mxu1 %v4583_v21  ;;  %v334_v21 = vmul.f32 %v5175_v11, %v285_v18  ;;  %v5197_v18 = vsel %vm1135_vm1, %v1151_v63, %v1153_v33  ;;  %v4589_v11 = vld [vmem:[%s6134_s1 + $0xd0] sm:$0xff]   ;;  %v1155_v63 = vrot.slane %v4744_v43, 1 }
  0x65   : > { %4223 = vmatprep.subr.bf16.mxu1 %v4585_v26  ;;  %v382_v3 = vadd.f32 %v5189_v4, %v333_v60  ;;  %v1171_v60 = vrot.slane %v5088_v1, 1 }
  0x66   : > { %4190 = vmatmul.mubr.bf16.gmra.mxu0 %v5154_v7  ;;  %v383_v9 = vadd.f32 %v5189_v4, %v334_v21  ;;  %v1165_v4 = vrot.slane %v5001_v2, 1 }
  0x67   : > { %4193 = vmatprep.mubr.bf16.mxu0 %v5163_v58  ;;  %4278 = vmatpush3.bf16.msra.mxu0 %v4588_v51  ;;  %v424_v51 = vmax.f32 %v382_v3, 0.0  ;;  %v5227_v3 = vsel %vm1135_vm1, %v1153_v33, %v1155_v63  ;;  %v1159_v33 = vrot.slane %v4858_v15, 1 }
  0x68   : > { %4279 = vmatprep.subr.bf16.mxu0 %v4590_v0  ;;  %4224 = vmatpush3.bf16.msra.mxu1 %v4585_v26  ;;  %v425_v10 = vmax.f32 %v383_v9, 0.0  ;;  %v1157_v9 = vrot.slane %v4839_v61, 1 }
  0x69   : > { %4225 = vmatprep.subr.bf16.mxu1 %v4587_v30 }
  0x6a   : > { %4138 = vmatmul.mubr.bf16.gmra.mxu1 %v4960_v28  ;;  %v5208_v26 = vpack.c.bf16 %v425_v10, %v424_v51  ;;  %v5221_v10 = vld [vmem:[%s6134_s1 + $0x1b8] sm:$0xff]   ;;  %v5230_v51 = vsel %vm1135_vm1, %v1155_v63, %v1157_v9  ;;  %v5248_v63 = vsel %vm1135_vm1, %v1157_v9, %v1159_v33 }
  0x6b   : > { %4280 = vmatpush3.bf16.msra.mxu0 %v4590_v0  ;;  %4141 = vmatprep.mubr.bf16.mxu1 %v4993_v5  ;;  %v4591_v0 = vld [vmem:[%s6134_s1 + $0xc8] sm:$0xff]  }
  0x6c   : > { %4281 = vmatprep.subr.bf16.mxu0 %v4592_v52  ;;  %6250 = vst [vmem:[#allocation39_spill] sm:$0xff] %v5208_v26  ;;  %4226 = vmatpush3.bf16.msra.mxu1 %v4587_v30  ;;  %v1470_v21 = vrot.slane %v5208_v26, 1 }
  0x6d   : > { %4227 = vmatprep.subr.bf16.mxu1 %v4589_v11 }
  0x6e   : > { %4194 = vmatmul.mubr.bf16.gmra.mxu0 %v5194_v25  ;;  %v5224_v30 = vsel %vm1135_vm1, %v1171_v60, %v1470_v21 }
  0x6f   : > { %4197 = vmatprep.mubr.bf16.mxu0 %v5197_v18  ;;  %4282 = vmatpush3.bf16.msra.mxu0 %v4592_v52  ;;  %v4593_v52 = vld [vmem:[%s6134_s1 + $0xc0] sm:$0xff]  }
  0x70   : > { %4283 = vmatprep.subr.bf16.mxu0 %v4594_v35  ;;  %4228 = vmatpush3.bf16.msra.mxu1 %v4589_v11  ;;  %v1161_v11 = vrot.slane %v4916_v19, 1 }
  0x71   : > { %4229 = vmatprep.subr.bf16.mxu1 %v4591_v0 }
  0x72   : > { %4142 = vmatmul.mubr.bf16.gmra.mxu1 %v5034_v23  ;;  %v5251_v21 = vsel %vm1135_vm1, %v1159_v33, %v1161_v11  ;;  %v1167_v33 = vrot.slane %v5026_v50, 1 }
  0x73   : > { %4284 = vmatpush3.bf16.msra.mxu0 %v4594_v35  ;;  %4145 = vmatprep.mubr.bf16.mxu1 %v4738_v39  ;;  %v5245_v35 = vld [vmem:[%s6134_s1 + $0x178] sm:$0xff]   ;;  %v1760_v39 = vrot.slane %v4886_v46, 2 }
  0x74   : > { %4373 = vmatprep.subr.bf16.mxu0 %v5221_v10  ;;  %4230 = vmatpush3.bf16.msra.mxu1 %v4591_v0  ;;  %v1163_v0 = vrot.slane %v4941_v56, 1 }
  0x75   : > { %4231 = vmatprep.subr.bf16.mxu1 %v4593_v52 }
  0x76   : > { %4198 = vmatmul.mubr.bf16.gmra.mxu0 %v5227_v3  ;;  %v5261_v9 = vsel %vm1135_vm1, %v1161_v11, %v1163_v0 }
  0x77   : > { %4201 = vmatprep.mubr.bf16.mxu0 %v5230_v51 }
  0x78   : > { %4232 = vmatpush3.bf16.msra.mxu1 %v4593_v52  ;;  %v5264_v52 = vsel %vm1135_vm1, %v1163_v0, %v1165_v4  ;;  %v1755_v0 = vrot.slane %v4833_v57, 1 }
  0x79   : > { %4321 = vmatprep.subr.bf16.mxu1 %v5245_v35 }
  0x7a   : > { %4146 = vmatmul.mubr.bf16.gmra.mxu1 %v4742_v42  ;;  %v5273_v42 = vsel %vm1135_vm1, %v1165_v4, %v1167_v33 }
  0x7b   : > { %4149 = vmatprep.mubr.bf16.mxu1 %v4744_v43  ;;  %v1169_v43 = vrot.slane %v5066_v29, 1 }
  0x7d   : > { %v5276_v11 = vsel %vm1135_vm1, %v1167_v33, %v1169_v43  ;;  %v5285_v4 = vsel %vm1135_vm1, %v1169_v43, %v1171_v60  ;;  %v1759_v33 = vrot.slane %v4889_v47, 1 }
  0x7e   : > { %4202 = vmatmul.mubr.bf16.gmra.mxu0 %v5248_v63 }
  0x7f   : > { %4205 = vmatprep.mubr.bf16.mxu0 %v5251_v21  ;;  %v1761_v43 = vor.u32 %v1760_v39, %v1759_v33  ;;  %v4597_v33 = vld [vmem:[%s6134_s1 + $0x170] sm:$0xff]  }
  0x82   : > { %4150 = vmatmul.mubr.bf16.gmra.mxu1 %v4839_v61  ;;  %v1756_v61 = vrot.slane %v4825_v45, 2  ;;  %v6251_v45 = vor.u32 %v5118_v31, %v5114_v59  ;;  %v1768_v59 = vrot.slane %v4972_v37, 2  ;;  %v4598_v31 = vld [vmem:[%s6134_s1 + $0x1b0] sm:$0xff]  }
  0x83   : > { %4153 = vmatprep.mubr.bf16.mxu1 %v4858_v15 }
  0x84   : > { %v1757_v15 = vor.u32 %v1756_v61, %v1755_v0  ;;  %v1767_v0 = vrot.slane %v4975_v41, 1 }
  0x86   : > { %4206 = vmatmul.mubr.bf16.gmra.mxu0 %v5261_v9  ;;  %v1758_v57 = vsel %vm1751_vm2, %v6251_v45, %v1757_v15  ;;  %v1762_v60 = vsel %vm1751_vm2, %v1757_v15, %v1761_v43  ;;  %v1769_v39 = vor.u32 %v1768_v59, %v1767_v0  ;;  %v4600_v15 = vld [vmem:[%s6134_s1 + $0x1a8] sm:$0xff]  }
  0x87   : > { %4209 = vmatprep.mubr.bf16.mxu0 %v5264_v52  ;;  %v4599_v59 = vld [vmem:[%s6134_s1 + $0x168] sm:$0xff]  }
  0x8a   : > { %4154 = vmatmul.mubr.bf16.gmra.mxu1 %v4916_v19  ;;  %v1763_v19 = vrot.slane %v4937_v44, 1 }
  0x8b   : > { %4157 = vmatprep.mubr.bf16.mxu1 %v4941_v56  ;;  %v1764_v56 = vrot.slane %v4908_v6, 2  ;;  %v1771_v6 = vrot.slane %v5020_v16, 1 }
  0x8d   : > { %v1765_v61 = vor.u32 %v1764_v56, %v1763_v19 }
  0x8e   : > { %4210 = vmatmul.mubr.bf16.gmra.mxu0 %v5273_v42 }
  0x8f   : > { %4213 = vmatprep.mubr.bf16.mxu0 %v5276_v11  ;;  %v1766_v45 = vsel %vm1751_vm2, %v1761_v43, %v1765_v61  ;;  %v1770_v56 = vsel %vm1751_vm2, %v1765_v61, %v1769_v39  ;;  %v1775_v43 = vrot.slane %v5053_v38, 1  ;;  %v4602_v61 = vld [vmem:[%s6134_s1 + $0x1a0] sm:$0xff]  }
  0x92   : > { %4158 = vmatmul.mubr.bf16.gmra.mxu1 %v5001_v2 }
  0x93   : > { %4161 = vmatprep.mubr.bf16.mxu1 %v5026_v50 }
  0x96   : > { %4214 = vmatmul.mubr.bf16.gmra.mxu0 %v5285_v4 }
  0x97   : > { %4285 = vmatprep.mubr.bf16.mxu0 %v1758_v57  ;;  %v1772_v57 = vrot.slane %v5005_v14, 2 }
  0x99   : > { %v1773_v19 = vor.u32 %v1772_v57, %v1771_v6 }
  0x9a   : > { %4162 = vmatmul.mubr.bf16.gmra.mxu1 %v5066_v29 }
  0x9b   : > { %4233 = vmatprep.mubr.bf16.mxu1 %v5101_v34  ;;  %v1776_v34 = vrot.slane %v5050_v22, 2  ;;  %v1774_v6 = vsel %vm1751_vm2, %v1769_v39, %v1773_v19  ;;  %v4601_v39 = vld [vmem:[%s6134_s1 + $0x160] sm:$0xff]  }
  0x9d   : > { %v1777_v0 = vor.u32 %v1776_v34, %v1775_v43  ;;  %v4603_v34 = vld [vmem:[%s6134_s1 + $0x158] sm:$0xff]  }
  0x9e   : > { %4286 = vmatmul.mubr.bf16.vlgmr.msra.gmra.mxu0 %v1762_v60  ;;  %v1780_v60 = vrot.slane %v4751_v48, 2 }
  0x9f   : > { %4374 = vmatpush3.bf16.msra.mxu0 %v5221_v10  ;;  %4289 = vmatprep.mubr.bf16.mxu0 %v1766_v45  ;;  %v1779_v10 = vrot.slane %v4754_v49, 1 }
  0xa0   : > { %4375 = vmatprep.subr.bf16.mxu0 %v4598_v31 }
  0xa1   : > { %v1781_v45 = vor.u32 %v1780_v60, %v1779_v10  ;;  %v1792_v60 = vrot.slane %v4852_v12, 2 }
  0xa2   : > { %4234 = vmatmul.mubr.bf16.vlgmr.msra.gmra.mxu1 %v5108_v36  ;;  %v4604_v36 = vld [vmem:[%s6134_s1 + $0x198] sm:$0xff]  }
  0xa3   : > { %4376 = vmatpush3.bf16.msra.mxu0 %v4598_v31  ;;  %4322 = vmatpush3.bf16.msra.mxu1 %v5245_v35  ;;  %v1778_v35 = vsel %vm1751_vm2, %v1773_v19, %v1777_v0  ;;  %v1784_v31 = vrot.slane %v4759_v53, 2  ;;  %v1782_v57 = vsel %vm1751_vm2, %v1777_v0, %v1781_v45  ;;  %v4606_v19 = vld [vmem:[%s6134_s1 + $0x190] sm:$0xff]   ;;  %v1796_v0 = vrot.slane %v4873_v32, 2 }
  0xa4   : > { %4377 = vmatprep.subr.bf16.mxu0 %v4600_v15  ;;  %4237 = vmatprep.mubr.bf16.mxu1 %v5129_v8  ;;  %v1783_v8 = vrot.slane %v4762_v54, 1 }
  0xa5   : > { %4323 = vmatprep.subr.bf16.mxu1 %v4597_v33 }
  0xa6   : > { %4290 = vmatmul.mubr.bf16.gmra.mxu0 %v1770_v56  ;;  %v1788_v56 = vrot.slane %v4765_v55, 2 }
  0xa7   : > { %4293 = vmatprep.mubr.bf16.mxu0 %v1774_v6  ;;  %4378 = vmatpush3.bf16.msra.mxu0 %v4600_v15  ;;  %v1787_v15 = vrot.slane %v4806_v27, 1  ;;  %v6293_v27 = vld [vmem:[#allocation10_spill] sm:$0xff] }
  0xa8   : > { %4379 = vmatprep.subr.bf16.mxu0 %v4602_v61  ;;  %4324 = vmatpush3.bf16.msra.mxu1 %v4597_v33  ;;  %v1785_v33 = vor.u32 %v1784_v31, %v1783_v8  ;;  %v4607_v8 = vld [vmem:[%s6134_s1 + $0x148] sm:$0xff]  }
  0xa9   : > { %4325 = vmatprep.subr.bf16.mxu1 %v4599_v59  ;;  %v1789_v43 = vor.u32 %v1788_v56, %v1787_v15  ;;  %v6252_v15 = vld [vmem:[#allocation25_spill] sm:$0xff] }
  0xaa   : > { %4238 = vmatmul.mubr.bf16.gmra.mxu1 %v5136_v20  ;;  %v4608_v20 = vld [vmem:[%s6134_s1 + $0x188] sm:$0xff]   ;;  %v1786_v10 = vsel %vm1751_vm2, %v1781_v45, %v1785_v33  ;;  %v4610_v45 = vld [vmem:[%s6134_s1 + $0x180] sm:$0xff]   ;;  %v1803_v56 = vrot.slane %v6252_v15, 1  ;;  %v4621_v15 = vld [vmem:[%s6134_s1 + $0x1d0] sm:$0xff]  }
  0xab   : > { %4380 = vmatpush3.bf16.msra.mxu0 %v4602_v61  ;;  %4241 = vmatprep.mubr.bf16.mxu1 %v5154_v7  ;;  %v1791_v7 = vrot.slane %v4855_v13, 1  ;;  %v1790_v6 = vsel %vm1751_vm2, %v1785_v33, %v1789_v43  ;;  %v1795_v61 = vrot.slane %v4878_v24, 1 }
  0xac   : > { %4381 = vmatprep.subr.bf16.mxu0 %v4604_v36  ;;  %4326 = vmatpush3.bf16.msra.mxu1 %v4599_v59  ;;  %v4605_v59 = vld [vmem:[%s6134_s1 + $0x150] sm:$0xff]  }
  0xad   : > { %4327 = vmatprep.subr.bf16.mxu1 %v4601_v39 }
  0xae   : > { %4294 = vmatmul.mubr.bf16.gmra.mxu0 %v1778_v35  ;;  %v1797_v35 = vor.u32 %v1796_v0, %v1795_v61 }
  0xaf   : > { %4297 = vmatprep.mubr.bf16.mxu0 %v1782_v57  ;;  %4382 = vmatpush3.bf16.msra.mxu0 %v4604_v36  ;;  %v1793_v36 = vor.u32 %v1792_v60, %v1791_v7  ;;  %v1800_v57 = vrot.slane %v4930_v40, 2  ;;  %v1807_v60 = vrot.slane %v5017_v62, 1 }
  0xb0   : > { %4383 = vmatprep.subr.bf16.mxu0 %v4606_v19  ;;  %4328 = vmatpush3.bf16.msra.mxu1 %v4601_v39 }
  0xb1   : > { %4329 = vmatprep.subr.bf16.mxu1 %v4603_v34  ;;  %v1794_v31 = vsel %vm1751_vm2, %v1789_v43, %v1793_v36  ;;  %v1798_v39 = vsel %vm1751_vm2, %v1793_v36, %v1797_v35 }
  0xb2   : > { %4242 = vmatmul.mubr.bf16.gmra.mxu1 %v5163_v58  ;;  %v5374_v58 = vld [vmem:[%s6134_s1 + $0x238] sm:$0xff]  }
  0xb3   : > { %4384 = vmatpush3.bf16.msra.mxu0 %v4606_v19  ;;  %4245 = vmatprep.mubr.bf16.mxu1 %v5194_v25  ;;  %v1799_v25 = vrot.slane %v4933_v17, 1  ;;  %v6253_v19 = vld [vmem:[#allocation24_spill] sm:$0xff] }
  0xb4   : > { %4385 = vmatprep.subr.bf16.mxu0 %v4608_v20  ;;  %4330 = vmatpush3.bf16.msra.mxu1 %v4603_v34  ;;  %v1804_v33 = vrot.slane %v6253_v19, 2  ;;  %v4609_v34 = vld [vmem:[%s6134_s1 + $0x140] sm:$0xff]   ;;  %v6277_v17 = vld [vmem:[#allocation20_spill] sm:$0xff] }
  0xb5   : > { %4331 = vmatprep.subr.bf16.mxu1 %v4605_v59  ;;  %v1801_v43 = vor.u32 %v1800_v57, %v1799_v25  ;;  %v6257_v25 = vld [vmem:[#allocation34_spill] sm:$0xff] }
  0xb6   : > { %4298 = vmatmul.mubr.bf16.gmra.mxu0 %v1786_v10  ;;  %v5391_v10 = vld [vmem:[%s6134_s1 + $0x1f8] sm:$0xff]   ;;  %v1815_v57 = vrot.slane %v6257_v25, 1 }
  0xb7   : > { %4301 = vmatprep.mubr.bf16.mxu0 %v1790_v6  ;;  %4386 = vmatpush3.bf16.msra.mxu0 %v4608_v20  ;;  %v1805_v20 = vor.u32 %v1804_v33, %v1803_v56  ;;  %v1802_v7 = vsel %vm1751_vm2, %v1797_v35, %v1801_v43 }
  0xb8   : > { %4387 = vmatprep.subr.bf16.mxu0 %v4610_v45  ;;  %4332 = vmatpush3.bf16.msra.mxu1 %v4605_v59  ;;  %v6256_v59 = vld [vmem:[#allocation30_spill] sm:$0xff] }
  0xb9   : > { %4333 = vmatprep.subr.bf16.mxu1 %v4607_v8  ;;  %v1806_v61 = vsel %vm1751_vm2, %v1801_v43, %v1805_v20 }
  0xba   : > { %4246 = vmatmul.mubr.bf16.gmra.mxu1 %v5197_v18  ;;  %v6254_v18 = vld [vmem:[#allocation27_spill] sm:$0xff] }
  0xbb   : > { %4388 = vmatpush3.bf16.msra.mxu0 %v4610_v45  ;;  %4249 = vmatprep.mubr.bf16.mxu1 %v5227_v3  ;;  %v1808_v6 = vrot.slane %v6254_v18, 2  ;;  %v6255_v3 = vld [vmem:[#allocation31_spill] sm:$0xff]  ;;  %v1812_v45 = vrot.slane %v6256_v59, 2 }
  0xbc   : > { %4477 = vmatprep.subr.bf16.mxu0 %v5374_v58  ;;  %4334 = vmatpush3.bf16.msra.mxu1 %v4607_v8  ;;  %v1811_v0 = vrot.slane %v6255_v3, 1  ;;  %v6188_v8 = vshrl.u32 %v5088_v1, 16  ;;  %v4619_v3 = vld [vmem:[%s6134_s1 + $0x1d8] sm:$0xff]  }
  0xbd   : > { %4335 = vmatprep.subr.bf16.mxu1 %v4609_v34  ;;  %v1809_v36 = vor.u32 %v1808_v6, %v1807_v60 }
  0xbe   : > { %4302 = vmatmul.mubr.bf16.gmra.mxu0 %v1794_v31  ;;  %v1813_v35 = vor.u32 %v1812_v45, %v1811_v0  ;;  %v6260_v45 = vld [vmem:[#allocation8_spill] sm:$0xff] }
  0xbf   : > { %4305 = vmatprep.mubr.bf16.mxu0 %v1798_v39  ;;  %v1810_v31 = vsel %vm1751_vm2, %v1805_v20, %v1809_v36  ;;  %v6258_v39 = vld [vmem:[#allocation33_spill] sm:$0xff]  ;;  %v6187_v20 = vshrl.u32 %v5208_v26, 16 }
  0xc0   : > { %4336 = vmatpush3.bf16.msra.mxu1 %v4609_v34  ;;  %v1816_v56 = vrot.slane %v6258_v39, 2  ;;  %v1814_v33 = vsel %vm1751_vm2, %v1809_v36, %v1813_v35  ;;  %v1821_v34 = vrot.slane %v6188_v8, 1  ;;  %v2132_v36 = vrot.slane %v6260_v45, 2  ;;  %v6270_v39 = vld [vmem:[#allocation4_spill] sm:$0xff] }
  0xc1   : > { %4425 = vmatprep.subr.bf16.mxu1 %v5391_v10  ;;  %v2148_v25 = vrot.slane %v6270_v39, 2 }
  0xc2   : > { %4250 = vmatmul.mubr.bf16.gmra.mxu1 %v5230_v51  ;;  %v6259_v51 = vld [vmem:[#allocation36_spill] sm:$0xff] }
  0xc3   : > { %4253 = vmatprep.mubr.bf16.mxu1 %v5248_v63  ;;  %v1822_v43 = vrot.slane %v6259_v51, 2  ;;  %v1817_v63 = vor.u32 %v1816_v56, %v1815_v57 }
  0xc5   : > { %v1823_v60 = vor.u32 %v1822_v43, %v1821_v34  ;;  %v1818_v6 = vsel %vm1751_vm2, %v1813_v35, %v1817_v63  ;;  %v2138_v43 = vrot.slane %v4960_v28, 2 }
  0xc6   : > { %4306 = vmatmul.mubr.bf16.gmra.mxu0 %v1802_v7  ;;  %v6186_v7 = vshll.u32 %v5208_v26, 16 }
  0xc7   : > { %4309 = vmatprep.mubr.bf16.mxu0 %v1806_v61  ;;  %v1828_v61 = vrot.slane %v6187_v20, 1 }
  0xc8   : > { %v1831_v0 = vrot.slane %v6186_v7, 2 }
  0xca   : > { %4254 = vmatmul.mubr.bf16.gmra.mxu1 %v5251_v21  ;;  %v1824_v21 = vsel %vm1751_vm2, %v1817_v63, %v1823_v60 }
  0xcb   : > { %4257 = vmatprep.mubr.bf16.mxu1 %v5261_v9  ;;  %v1832_v9 = vor.u32 %v1831_v0, %v1828_v61  ;;  %v4616_v61 = vld [vmem:[%s6134_s1 + $0x228] sm:$0xff]   ;;  %v2142_v0 = vrot.slane %v5034_v23, 2 }
  0xcd   : > { %v1833_v35 = vsel %vm1751_vm2, %v1823_v60, %v1832_v9 }
  0xce   : > { %4310 = vmatmul.mubr.bf16.gmra.mxu0 %v1810_v31  ;;  %v6261_v31 = vld [vmem:[#allocation16_spill] sm:$0xff] }
  0xcf   : > { %4313 = vmatprep.mubr.bf16.mxu0 %v1814_v33  ;;  %v2134_v57 = vrot.slane %v6261_v31, 2 }
  0xd1   : > { %v2135_v56 = vsel %vm2130_vm3, %v2132_v36, %v2134_v57 }
  0xd2   : > { %4258 = vmatmul.mubr.bf16.gmra.mxu1 %v5264_v52  ;;  %v6262_v52 = vld [vmem:[#allocation18_spill] sm:$0xff] }
  0xd3   : > { %4261 = vmatprep.mubr.bf16.mxu1 %v5273_v42  ;;  %v2136_v33 = vrot.slane %v6262_v52, 2  ;;  %v6263_v42 = vld [vmem:[#allocation6_spill] sm:$0xff] }
  0xd4   : > { %v2131_v34 = vrot.slane %v6263_v42, 2  ;;  %v6264_v42 = vld [vmem:[#allocation2_spill] sm:$0xff] }
  0xd5   : > { %v2137_v63 = vsel %vm2130_vm3, %v2134_v57, %v2136_v33  ;;  %v2139_v60 = vsel %vm2130_vm3, %v2136_v33, %v2138_v43  ;;  %v4618_v57 = vld [vmem:[%s6134_s1 + $0x220] sm:$0xff]  }
  0xd6   : > { %4314 = vmatmul.mubr.bf16.gmra.mxu0 %v1818_v6  ;;  %v2133_v6 = vsel %vm2130_vm3, %v2131_v34, %v2132_v36  ;;  %v2144_v34 = vrot.slane %v6264_v42, 2 }
  0xd7   : > { %4317 = vmatprep.mubr.bf16.mxu0 %v1824_v21 }
  0xd8   : > { %v2145_v7 = vsel %vm2130_vm3, %v2142_v0, %v2144_v34 }
  0xda   : > { %4262 = vmatmul.mubr.bf16.gmra.mxu1 %v5276_v11  ;;  %v4614_v11 = vld [vmem:[%s6134_s1 + $0x230] sm:$0xff]  }
  0xdb   : > { %4265 = vmatprep.mubr.bf16.mxu1 %v5285_v4  ;;  %v2140_v4 = vrot.slane %v4993_v5, 2 }
  0xdd   : > { %v2141_v21 = vsel %vm2130_vm3, %v2138_v43, %v2140_v4  ;;  %v2143_v36 = vsel %vm2130_vm3, %v2140_v4, %v2142_v0 }
  0xde   : > { %4318 = vmatmul.mubr.bf16.gmra.mxu0 %v1833_v35 }
  0xdf   : > { %4389 = vmatprep.mubr.bf16.mxu0 %v2135_v56 }
  0xe2   : > { %4266 = vmatmul.mubr.bf16.gmra.mxu1 %v5224_v30  ;;  %v4613_v30 = vld [vmem:[%s6134_s1 + $0x1f0] sm:$0xff]  }
  0xe3   : > { %4337 = vmatprep.mubr.bf16.mxu1 %v2133_v6 }
  0xe6   : > { %4390 = vmatmul.mubr.bf16.vlgmr.msra.gmra.mxu0 %v2137_v63 }
  0xe7   : > { %4478 = vmatpush3.bf16.msra.mxu0 %v5374_v58  ;;  %4393 = vmatprep.mubr.bf16.mxu0 %v2139_v60 }
  0xe8   : > { %4479 = vmatprep.subr.bf16.mxu0 %v4614_v11 }
  0xea   : > { %4338 = vmatmul.mubr.bf16.vlgmr.msra.gmra.mxu1 %v2135_v56  ;;  %v4615_v56 = vld [vmem:[%s6134_s1 + $0x1e8] sm:$0xff]  }
  0xeb   : > { %4480 = vmatpush3.bf16.msra.mxu0 %v4614_v11  ;;  %4426 = vmatpush3.bf16.msra.mxu1 %v5391_v10  ;;  %v6266_v11 = vld [vmem:[#allocation3_spill] sm:$0xff] }
  0xec   : > { %v5448_v9 = vpop.f32.mrf.mxu1  ;;  %v5450_v58 = vpop.f32.mrf.mxu0  ;;  %4481 = vmatprep.subr.bf16.mxu0 %v4616_v61  ;;  %4341 = vmatprep.mubr.bf16.mxu1 %v2137_v63  ;;  %v2146_v10 = vrot.slane %v6266_v11, 2  ;;  %v4620_v63 = vld [vmem:[%s6134_s1 + $0x218] sm:$0xff]  }
  0xed   : > { %4427 = vmatprep.subr.bf16.mxu1 %v4613_v30 }
  0xee   : > { %4394 = vmatmul.mubr.bf16.gmra.mxu0 %v2141_v21  ;;  %v5457_v35 = vpop.f32.mrf.mxu1  ;;  %v5459_v33 = vpop.f32.mrf.mxu0  ;;  %v2147_v51 = vsel %vm2130_vm3, %v2144_v34, %v2146_v10  ;;  %v2149_v62 = vsel %vm2130_vm3, %v2146_v10, %v2148_v25 }
  0xef   : > { %4397 = vmatprep.mubr.bf16.mxu0 %v2143_v36  ;;  %4482 = vmatpush3.bf16.msra.mxu0 %v4616_v61  ;;  %v4617_v61 = vld [vmem:[%s6134_s1 + $0x1e0] sm:$0xff]  }
  0xf0   : > { %v5465_v43 = vpop.f32.mrf.mxu1  ;;  %v5467_v6 = vpop.f32.mrf.mxu0  ;;  %4483 = vmatprep.subr.bf16.mxu0 %v4618_v57  ;;  %4428 = vmatpush3.bf16.msra.mxu1 %v4613_v30  ;;  %v4622_v30 = vld [vmem:[%s6134_s1 + $0x210] sm:$0xff]  }
  0xf1   : > { %6265 = vst [vmem:[#allocation8_spill] sm:$0xff] %v5465_v43  ;;  %4429 = vmatprep.subr.bf16.mxu1 %v4615_v56 }
  0xf2   : > { %v5473_v4 = vpop.f32.mrf.mxu1  ;;  %v5478_v8 = vpop.f32.mrf.mxu0  ;;  %4342 = vmatmul.mubr.bf16.gmra.mxu1 %v2139_v60 }
  0xf3   : > { %6267 = vst [vmem:[#allocation16_spill] sm:$0xff] %v5473_v4  ;;  %4484 = vmatpush3.bf16.msra.mxu0 %v4618_v57  ;;  %4345 = vmatprep.mubr.bf16.mxu1 %v2141_v21  ;;  %v6272_v57 = vld [vmem:[#allocation11_spill] sm:$0xff]  ;;  %v6286_v4 = vld [vmem:[#allocation38_spill] sm:$0xff] }
  0xf4   : > { %v5476_v20 = vpop.f32.mrf.mxu1  ;;  %4485 = vmatprep.subr.bf16.mxu0 %v4620_v63  ;;  %4430 = vmatpush3.bf16.msra.mxu1 %v4615_v56  ;;  %v2150_v60 = vrot.slane %v6272_v57, 2  ;;  %v4624_v21 = vld [vmem:[%s6134_s1 + $0x208] sm:$0xff]   ;;  %v2747_v57 = vrot.slane %v6293_v27, 2 }
  0xf5   : > { %6268 = vst [vmem:[#allocation18_spill] sm:$0xff] %v5476_v20  ;;  %4431 = vmatprep.subr.bf16.mxu1 %v4617_v61 }
  0xf6   : > { %4398 = vmatmul.mubr.bf16.gmra.mxu0 %v2145_v7  ;;  %v5487_v0 = vpop.f32.mrf.mxu1  ;;  %v2151_v19 = vsel %vm2130_vm3, %v2148_v25, %v2150_v60  ;;  %v6275_v25 = vld [vmem:[#allocation14_spill] sm:$0xff] }
  0xf7   : > { %6269 = vst [vmem:[#allocation6_spill] sm:$0xff] %v5487_v0  ;;  %4401 = vmatprep.mubr.bf16.mxu0 %v2147_v51  ;;  %v5492_v59 = vpop.f32.mrf.mxu0  ;;  %4486 = vmatpush3.bf16.msra.mxu0 %v4620_v63  ;;  %v4626_v63 = vld [vmem:[%s6134_s1 + $0x200] sm:$0xff]   ;;  %v287_v0 = vld [vmem:[%s4692_s29 + $0x148] sm:$0xff] }
  0xf8   : > { %v5490_v34 = vpop.f32.mrf.mxu1  ;;  %4487 = vmatprep.subr.bf16.mxu0 %v4622_v30  ;;  %4432 = vmatpush3.bf16.msra.mxu1 %v4617_v61  ;;  %v2152_v61 = vrot.slane %v6275_v25, 2 }
  0xf9   : > { %6271 = vst [vmem:[#allocation2_spill] sm:$0xff] %v5490_v34  ;;  %v5503_v18 = vpop.f32.mrf.mxu0  ;;  %4433 = vmatprep.subr.bf16.mxu1 %v4619_v3 }
  0xfa   : > { %v5501_v56 = vpop.f32.mrf.mxu1  ;;  %4346 = vmatmul.mubr.bf16.gmra.mxu1 %v2143_v36  ;;  %v4623_v36 = vld [vmem:[%s6134_s1 + $0x1c8] sm:$0xff]   ;;  %v2153_v32 = vsel %vm2130_vm3, %v2150_v60, %v2152_v61 }
  0xfb   : > { %6273 = vst [vmem:[#allocation3_spill] sm:$0xff] %v5501_v56  ;;  %4488 = vmatpush3.bf16.msra.mxu0 %v4622_v30  ;;  %4349 = vmatprep.mubr.bf16.mxu1 %v2145_v7  ;;  %v5515_v10 = vpop.f32.mrf.mxu0  ;;  %v2154_v30 = vrot.slane %v6277_v17, 2  ;;  %v6280_v60 = vld [vmem:[#allocation23_spill] sm:$0xff]  ;;  %v286_v17 = vld [vmem:[%s4692_s29 + $0x140] sm:$0xff] }
  0xfc   : > { %4489 = vmatprep.subr.bf16.mxu0 %v4624_v21  ;;  %4434 = vmatpush3.bf16.msra.mxu1 %v4619_v3 }
  0xfd   : > { %4435 = vmatprep.subr.bf16.mxu1 %v4621_v15  ;;  %v5524_v7 = vpop.f32.mrf.mxu0  ;;  %v2155_v3 = vsel %vm2130_vm3, %v2152_v61, %v2154_v30 }
  0xfe   : > { %4402 = vmatmul.mubr.bf16.gmra.mxu0 %v2149_v62  ;;  %v5513_v56 = vpop.f32.mrf.mxu1 }
  0xff   : > { %6274 = vst [vmem:[#allocation4_spill] sm:$0xff] %v5513_v56  ;;  %4405 = vmatprep.mubr.bf16.mxu0 %v2151_v19  ;;  %4490 = vmatpush3.bf16.msra.mxu0 %v4624_v21 }
 0x100   : > { %v5518_v40 = vpop.f32.mrf.mxu1  ;;  %4491 = vmatprep.subr.bf16.mxu0 %v4626_v63  ;;  %4436 = vmatpush3.bf16.msra.mxu1 %v4621_v15  ;;  %v2156_v15 = vrot.slane %v6280_v60, 2 }
 0x101   : > { %6276 = vst [vmem:[#allocation40_spill] sm:$0xff] %v5518_v40  ;;  %4437 = vmatprep.subr.bf16.mxu1 %v4623_v36  ;;  %v4625_v40 = vld [vmem:[%s6134_s1 + $0x1c0] sm:$0xff]  }
 0x102   : > { %v5526_v56 = vpop.f32.mrf.mxu1  ;;  %4350 = vmatmul.mubr.bf16.gmra.mxu1 %v2147_v51  ;;  %v2157_v51 = vsel %vm2130_vm3, %v2154_v30, %v2156_v15 }
 0x103   : > { %6278 = vst [vmem:[#allocation41_spill] sm:$0xff] %v5526_v56  ;;  %4492 = vmatpush3.bf16.msra.mxu0 %v4626_v63  ;;  %4353 = vmatprep.mubr.bf16.mxu1 %v2149_v62  ;;  %v2158_v56 = vrot.slane %v5001_v2, 2  ;;  %v6283_v2 = vld [vmem:[#allocation37_spill] sm:$0xff] }
 0x104   : > { %v5533_v21 = vpop.f32.mrf.mxu0  ;;  %v5535_v24 = vpop.f32.mrf.mxu1  ;;  %4438 = vmatpush3.bf16.msra.mxu1 %v4623_v36  ;;  %v335_v25 = vmul.f32 %v6283_v2, %v286_v17 }
 0x105   : > { %6279 = vst [vmem:[#allocation42_spill] sm:$0xff] %v5535_v24  ;;  %4439 = vmatprep.subr.bf16.mxu1 %v4625_v40  ;;  %v2159_v24 = vsel %vm2130_vm3, %v2156_v15, %v2158_v56  ;;  %v2162_v15 = vrot.slane %v5066_v29, 2 }
 0x106   : > { %4406 = vmatmul.mubr.bf16.gmra.mxu0 %v2153_v32  ;;  %v5538_v61 = vpop.f32.mrf.mxu0  ;;  %v384_v12 = vadd.f32 %v6286_v4, %v335_v25  ;;  %v2164_v25 = vrot.slane %v5088_v1, 2 }
 0x107   : > { %4409 = vmatprep.mubr.bf16.mxu0 %v2155_v3 }
 0x108   : > { %v5541_v34 = vpop.f32.mrf.mxu0  ;;  %4440 = vmatpush3.bf16.msra.mxu1 %v4625_v40  ;;  %v2160_v40 = vrot.slane %v5026_v50, 2  ;;  %v426_v29 = vmax.f32 %v384_v12, 0.0 }
 0x10a   : > { %v5543_v63 = vpop.f32.mrf.mxu1  ;;  %v5548_v62 = vpop.f32.mrf.mxu0  ;;  %4354 = vmatmul.mubr.bf16.gmra.mxu1 %v2151_v19  ;;  %v2161_v17 = vsel %vm2130_vm3, %v2158_v56, %v2160_v40  ;;  %v2166_v56 = vrot.slane %v5208_v26, 2 }
 0x10b   : > { %6281 = vst [vmem:[#allocation43_spill] sm:$0xff] %v5543_v63  ;;  %4357 = vmatprep.mubr.bf16.mxu1 %v2153_v32  ;;  %v336_v63 = vmul.f32 %v6283_v2, %v287_v0  ;;  %v2163_v0 = vsel %vm2130_vm3, %v2160_v40, %v2162_v15 }
 0x10c   : > { %v5551_v36 = vpop.f32.mrf.mxu1  ;;  %v2167_v12 = vsel %vm2130_vm3, %v2164_v25, %v2166_v56 }
 0x10d   : > { %6282 = vst [vmem:[#allocation44_spill] sm:$0xff] %v5551_v36  ;;  %v385_v32 = vadd.f32 %v6286_v4, %v336_v63 }
 0x10e   : > { %v5553_v60 = vpop.f32.mrf.mxu0  ;;  %4410 = vmatmul.mubr.bf16.gmra.mxu0 %v2157_v51  ;;  %v5557_v20 = vpop.f32.mrf.mxu1 }
 0x10f   : > { %6284 = vst [vmem:[#allocation37_spill] sm:$0xff] %v5557_v20  ;;  %4413 = vmatprep.mubr.bf16.mxu0 %v2159_v24 }
 0x110   : > { %v5560_v30 = vpop.f32.mrf.mxu0  ;;  %v5563_v19 = vpop.f32.mrf.mxu1 }
 0x111   : > { %6285 = vst [vmem:[#allocation45_spill] sm:$0xff] %v5563_v19  ;;  %v427_v19 = vmax.f32 %v385_v32, 0.0 }
 0x112   : > { %v5565_v36 = vpop.f32.mrf.mxu0  ;;  %v5573_v20 = vpop.f32.mrf.mxu1  ;;  %4358 = vmatmul.mubr.bf16.gmra.mxu1 %v2155_v3  ;;  %v2165_v3 = vsel %vm2130_vm3, %v2162_v15, %v2164_v25  ;;  %v3125_v15 = vrot.slane %v6261_v31, 3  ;;  %v2751_v31 = vrot.slane %v4886_v46, 3  ;;  %v3127_v46 = vrot.slane %v6262_v52, 3 }
 0x113   : > { %6287 = vst [vmem:[#allocation38_spill] sm:$0xff] %v5573_v20  ;;  %4361 = vmatprep.mubr.bf16.mxu1 %v2157_v51  ;;  %v5581_v40 = vpack.c.bf16 %v427_v19, %v426_v29 }
 0x114   : > { %v5570_v2 = vpop.f32.mrf.mxu0  ;;  %v5575_v13 = vpop.f32.mrf.mxu1 }
 0x115   : > { %6288 = vst [vmem:[#allocation46_spill] sm:$0xff] %v5575_v13  ;;  %6290 = vst [vmem:[#allocation48_spill] sm:$0xff] %v5581_v40  ;;  %v2465_v26 = vrot.slane %v5581_v40, 2 }
 0x116   : > { %v4183_v50 = vpop.f32.mrf.mxu0  ;;  %4414 = vmatmul.mubr.bf16.gmra.mxu0 %v2161_v17  ;;  %v5579_v63 = vpop.f32.mrf.mxu1 }
 0x117   : > { %4417 = vmatprep.mubr.bf16.mxu0 %v2163_v0  ;;  %6289 = vst [vmem:[#allocation47_spill] sm:$0xff] %v5579_v63 }
 0x118   : > { %v1273_v4 = vpop.f32.mrf.mxu0  ;;  %v5583_v20 = vpop.f32.mrf.mxu1 }
 0x119   : > { %6291 = vst [vmem:[#allocation49_spill] sm:$0xff] %v5583_v20  ;;  %v3124_v20 = vrot.slane %v6260_v45, 3  ;;  %v2750_v45 = vrot.slane %v4889_v47, 2 }
 0x11a   : > { %v4184_v43 = vpop.f32.mrf.mxu0  ;;  %v4131_v32 = vpop.f32.mrf.mxu1  ;;  %4362 = vmatmul.mubr.bf16.gmra.mxu1 %v2159_v24 }
 0x11b   : > { %v965_v13 = vadd.f32 %v4131_v32, %v5450_v58  ;;  %4365 = vmatprep.mubr.bf16.mxu1 %v2161_v17  ;;  %v2466_v17 = vsel %vm2130_vm3, %v2166_v56, %v2465_v26 }
 0x11c   : > { %v1276_v51 = vpop.f32.mrf.mxu0  ;;  %v956_v63 = vpop.f32.mrf.mxu1 }
 0x11d   : > { %v957_v29 = vadd.f32 %v956_v63, %v5459_v33  ;;  %v5592_v55 = vadd.f32 %v4183_v50, %v965_v13  ;;  %v6294_v33 = vld [vmem:[#allocation9_spill] sm:$0xff] }
 0x11e   : > { %v4187_v1 = vpop.f32.mrf.mxu0  ;;  %4418 = vmatmul.mubr.bf16.gmra.mxu0 %v2165_v3  ;;  %v4132_v25 = vpop.f32.mrf.mxu1  ;;  %v2748_v63 = vrot.slane %v6294_v33, 3  ;;  %v2758_v33 = vrot.slane %v4975_v41, 2 }
 0x11f   : > { %4421 = vmatprep.mubr.bf16.mxu0 %v2167_v12  ;;  %6292 = vst [vmem:[#allocation50_spill] sm:$0xff] %v5592_v55  ;;  %v968_v24 = vadd.f32 %v4132_v25, %v5467_v6  ;;  %v5596_v32 = vadd.f32 %v1273_v4, %v957_v29  ;;  %v3126_v55 = vsel %vm3123_vm4, %v3124_v20, %v3125_v15 }
 0x120   : > { %v1289_v19 = vpop.f32.mrf.mxu0  ;;  %v959_v40 = vpop.f32.mrf.mxu1  ;;  %v2749_v47 = vor.u32 %v2748_v63, %v2747_v57  ;;  %v3128_v57 = vsel %vm3123_vm4, %v3125_v15, %v3127_v46 }
 0x121   : > { %v960_v13 = vadd.f32 %v959_v40, %v5478_v8  ;;  %v5604_v6 = vadd.f32 %v4184_v43, %v968_v24  ;;  %v2752_v8 = vor.u32 %v2751_v31, %v2750_v45  ;;  %v3129_v43 = vrot.slane %v4960_v28, 3  ;;  %v6295_v24 = vld [vmem:[#allocation19_spill] sm:$0xff] }
 0x122   : > { %v4188_v58 = vpop.f32.mrf.mxu0  ;;  %v4135_v25 = vpop.f32.mrf.mxu1  ;;  %4366 = vmatmul.mubr.bf16.gmra.mxu1 %v2163_v0  ;;  %v2759_v28 = vrot.slane %v4972_v37, 3  ;;  %v3131_v37 = vrot.slane %v4993_v5, 3 }
 0x123   : > { %v981_v26 = vadd.f32 %v4135_v25, %v5492_v59  ;;  %4369 = vmatprep.mubr.bf16.mxu1 %v2165_v3  ;;  %v5607_v27 = vadd.f32 %v1276_v51, %v960_v13  ;;  %v2754_v51 = vrot.slane %v4937_v44, 2 }
 0x124   : > { %v1292_v50 = vpop.f32.mrf.mxu0  ;;  %v972_v56 = vpop.f32.mrf.mxu1 }
 0x125   : > { %v973_v40 = vadd.f32 %v972_v56, %v5503_v18  ;;  %v5612_v0 = vadd.f32 %v4187_v1, %v981_v26  ;;  %v2753_v18 = vsel %vm2746_vm5, %v2749_v47, %v2752_v8 }
 0x126   : > { %v4191_v4 = vpop.f32.mrf.mxu0  ;;  %4422 = vmatmul.mubr.bf16.gmra.mxu0 %v2466_v17  ;;  %v4136_v59 = vpop.f32.mrf.mxu1 }
 0x127   : > { %4493 = vmatprep.mubr.bf16.mxu0 %v3126_v55  ;;  %v984_v29 = vadd.f32 %v4136_v59, %v5515_v10  ;;  %v2755_v55 = vrot.slane %v6295_v24, 3  ;;  %v5617_v17 = vadd.f32 %v1289_v19, %v973_v40  ;;  %v3130_v10 = vsel %vm3123_vm4, %v3127_v46, %v3129_v43 }
 0x128   : > { %v1305_v20 = vpop.f32.mrf.mxu0  ;;  %v975_v52 = vpop.f32.mrf.mxu1  ;;  %v2763_v46 = vrot.slane %v5005_v14, 3 }
 0x129   : > { %v976_v1 = vadd.f32 %v975_v52, %v5524_v7  ;;  %v5625_v45 = vadd.f32 %v4188_v58, %v984_v29  ;;  %v2756_v15 = vor.u32 %v2755_v55, %v2754_v51  ;;  %v2760_v7 = vor.u32 %v2759_v28, %v2758_v33 }
 0x12a   : > { %v4192_v3 = vpop.f32.mrf.mxu0  ;;  %v4139_v44 = vpop.f32.mrf.mxu1  ;;  %4370 = vmatmul.mubr.bf16.gmra.mxu1 %v2167_v12  ;;  %v3133_v58 = vrot.slane %v5034_v23, 3  ;;  %v2766_v23 = vrot.slane %v5053_v38, 2 }
 0x12b   : > { %v997_v19 = vadd.f32 %v4139_v44, %v5533_v21  ;;  %4441 = vmatprep.mubr.bf16.mxu1 %v2753_v18  ;;  %v5628_v13 = vadd.f32 %v1292_v50, %v976_v1  ;;  %v2762_v21 = vrot.slane %v5020_v16, 2  ;;  %v2757_v47 = vsel %vm2746_vm5, %v2752_v8, %v2756_v15 }
 0x12c   : > { %v1308_v63 = vpop.f32.mrf.mxu0  ;;  %v988_v41 = vpop.f32.mrf.mxu1  ;;  %v2761_v29 = vsel %vm2746_vm5, %v2756_v15, %v2760_v7  ;;  %v3134_v14 = vsel %vm3123_vm4, %v3131_v37, %v3133_v58 }
 0x12d   : > { %v989_v25 = vadd.f32 %v988_v41, %v5538_v61  ;;  %v5633_v56 = vadd.f32 %v4191_v4, %v997_v19  ;;  %v3132_v61 = vsel %vm3123_vm4, %v3129_v43, %v3131_v37  ;;  %v2767_v4 = vrot.slane %v5050_v22, 3 }
 0x12e   : > { %v4195_v31 = vpop.f32.mrf.mxu0  ;;  %4494 = vmatmul.mubr.bf16.vlgmr.msra.gmra.mxu0 %v3128_v57  ;;  %v4140_v12 = vpop.f32.mrf.mxu1  ;;  %v3135_v22 = vrot.slane %v6264_v42, 3 }
 0x12f   : > { %4497 = vmatprep.mubr.bf16.mxu0 %v3130_v10  ;;  %v1000_v50 = vadd.f32 %v4140_v12, %v5541_v34  ;;  %v5639_v59 = vadd.f32 %v1305_v20, %v989_v25  ;;  %v2764_v20 = vor.u32 %v2763_v46, %v2762_v21  ;;  %v2771_v10 = vrot.slane %v4751_v48, 3  ;;  %v6296_v21 = vld [vmem:[#allocation11_spill] sm:$0xff] }
 0x130   : > { %v1321_v26 = vpop.f32.mrf.mxu0  ;;  %v991_v5 = vpop.f32.mrf.mxu1  ;;  %v3141_v46 = vrot.slane %v6296_v21, 3 }
 0x131   : > { %v992_v16 = vadd.f32 %v991_v5, %v5548_v62  ;;  %v5647_v34 = vadd.f32 %v4192_v3, %v1000_v50  ;;  %v2768_v62 = vor.u32 %v2767_v4, %v2766_v23  ;;  %v3137_v3 = vrot.slane %v6266_v11, 3  ;;  %v6298_v5 = vld [vmem:[#allocation5_spill] sm:$0xff] }
 0x132   : > { %v4196_v40 = vpop.f32.mrf.mxu0  ;;  %v4143_v8 = vpop.f32.mrf.mxu1  ;;  %4442 = vmatmul.mubr.bf16.vlgmr.msra.gmra.mxu1 %v2757_v47  ;;  %v2774_v11 = vrot.slane %v4762_v54, 2 }
 0x133   : > { %v1013_v24 = vadd.f32 %v4143_v8, %v5553_v60  ;;  %4445 = vmatprep.mubr.bf16.mxu1 %v2761_v29  ;;  %v5650_v43 = vadd.f32 %v1308_v63, %v992_v16  ;;  %v2765_v60 = vsel %vm2746_vm5, %v2760_v7, %v2764_v20  ;;  %v2770_v63 = vrot.slane %v4754_v49, 2  ;;  %v6299_v29 = vld [vmem:[#allocation8_spill] sm:$0xff]  ;;  %v6300_v8 = vld [vmem:[#allocation13_spill] sm:$0xff] }
 0x134   : > { %v1324_v51 = vpop.f32.mrf.mxu0  ;;  %v1004_v38 = vpop.f32.mrf.mxu1  ;;  %v2769_v19 = vsel %vm2746_vm5, %v2764_v20, %v2768_v62  ;;  %v2782_v20 = vrot.slane %v6300_v8, 2 }
 0x135   : > { %v1005_v52 = vadd.f32 %v1004_v38, %v5560_v30  ;;  %v5655_v18 = vadd.f32 %v4195_v31, %v1013_v24  ;;  %v3136_v30 = vsel %vm3123_vm4, %v3133_v58, %v3135_v22  ;;  %v2775_v31 = vrot.slane %v4759_v53, 3  ;;  %v6301_v24 = vld [vmem:[#allocation12_spill] sm:$0xff] }
 0x136   : > { %v4199_v55 = vpop.f32.mrf.mxu0  ;;  %4498 = vmatmul.mubr.bf16.gmra.mxu0 %v3132_v61  ;;  %v4144_v33 = vpop.f32.mrf.mxu1  ;;  %v2772_v25 = vor.u32 %v2771_v10, %v2770_v63  ;;  %v3139_v53 = vrot.slane %v6270_v39, 3  ;;  %v2779_v61 = vrot.slane %v6298_v5, 3  ;;  %v6302_v38 = vld [vmem:[#allocation16_spill] sm:$0xff] }
 0x137   : > { %4501 = vmatprep.mubr.bf16.mxu0 %v3134_v14  ;;  %v1016_v28 = vadd.f32 %v4144_v33, %v5565_v36  ;;  %v5661_v44 = vadd.f32 %v1321_v26, %v1005_v52  ;;  %v3138_v36 = vsel %vm3123_vm4, %v3135_v22, %v3137_v3 }
 0x138   : > { %v1337_v57 = vpop.f32.mrf.mxu0  ;;  %v1007_v42 = vpop.f32.mrf.mxu1  ;;  %v2773_v4 = vsel %vm2746_vm5, %v2768_v62, %v2772_v25  ;;  %v3142_v33 = vsel %vm3123_vm4, %v3139_v53, %v3141_v46 }
 0x139   : > { %v1008_v15 = vadd.f32 %v1007_v42, %v5570_v2  ;;  %v5669_v37 = vadd.f32 %v4196_v40, %v1016_v28  ;;  %v2776_v2 = vor.u32 %v2775_v31, %v2774_v11  ;;  %v6303_v28 = vld [vmem:[#allocation18_spill] sm:$0xff] }
 0x13a   : > { %v4200_v1 = vpop.f32.mrf.mxu0  ;;  %v4147_v49 = vpop.f32.mrf.mxu1  ;;  %4446 = vmatmul.mubr.bf16.gmra.mxu1 %v2765_v60  ;;  %v6305_v31 = vld [vmem:[#allocation6_spill] sm:$0xff] }
 0x13b   : > { %v1029_v48 = vadd.f32 %v4147_v49, %v5448_v9  ;;  %4449 = vmatprep.mubr.bf16.mxu1 %v2769_v19  ;;  %v5672_v26 = vadd.f32 %v1324_v51, %v1008_v15  ;;  %v6297_v9 = vld [vmem:[#allocation7_spill] sm:$0xff]  ;;  %v2777_v14 = vsel %vm2746_vm5, %v2772_v25, %v2776_v2 }
 0x13c   : > { %v1340_v41 = vpop.f32.mrf.mxu0  ;;  %v1020_v54 = vpop.f32.mrf.mxu1  ;;  %v2778_v40 = vrot.slane %v6297_v9, 2  ;;  %v6309_v9 = vld [vmem:[#allocation15_spill] sm:$0xff] }
 0x13d   : > { %v1021_v58 = vadd.f32 %v1020_v54, %v5457_v35  ;;  %v5677_v50 = vadd.f32 %v4199_v55, %v1029_v48  ;;  %v3140_v35 = vsel %vm3123_vm4, %v3137_v3, %v3139_v53  ;;  %v2783_v55 = vrot.slane %v6301_v24, 3  ;;  %v6307_v53 = vld [vmem:[#allocation2_spill] sm:$0xff] }
 0x13e   : > { %v4203_v7 = vpop.f32.mrf.mxu0  ;;  %4502 = vmatmul.mubr.bf16.gmra.mxu0 %v3136_v30  ;;  %v4148_v47 = vpop.f32.mrf.mxu1  ;;  %v6304_v30 = vld [vmem:[#allocation14_spill] sm:$0xff] }
 0x13f   : > { %4505 = vmatprep.mubr.bf16.mxu0 %v3138_v36  ;;  %v1032_v23 = vadd.f32 %v4148_v47, %v6299_v29  ;;  %v5683_v51 = vadd.f32 %v1337_v57, %v1021_v58  ;;  %v2780_v57 = vor.u32 %v2779_v61, %v2778_v40  ;;  %v3143_v19 = vrot.slane %v6304_v30, 3 }
 0x140   : > { %v1353_v12 = vpop.f32.mrf.mxu0  ;;  %v1023_v39 = vpop.f32.mrf.mxu1  ;;  %v2784_v11 = vor.u32 %v2783_v55, %v2782_v20  ;;  %v2787_v40 = vrot.slane %v6309_v9, 3 }
 0x141   : > { %v1024_v22 = vadd.f32 %v1023_v39, %v6302_v38  ;;  %v5691_v60 = vadd.f32 %v4200_v1, %v1032_v23  ;;  %v6306_v1 = vld [vmem:[#allocation20_spill] sm:$0xff]  ;;  %v2781_v54 = vsel %vm2746_vm5, %v2776_v2, %v2780_v57  ;;  %v3144_v29 = vsel %vm3123_vm4, %v3141_v46, %v3143_v19  ;;  %v6311_v39 = vld [vmem:[#allocation21_spill] sm:$0xff] }
 0x142   : > { %v4204_v16 = vpop.f32.mrf.mxu0  ;;  %v4151_v62 = vpop.f32.mrf.mxu1  ;;  %4450 = vmatmul.mubr.bf16.gmra.mxu1 %v2773_v4  ;;  %v3145_v49 = vrot.slane %v6306_v1, 3  ;;  %v2785_v23 = vsel %vm2746_vm5, %v2780_v57, %v2784_v11  ;;  %v6310_v4 = vld [vmem:[#allocation22_spill] sm:$0xff]  ;;  %v6314_v57 = vld [vmem:[#allocation23_spill] sm:$0xff] }
 0x143   : > { %v1045_v63 = vadd.f32 %v4151_v62, %v6303_v28  ;;  %4453 = vmatprep.mubr.bf16.mxu1 %v2777_v14  ;;  %v5694_v3 = vadd.f32 %v1340_v41, %v1024_v22  ;;  %v6308_v41 = vld [vmem:[#allocation17_spill] sm:$0xff]  ;;  %v6312_v14 = vld [vmem:[#allocation3_spill] sm:$0xff]  ;;  %v3147_v28 = vrot.slane %v6314_v57, 3 }
 0x144   : > { %v1356_v52 = vpop.f32.mrf.mxu0  ;;  %v1036_v42 = vpop.f32.mrf.mxu1  ;;  %v2786_v47 = vrot.slane %v6308_v41, 2  ;;  %v3146_v20 = vsel %vm3123_vm4, %v3143_v19, %v3145_v49  ;;  %v6319_v41 = vld [vmem:[#allocation41_spill] sm:$0xff] }
 0x145   : > { %v1037_v15 = vadd.f32 %v1036_v42, %v6305_v31  ;;  %v5699_v48 = vadd.f32 %v4203_v7, %v1045_v63  ;;  %v2790_v7 = vrot.slane %v6310_v4, 2  ;;  %v6315_v42 = vld [vmem:[#allocation40_spill] sm:$0xff]  ;;  %v6324_v57 = vld [vmem:[#allocation29_spill] sm:$0xff] }
 0x146   : > { %v4207_v10 = vpop.f32.mrf.mxu0  ;;  %4506 = vmatmul.mubr.bf16.gmra.mxu0 %v3140_v35  ;;  %v4152_v25 = vpop.f32.mrf.mxu1  ;;  %v2791_v35 = vrot.slane %v6311_v39, 3  ;;  %v2788_v46 = vor.u32 %v2787_v40, %v2786_v47  ;;  %v6320_v4 = vld [vmem:[#allocation28_spill] sm:$0xff] }
 0x147   : > { %4509 = vmatprep.mubr.bf16.mxu0 %v3142_v33  ;;  %v1048_v58 = vadd.f32 %v4152_v25, %v6307_v53  ;;  %v5705_v5 = vadd.f32 %v1353_v12, %v1037_v15  ;;  %v6313_v12 = vld [vmem:[#allocation4_spill] sm:$0xff]  ;;  %v6317_v25 = vld [vmem:[#allocation25_spill] sm:$0xff] }
 0x148   : > { %v1369_v36 = vpop.f32.mrf.mxu0  ;;  %v1039_v61 = vpop.f32.mrf.mxu1  ;;  %v2792_v63 = vor.u32 %v2791_v35, %v2790_v7  ;;  %v6318_v53 = vld [vmem:[#allocation24_spill] sm:$0xff]  ;;  %v2789_v47 = vsel %vm2746_vm5, %v2784_v11, %v2788_v46  ;;  %v6321_v7 = vld [vmem:[#allocation27_spill] sm:$0xff]  ;;  %v6322_v35 = vld [vmem:[#allocation42_spill] sm:$0xff] }
 0x149   : > { %v1040_v2 = vadd.f32 %v1039_v61, %v6312_v14  ;;  %v5713_v24 = vadd.f32 %v4204_v16, %v1048_v58  ;;  %v6316_v16 = vld [vmem:[#allocation26_spill] sm:$0xff]  ;;  %v2795_v58 = vrot.slane %v6318_v53, 3  ;;  %v2799_v39 = vrot.slane %v6321_v7, 3 }
 0x14a   : > { %v4208_v21 = vpop.f32.mrf.mxu0  ;;  %v4155_v55 = vpop.f32.mrf.mxu1  ;;  %4454 = vmatmul.mubr.bf16.gmra.mxu1 %v2781_v54  ;;  %v3149_v31 = vrot.slane %v6316_v16, 3  ;;  %v2794_v54 = vrot.slane %v6317_v25, 2  ;;  %v6325_v16 = vld [vmem:[#allocation44_spill] sm:$0xff] }
 0x14b   : > { %v1061_v38 = vadd.f32 %v4155_v55, %v6313_v12  ;;  %4457 = vmatprep.mubr.bf16.mxu1 %v2785_v23  ;;  %v5716_v33 = vadd.f32 %v1356_v52, %v1040_v2  ;;  %v2793_v23 = vsel %vm2746_vm5, %v2788_v46, %v2792_v63  ;;  %v6323_v12 = vld [vmem:[#allocation43_spill] sm:$0xff] }
 0x14c   : > { %v1372_v8 = vpop.f32.mrf.mxu0  ;;  %v1052_v62 = vpop.f32.mrf.mxu1 }
 0x14d   : > { %v1053_v30 = vadd.f32 %v1052_v62, %v6315_v42  ;;  %v5721_v15 = vadd.f32 %v4207_v10, %v1061_v38  ;;  %v2798_v10 = vrot.slane %v6320_v4, 2  ;;  %v3151_v42 = vrot.slane %v6324_v57, 3 }
 0x14e   : > { %v4211_v22 = vpop.f32.mrf.mxu0  ;;  %4510 = vmatmul.mubr.bf16.gmra.mxu0 %v3144_v29  ;;  %v4156_v1 = vpop.f32.mrf.mxu1  ;;  %v3148_v29 = vsel %vm3123_vm4, %v3145_v49, %v3147_v28 }
 0x14f   : > { %4513 = vmatprep.mubr.bf16.mxu0 %v3146_v20  ;;  %v1064_v52 = vadd.f32 %v4156_v1, %v6319_v41  ;;  %v5727_v40 = vadd.f32 %v1369_v36, %v1053_v30  ;;  %v3150_v20 = vsel %vm3123_vm4, %v3147_v28, %v3149_v31  ;;  %v2796_v36 = vor.u32 %v2795_v58, %v2794_v54  ;;  %v6327_v41 = vld [vmem:[#allocation37_spill] sm:$0xff] }
 0x150   : > { %v1385_v19 = vpop.f32.mrf.mxu0  ;;  %v1055_v61 = vpop.f32.mrf.mxu1  ;;  %v2800_v30 = vor.u32 %v2799_v39, %v2798_v10  ;;  %v3152_v7 = vsel %vm3123_vm4, %v3149_v31, %v3151_v42 }
 0x151   : > { %v1056_v14 = vadd.f32 %v1055_v61, %v6322_v35  ;;  %v5735_v55 = vadd.f32 %v4208_v21, %v1064_v52  ;;  %v6326_v21 = vld [vmem:[#allocation32_spill] sm:$0xff]  ;;  %v2797_v58 = vsel %vm2746_vm5, %v2792_v63, %v2796_v36  ;;  %v6330_v35 = vld [vmem:[#allocation34_spill] sm:$0xff] }
 0x152   : > { %v4212_v9 = vpop.f32.mrf.mxu0  ;;  %v4159_v11 = vpop.f32.mrf.mxu1  ;;  %4458 = vmatmul.mubr.bf16.gmra.mxu1 %v2789_v47  ;;  %v3153_v25 = vrot.slane %v6326_v21, 3  ;;  %v2801_v39 = vsel %vm2746_vm5, %v2796_v36, %v2800_v30 }
 0x153   : > { %v1077_v38 = vadd.f32 %v4159_v11, %v6323_v12  ;;  %4461 = vmatprep.mubr.bf16.mxu1 %v2793_v23  ;;  %v5738_v49 = vadd.f32 %v1372_v8, %v1056_v14  ;;  %v6328_v8 = vld [vmem:[#allocation31_spill] sm:$0xff]  ;;  %v6331_v14 = vld [vmem:[#allocation33_spill] sm:$0xff] }
 0x154   : > { %v1388_v2 = vpop.f32.mrf.mxu0  ;;  %v1068_v46 = vpop.f32.mrf.mxu1  ;;  %v2802_v61 = vrot.slane %v6328_v8, 2  ;;  %v6332_v11 = vld [vmem:[#allocation45_spill] sm:$0xff] }
 0x155   : > { %v1069_v1 = vadd.f32 %v1068_v46, %v6325_v16  ;;  %v5743_v53 = vadd.f32 %v4211_v22, %v1077_v38  ;;  %v2806_v22 = vrot.slane %v6330_v35, 2  ;;  %v3154_v38 = vsel %vm3123_vm4, %v3151_v42, %v3153_v25 }
 0x156   : > { %v4215_v62 = vpop.f32.mrf.mxu0  ;;  %4514 = vmatmul.mubr.bf16.gmra.mxu0 %v3148_v29  ;;  %v4160_v54 = vpop.f32.mrf.mxu1  ;;  %v6329_v29 = vld [vmem:[#allocation30_spill] sm:$0xff] }
 0x157   : > { %4517 = vmatprep.mubr.bf16.mxu0 %v3150_v20  ;;  %v1080_v52 = vadd.f32 %v4160_v54, %v6327_v41  ;;  %v2803_v23 = vrot.slane %v6329_v29, 3  ;;  %v5749_v4 = vadd.f32 %v1385_v19, %v1069_v1  ;;  %v2807_v20 = vrot.slane %v6331_v14, 3  ;;  %v6333_v19 = vld [vmem:[#allocation38_spill] sm:$0xff]  ;;  %v6334_v54 = vld [vmem:[#allocation35_spill] sm:$0xff] }
 0x158   : > { %v1401_v28 = vpop.f32.mrf.mxu0  ;;  %v1071_v10 = vpop.f32.mrf.mxu1  ;;  %v3155_v41 = vrot.slane %v6334_v54, 3  ;;  %v6335_v29 = vld [vmem:[#allocation46_spill] sm:$0xff]  ;;  %v6337_v14 = vshrl.u32 %v6334_v54, 16  ;;  %v6342_v54 = vld [vmem:[#allocation49_spill] sm:$0xff] }
 0x159   : > { %v1072_v63 = vadd.f32 %v1071_v10, %v6332_v11  ;;  %v5757_v46 = vadd.f32 %v4212_v9, %v1080_v52  ;;  %v2804_v31 = vor.u32 %v2803_v23, %v2802_v61  ;;  %v2808_v8 = vor.u32 %v2807_v20, %v2806_v22  ;;  %v6336_v9 = vld [vmem:[#allocation39_spill] sm:$0xff] }
 0x15a   : > { %v4216_v47 = vpop.f32.mrf.mxu0  ;;  %v4163_v57 = vpop.f32.mrf.mxu1  ;;  %4462 = vmatmul.mubr.bf16.gmra.mxu1 %v2797_v58  ;;  %v3157_v52 = vrot.slane %v6336_v9, 3  ;;  %v3156_v20 = vsel %vm3123_vm4, %v3153_v25, %v3155_v41 }
 0x15b   : > { %v1093_v16 = vadd.f32 %v4163_v57, %v6333_v19  ;;  %4465 = vmatprep.mubr.bf16.mxu1 %v2801_v39  ;;  %v5760_v36 = vadd.f32 %v1388_v2, %v1072_v63  ;;  %v6338_v39 = vld [vmem:[#allocation36_spill] sm:$0xff]  ;;  %v6339_v2 = vld [vmem:[#allocation47_spill] sm:$0xff]  ;;  %v2805_v11 = vsel %vm2746_vm5, %v2800_v30, %v2804_v31  ;;  %v2809_v57 = vsel %vm2746_vm5, %v2804_v31, %v2808_v8 }
 0x15c   : > { %v1404_v12 = vpop.f32.mrf.mxu0  ;;  %v1084_v21 = vpop.f32.mrf.mxu1  ;;  %v2811_v61 = vrot.slane %v6338_v39, 3  ;;  %v6343_v39 = vld [vmem:[#allocation50_spill] sm:$0xff]  ;;  %v6344_v31 = vld [vmem:[#allocation48_spill] sm:$0xff] }
 0x15d   : > { %v1085_v10 = vadd.f32 %v1084_v21, %v6335_v29  ;;  %v5765_v35 = vadd.f32 %v4215_v62, %v1093_v16  ;;  %v6340_v62 = vshrl.u32 %v6336_v9, 16  ;;  %v6341_v16 = vshll.u32 %v6336_v9, 16 }
 0x15e   : > { %v4287_v1 = vpop.f32.mrf.mxu0  ;;  %4518 = vmatmul.mubr.bf16.gmra.mxu0 %v3152_v7  ;;  %v4164_v58 = vpop.f32.mrf.mxu1  ;;  %v2810_v7 = vrot.slane %v6337_v14, 2  ;;  %v2822_v9 = vshll.u32 %v6344_v31, 16 }
 0x15f   : > { %4521 = vmatprep.mubr.bf16.mxu0 %v3154_v38  ;;  %v1096_v23 = vadd.f32 %v4164_v58, %v6339_v2  ;;  %v5772_v38 = vadd.f32 %v1401_v28, %v1085_v10  ;;  %v2814_v19 = vrot.slane %v6340_v62, 2  ;;  %v2815_v21 = vrot.slane %v6341_v16, 3 }
 0x160   : > { %v1934_v42 = vpop.f32.mrf.mxu0  ;;  %v1087_v22 = vpop.f32.mrf.mxu1  ;;  %v3158_v58 = vsel %vm3123_vm4, %v3155_v41, %v3157_v52  ;;  %v2812_v10 = vor.u32 %v2811_v61, %v2810_v7  ;;  %v2819_v62 = vshrl.u32 %v6344_v31, 16  ;;  %v3159_v41 = vrot.slane %v6344_v31, 3 }
 0x161   : > { %v1088_v29 = vadd.f32 %v1087_v22, %v6342_v54  ;;  %v5782_v30 = vadd.f32 %v4216_v47, %v1096_v23  ;;  %v2816_v47 = vor.u32 %v2815_v21, %v2814_v19 }
 0x162   : > { %v4288_v63 = vpop.f32.mrf.mxu0  ;;  %v4235_v28 = vpop.f32.mrf.mxu1  ;;  %4466 = vmatmul.mubr.bf16.gmra.mxu1 %v2805_v11 }
 0x163   : > { %v1700_v25 = vadd.f32 %v4235_v28, %v6343_v39  ;;  %4469 = vmatprep.mubr.bf16.mxu1 %v2809_v57  ;;  %v5787_v16 = vadd.f32 %v1404_v12, %v1088_v29  ;;  %v2821_v28 = vrot.slane %v2819_v62, 2  ;;  %v2824_v39 = vrot.slane %v2822_v9, 3 }
 0x164   : > { %v1937_v14 = vpop.f32.mrf.mxu0  ;;  %v1555_v22 = vpop.f32.mrf.mxu1  ;;  %v2817_v19 = vsel %vm2746_vm5, %v2812_v10, %v2816_v47 }
 0x165   : > { %v1698_v23 = vadd.f32 %v1555_v22, %v5596_v32  ;;  %v5791_v7 = vadd.f32 %v4287_v1, %v1700_v25  ;;  %v2825_v31 = vor.u32 %v2824_v39, %v2821_v28 }
 0x166   : > { %v4291_v2 = vpop.f32.mrf.mxu0  ;;  %4522 = vmatmul.mubr.bf16.gmra.mxu0 %v3156_v20  ;;  %v4236_v61 = vpop.f32.mrf.mxu1  ;;  %v2813_v20 = vsel %vm2746_vm5, %v2808_v8, %v2812_v10 }
 0x167   : > { %4525 = vmatprep.mubr.bf16.mxu0 %v3158_v58  ;;  %v1701_v57 = vadd.f32 %v4236_v61, %v5604_v6  ;;  %v5795_v12 = vadd.f32 %v1934_v42, %v1698_v23  ;;  %v3160_v58 = vsel %vm3123_vm4, %v3157_v52, %v3159_v41  ;;  %v2826_v22 = vsel %vm2746_vm5, %v2816_v47, %v2825_v31 }
 0x168   : > { %v1950_v11 = vpop.f32.mrf.mxu0  ;;  %v1558_v29 = vpop.f32.mrf.mxu1 }
 0x169   : > { %v1699_v32 = vadd.f32 %v1558_v29, %v5607_v27  ;;  %v5800_v1 = vadd.f32 %v4288_v63, %v1701_v57 }
 0x16a   : > { %v4292_v54 = vpop.f32.mrf.mxu0  ;;  %v4239_v25 = vpop.f32.mrf.mxu1  ;;  %4470 = vmatmul.mubr.bf16.gmra.mxu1 %v2813_v20 }
 0x16b   : > { %v1704_v8 = vadd.f32 %v4239_v25, %v5612_v0  ;;  %4473 = vmatprep.mubr.bf16.mxu1 %v2817_v19  ;;  %v5803_v42 = vadd.f32 %v1937_v14, %v1699_v32 }
 0x16c   : > { %v1953_v21 = vpop.f32.mrf.mxu0  ;;  %v1571_v62 = vpop.f32.mrf.mxu1 }
 0x16d   : > { %v1702_v52 = vadd.f32 %v1571_v62, %v5617_v17  ;;  %v5806_v10 = vadd.f32 %v4291_v2, %v1704_v8 }
 0x16e   : > { %v4295_v6 = vpop.f32.mrf.mxu0  ;;  %4526 = vmatmul.mubr.bf16.gmra.mxu0 %v3160_v58  ;;  %v4240_v27 = vpop.f32.mrf.mxu1 }
 0x16f   : > { %v1705_v63 = vadd.f32 %v4240_v27, %v5625_v45  ;;  %v5810_v23 = vadd.f32 %v1950_v11, %v1702_v52 }
 0x170   : > { %v1966_v9 = vpop.f32.mrf.mxu0  ;;  %v1574_v0 = vpop.f32.mrf.mxu1 }
 0x171   : > { %v1703_v61 = vadd.f32 %v1574_v0, %v5628_v13  ;;  %v5813_v14 = vadd.f32 %v4292_v54, %v1705_v63 }
 0x172   : > { %v4296_v41 = vpop.f32.mrf.mxu0  ;;  %v4243_v57 = vpop.f32.mrf.mxu1  ;;  %4474 = vmatmul.mubr.bf16.gmra.mxu1 %v2826_v22 }
 0x173   : > { %v1708_v17 = vadd.f32 %v4243_v57, %v5633_v56  ;;  %v5816_v28 = vadd.f32 %v1953_v21, %v1703_v61 }
 0x174   : > { %v1969_v20 = vpop.f32.mrf.mxu0  ;;  %v1587_v39 = vpop.f32.mrf.mxu1 }
 0x175   : > { %v1706_v45 = vadd.f32 %v1587_v39, %v5639_v59  ;;  %v5819_v29 = vadd.f32 %v4295_v6, %v1708_v17 }
 0x176   : > { %v4299_v2 = vpop.f32.mrf.mxu0  ;;  %v4244_v11 = vpop.f32.mrf.mxu1 }
 0x177   : > { %v1709_v58 = vadd.f32 %v4244_v11, %v5647_v34  ;;  %v5822_v19 = vadd.f32 %v1966_v9, %v1706_v45 }
 0x178   : > { %v1982_v47 = vpop.f32.mrf.mxu0  ;;  %v1590_v54 = vpop.f32.mrf.mxu1 }
 0x179   : > { %v1707_v32 = vadd.f32 %v1590_v54, %v5650_v43  ;;  %v5825_v56 = vadd.f32 %v4296_v41, %v1709_v58 }
 0x17a   : > { %v4300_v13 = vpop.f32.mrf.mxu0  ;;  %v4247_v21 = vpop.f32.mrf.mxu1 }
 0x17b   : > { %v1712_v8 = vadd.f32 %v4247_v21, %v5655_v18  ;;  %v5828_v59 = vadd.f32 %v1969_v20, %v1707_v32 }
 0x17c   : > { %v1985_v25 = vpop.f32.mrf.mxu0  ;;  %v1603_v6 = vpop.f32.mrf.mxu1 }
 0x17d   : > { %v1710_v62 = vadd.f32 %v1603_v6, %v5661_v44  ;;  %v5831_v34 = vadd.f32 %v4299_v2, %v1712_v8 }
 0x17e   : > { %v4303_v31 = vpop.f32.mrf.mxu0  ;;  %v4248_v9 = vpop.f32.mrf.mxu1 }
 0x17f   : > { %v1713_v27 = vadd.f32 %v4248_v9, %v5669_v37  ;;  %v5834_v43 = vadd.f32 %v1982_v47, %v1710_v62 }
 0x180   : > { %v1998_v52 = vpop.f32.mrf.mxu0  ;;  %v1606_v22 = vpop.f32.mrf.mxu1 }
 0x181   : > { %v1711_v41 = vadd.f32 %v1606_v22, %v5672_v26  ;;  %v5837_v18 = vadd.f32 %v4300_v13, %v1713_v27 }
 0x182   : > { %v4304_v63 = vpop.f32.mrf.mxu0  ;;  %v4251_v61 = vpop.f32.mrf.mxu1 }
 0x183   : > { %v1716_v20 = vadd.f32 %v4251_v61, %v5677_v50  ;;  %v5840_v44 = vadd.f32 %v1985_v25, %v1711_v41 }
 0x184   : > { %v2001_v0 = vpop.f32.mrf.mxu0  ;;  %v1619_v17 = vpop.f32.mrf.mxu1 }
 0x185   : > { %v1714_v2 = vadd.f32 %v1619_v17, %v5683_v51  ;;  %v5843_v37 = vadd.f32 %v4303_v31, %v1716_v20 }
 0x186   : > { %v4307_v57 = vpop.f32.mrf.mxu0  ;;  %v4252_v45 = vpop.f32.mrf.mxu1 }
 0x187   : > { %v1717_v47 = vadd.f32 %v4252_v45, %v5691_v60  ;;  %v5846_v26 = vadd.f32 %v1998_v52, %v1714_v2 }
 0x188   : > { %v2014_v39 = vpop.f32.mrf.mxu0  ;;  %v1622_v58 = vpop.f32.mrf.mxu1 }
 0x189   : > { %v1715_v13 = vadd.f32 %v1622_v58, %v5694_v3  ;;  %v5849_v50 = vadd.f32 %v4304_v63, %v1717_v47 }
 0x18a   : > { %v4308_v11 = vpop.f32.mrf.mxu0  ;;  %v4255_v32 = vpop.f32.mrf.mxu1 }
 0x18b   : > { %v1720_v25 = vadd.f32 %v4255_v32, %v5699_v48  ;;  %v5852_v51 = vadd.f32 %v2001_v0, %v1715_v13 }
 0x18c   : > { %v2017_v54 = vpop.f32.mrf.mxu0  ;;  %v1635_v8 = vpop.f32.mrf.mxu1 }
 0x18d   : > { %v1718_v31 = vadd.f32 %v1635_v8, %v5705_v5  ;;  %v5855_v60 = vadd.f32 %v4307_v57, %v1720_v25 }
 0x18e   : > { %v4311_v21 = vpop.f32.mrf.mxu0  ;;  %v4256_v62 = vpop.f32.mrf.mxu1 }
 0x18f   : > { %v1721_v52 = vadd.f32 %v4256_v62, %v5713_v24  ;;  %v5858_v3 = vadd.f32 %v2014_v39, %v1718_v31 }
 0x190   : > { %v2030_v6 = vpop.f32.mrf.mxu0  ;;  %v1638_v27 = vpop.f32.mrf.mxu1 }
 0x191   : > { %v1719_v63 = vadd.f32 %v1638_v27, %v5716_v33  ;;  %v5861_v48 = vadd.f32 %v4308_v11, %v1721_v52 }
 0x192   : > { %v4312_v9 = vpop.f32.mrf.mxu0  ;;  %v4259_v41 = vpop.f32.mrf.mxu1 }
 0x193   : > { %v1724_v0 = vadd.f32 %v4259_v41, %v5721_v15  ;;  %v5864_v5 = vadd.f32 %v2017_v54, %v1719_v63 }
 0x194   : > { %v2033_v22 = vpop.f32.mrf.mxu0  ;;  %v1651_v20 = vpop.f32.mrf.mxu1 }
 0x195   : > { %v1722_v57 = vadd.f32 %v1651_v20, %v5727_v40  ;;  %v5867_v24 = vadd.f32 %v4311_v21, %v1724_v0 }
 0x196   : > { %v4315_v61 = vpop.f32.mrf.mxu0  ;;  %v4260_v2 = vpop.f32.mrf.mxu1 }
 0x197   : > { %v1725_v39 = vadd.f32 %v4260_v2, %v5735_v55  ;;  %v5870_v33 = vadd.f32 %v2030_v6, %v1722_v57 }
 0x198   : > { %v2046_v17 = vpop.f32.mrf.mxu0  ;;  %v1654_v47 = vpop.f32.mrf.mxu1 }
 0x199   : > { %v1723_v11 = vadd.f32 %v1654_v47, %v5738_v49  ;;  %v5873_v15 = vadd.f32 %v4312_v9, %v1725_v39 }
 0x19a   : > { %v4316_v45 = vpop.f32.mrf.mxu0  ;;  %v4263_v13 = vpop.f32.mrf.mxu1 }
 0x19b   : > { %v1728_v54 = vadd.f32 %v4263_v13, %v5743_v53  ;;  %v5876_v40 = vadd.f32 %v2033_v22, %v1723_v11 }
 0x19c   : > { %v2049_v58 = vpop.f32.mrf.mxu0  ;;  %v1667_v25 = vpop.f32.mrf.mxu1 }
 0x19d   : > { %v1726_v21 = vadd.f32 %v1667_v25, %v5749_v4  ;;  %v5879_v55 = vadd.f32 %v4315_v61, %v1728_v54 }
 0x19e   : > { %v4319_v32 = vpop.f32.mrf.mxu0  ;;  %v4264_v31 = vpop.f32.mrf.mxu1 }
 0x19f   : > { %v1729_v6 = vadd.f32 %v4264_v31, %v5757_v46  ;;  %v5882_v49 = vadd.f32 %v2046_v17, %v1726_v21 }
 0x1a0   : > { %v2062_v8 = vpop.f32.mrf.mxu0  ;;  %v1670_v52 = vpop.f32.mrf.mxu1 }
 0x1a1   : > { %v1727_v9 = vadd.f32 %v1670_v52, %v5760_v36  ;;  %v5885_v53 = vadd.f32 %v4316_v45, %v1729_v6 }
 0x1a2   : > { %v4320_v62 = vpop.f32.mrf.mxu0  ;;  %v4267_v63 = vpop.f32.mrf.mxu1 }
 0x1a3   : > { %v1732_v22 = vadd.f32 %v4267_v63, %v5765_v35  ;;  %v5888_v4 = vadd.f32 %v2049_v58, %v1727_v9 }
 0x1a4   : > { %v2065_v27 = vpop.f32.mrf.mxu0  ;;  %v1683_v0 = vpop.f32.mrf.mxu1 }
 0x1a5   : > { %v1730_v61 = vadd.f32 %v1683_v0, %v5772_v38  ;;  %v5891_v46 = vadd.f32 %v4319_v32, %v1732_v22 }
 0x1a6   : > { %v4391_v41 = vpop.f32.mrf.mxu0  ;;  %v4268_v57 = vpop.f32.mrf.mxu1 }
 0x1a7   : > { %v1733_v17 = vadd.f32 %v4268_v57, %v5782_v30  ;;  %v5894_v36 = vadd.f32 %v2062_v8, %v1730_v61 }
 0x1a8   : > { %v2550_v20 = vpop.f32.mrf.mxu0  ;;  %v1686_v39 = vpop.f32.mrf.mxu1 }
 0x1a9   : > { %v1731_v45 = vadd.f32 %v1686_v39, %v5787_v16  ;;  %v5897_v35 = vadd.f32 %v4320_v62, %v1733_v17 }
 0x1aa   : > { %v4392_v2 = vpop.f32.mrf.mxu0  ;;  %v4339_v11 = vpop.f32.mrf.mxu1 }
 0x1ab   : > { %v2413_v58 = vadd.f32 %v4339_v11, %v5791_v7  ;;  %v5900_v38 = vadd.f32 %v2065_v27, %v1731_v45 }
 0x1ac   : > { %v2553_v47 = vpop.f32.mrf.mxu0  ;;  %v2268_v54 = vpop.f32.mrf.mxu1 }
 0x1ad   : > { %v2411_v32 = vadd.f32 %v2268_v54, %v5795_v12  ;;  %v5903_v30 = vadd.f32 %v4391_v41, %v2413_v58 }
 0x1ae   : > { %v4395_v13 = vpop.f32.mrf.mxu0  ;;  %v4340_v21 = vpop.f32.mrf.mxu1 }
 0x1af   : > { %v2414_v8 = vadd.f32 %v4340_v21, %v5800_v1  ;;  %v5906_v16 = vadd.f32 %v2550_v20, %v2411_v32 }
 0x1b0   : > { %v2566_v25 = vpop.f32.mrf.mxu0  ;;  %v2271_v6 = vpop.f32.mrf.mxu1 }
 0x1b1   : > { %v2412_v62 = vadd.f32 %v2271_v6, %v5803_v42  ;;  %v5909_v7 = vadd.f32 %v4392_v2, %v2414_v8 }
 0x1b2   : > { %v4396_v31 = vpop.f32.mrf.mxu0  ;;  %v4343_v9 = vpop.f32.mrf.mxu1 }
 0x1b3   : > { %v2417_v27 = vadd.f32 %v4343_v9, %v5806_v10  ;;  %v5912_v12 = vadd.f32 %v2553_v47, %v2412_v62 }
 0x1b4   : > { %v2569_v52 = vpop.f32.mrf.mxu0  ;;  %v2284_v22 = vpop.f32.mrf.mxu1 }
 0x1b5   : > { %v2415_v41 = vadd.f32 %v2284_v22, %v5810_v23  ;;  %v5915_v1 = vadd.f32 %v4395_v13, %v2417_v27 }
 0x1b6   : > { %v4399_v63 = vpop.f32.mrf.mxu0  ;;  %v4344_v61 = vpop.f32.mrf.mxu1 }
 0x1b7   : > { %v2418_v20 = vadd.f32 %v4344_v61, %v5813_v14  ;;  %v5918_v42 = vadd.f32 %v2566_v25, %v2415_v41 }
 0x1b8   : > { %v2582_v0 = vpop.f32.mrf.mxu0  ;;  %v2287_v17 = vpop.f32.mrf.mxu1 }
 0x1b9   : > { %v2416_v2 = vadd.f32 %v2287_v17, %v5816_v28  ;;  %v5921_v10 = vadd.f32 %v4396_v31, %v2418_v20 }
 0x1ba   : > { %v4400_v57 = vpop.f32.mrf.mxu0  ;;  %v4347_v45 = vpop.f32.mrf.mxu1 }
 0x1bb   : > { %v2421_v47 = vadd.f32 %v4347_v45, %v5819_v29  ;;  %v5924_v23 = vadd.f32 %v2569_v52, %v2416_v2 }
 0x1bc   : > { %v2585_v39 = vpop.f32.mrf.mxu0  ;;  %v2300_v58 = vpop.f32.mrf.mxu1 }
 0x1bd   : > { %v2419_v13 = vadd.f32 %v2300_v58, %v5822_v19  ;;  %v5927_v14 = vadd.f32 %v4399_v63, %v2421_v47 }
 0x1be   : > { %v4403_v11 = vpop.f32.mrf.mxu0  ;;  %v4348_v32 = vpop.f32.mrf.mxu1 }
 0x1bf   : > { %v2422_v25 = vadd.f32 %v4348_v32, %v5825_v56  ;;  %v5930_v28 = vadd.f32 %v2582_v0, %v2419_v13 }
 0x1c0   : > { %v2598_v54 = vpop.f32.mrf.mxu0  ;;  %v2303_v8 = vpop.f32.mrf.mxu1 }
 0x1c1   : > { %v2420_v31 = vadd.f32 %v2303_v8, %v5828_v59  ;;  %v5933_v29 = vadd.f32 %v4400_v57, %v2422_v25 }
 0x1c2   : > { %v4404_v21 = vpop.f32.mrf.mxu0  ;;  %v4351_v62 = vpop.f32.mrf.mxu1 }
 0x1c3   : > { %v2425_v52 = vadd.f32 %v4351_v62, %v5831_v34  ;;  %v5936_v19 = vadd.f32 %v2585_v39, %v2420_v31 }
 0x1c4   : > { %v2601_v6 = vpop.f32.mrf.mxu0  ;;  %v2316_v27 = vpop.f32.mrf.mxu1 }
 0x1c5   : > { %v2423_v63 = vadd.f32 %v2316_v27, %v5834_v43  ;;  %v5939_v56 = vadd.f32 %v4403_v11, %v2425_v52 }
 0x1c6   : > { %v4407_v9 = vpop.f32.mrf.mxu0  ;;  %v4352_v41 = vpop.f32.mrf.mxu1 }
 0x1c7   : > { %v2426_v0 = vadd.f32 %v4352_v41, %v5837_v18  ;;  %v5942_v59 = vadd.f32 %v2598_v54, %v2423_v63 }
 0x1c8   : > { %v2614_v22 = vpop.f32.mrf.mxu0  ;;  %v2319_v20 = vpop.f32.mrf.mxu1 }
 0x1c9   : > { %v2424_v57 = vadd.f32 %v2319_v20, %v5840_v44  ;;  %v5945_v34 = vadd.f32 %v4404_v21, %v2426_v0 }
 0x1ca   : > { %v4408_v61 = vpop.f32.mrf.mxu0  ;;  %v4355_v2 = vpop.f32.mrf.mxu1 }
 0x1cb   : > { %v2429_v39 = vadd.f32 %v4355_v2, %v5843_v37  ;;  %v5948_v43 = vadd.f32 %v2601_v6, %v2424_v57 }
 0x1cc   : > { %v2617_v17 = vpop.f32.mrf.mxu0  ;;  %v2332_v47 = vpop.f32.mrf.mxu1 }
 0x1cd   : > { %v2427_v11 = vadd.f32 %v2332_v47, %v5846_v26  ;;  %v5951_v18 = vadd.f32 %v4407_v9, %v2429_v39 }
 0x1ce   : > { %v4411_v45 = vpop.f32.mrf.mxu0  ;;  %v4356_v13 = vpop.f32.mrf.mxu1 }
 0x1cf   : > { %v2430_v54 = vadd.f32 %v4356_v13, %v5849_v50  ;;  %v5954_v44 = vadd.f32 %v2614_v22, %v2427_v11 }
 0x1d0   : > { %v2630_v58 = vpop.f32.mrf.mxu0  ;;  %v2335_v25 = vpop.f32.mrf.mxu1 }
 0x1d1   : > { %v2428_v21 = vadd.f32 %v2335_v25, %v5852_v51  ;;  %v5957_v37 = vadd.f32 %v4408_v61, %v2430_v54 }
 0x1d2   : > { %v4412_v32 = vpop.f32.mrf.mxu0  ;;  %v4359_v31 = vpop.f32.mrf.mxu1 }
 0x1d3   : > { %v2433_v6 = vadd.f32 %v4359_v31, %v5855_v60  ;;  %v5960_v26 = vadd.f32 %v2617_v17, %v2428_v21 }
 0x1d4   : > { %v2633_v8 = vpop.f32.mrf.mxu0  ;;  %v2348_v52 = vpop.f32.mrf.mxu1 }
 0x1d5   : > { %v2431_v9 = vadd.f32 %v2348_v52, %v5858_v3  ;;  %v5963_v50 = vadd.f32 %v4411_v45, %v2433_v6 }
 0x1d6   : > { %v4415_v62 = vpop.f32.mrf.mxu0  ;;  %v4360_v63 = vpop.f32.mrf.mxu1 }
 0x1d7   : > { %v2434_v22 = vadd.f32 %v4360_v63, %v5861_v48  ;;  %v5966_v51 = vadd.f32 %v2630_v58, %v2431_v9 }
 0x1d8   : > { %v2646_v27 = vpop.f32.mrf.mxu0  ;;  %v2351_v0 = vpop.f32.mrf.mxu1 }
 0x1d9   : > { %v2432_v61 = vadd.f32 %v2351_v0, %v5864_v5  ;;  %v5969_v60 = vadd.f32 %v4412_v32, %v2434_v22 }
 0x1da   : > { %v4416_v41 = vpop.f32.mrf.mxu0  ;;  %v4363_v57 = vpop.f32.mrf.mxu1 }
 0x1db   : > { %v2437_v17 = vadd.f32 %v4363_v57, %v5867_v24  ;;  %v5972_v3 = vadd.f32 %v2633_v8, %v2432_v61 }
 0x1dc   : > { %v2649_v20 = vpop.f32.mrf.mxu0  ;;  %v2364_v39 = vpop.f32.mrf.mxu1 }
 0x1dd   : > { %v2435_v45 = vadd.f32 %v2364_v39, %v5870_v33  ;;  %v5975_v48 = vadd.f32 %v4415_v62, %v2437_v17 }
 0x1de   : > { %v4419_v2 = vpop.f32.mrf.mxu0  ;;  %v4364_v11 = vpop.f32.mrf.mxu1 }
 0x1df   : > { %v2438_v58 = vadd.f32 %v4364_v11, %v5873_v15  ;;  %v5978_v5 = vadd.f32 %v2646_v27, %v2435_v45 }
 0x1e0   : > { %v2662_v47 = vpop.f32.mrf.mxu0  ;;  %v2367_v54 = vpop.f32.mrf.mxu1 }
 0x1e1   : > { %v2436_v32 = vadd.f32 %v2367_v54, %v5876_v40  ;;  %v5981_v24 = vadd.f32 %v4416_v41, %v2438_v58 }
 0x1e2   : > { %v4420_v13 = vpop.f32.mrf.mxu0  ;;  %v4367_v21 = vpop.f32.mrf.mxu1 }
 0x1e3   : > { %v2441_v8 = vadd.f32 %v4367_v21, %v5879_v55  ;;  %v5984_v33 = vadd.f32 %v2649_v20, %v2436_v32 }
 0x1e4   : > { %v2665_v25 = vpop.f32.mrf.mxu0  ;;  %v2380_v6 = vpop.f32.mrf.mxu1 }
 0x1e5   : > { %v2439_v62 = vadd.f32 %v2380_v6, %v5882_v49  ;;  %v5987_v15 = vadd.f32 %v4419_v2, %v2441_v8 }
 0x1e6   : > { %v4423_v31 = vpop.f32.mrf.mxu0  ;;  %v4368_v9 = vpop.f32.mrf.mxu1 }
 0x1e7   : > { %v2442_v27 = vadd.f32 %v4368_v9, %v5885_v53  ;;  %v5990_v40 = vadd.f32 %v2662_v47, %v2439_v62  ;;  %v3440_v62 = vld [vmem:[%s6010_s30 + $0x13] sm:$0xff] }
 0x1e8   : > { %v2678_v52 = vpop.f32.mrf.mxu0  ;;  %v2383_v22 = vpop.f32.mrf.mxu1 }
 0x1e9   : > { %v2440_v41 = vadd.f32 %v2383_v22, %v5888_v4  ;;  %v5993_v55 = vadd.f32 %v4420_v13, %v2442_v27  ;;  %v3443_v22 = vld [vmem:[%s6010_s30 + $0x2b] sm:$0xff] }
 0x1ea   : > { %v4424_v63 = vpop.f32.mrf.mxu0  ;;  %v4371_v61 = vpop.f32.mrf.mxu1 }
 0x1eb   : > { %v2445_v20 = vadd.f32 %v4371_v61, %v5891_v46  ;;  %v5996_v57 = vadd.f32 %v2665_v25, %v2440_v41 }
 0x1ec   : > { %v2681_v0 = vpop.f32.mrf.mxu0  ;;  %v2396_v17 = vpop.f32.mrf.mxu1 }
 0x1ed   : > { %v2443_v53 = vadd.f32 %v2396_v17, %v5894_v36  ;;  %v5999_v39 = vadd.f32 %v4423_v31, %v2445_v20 }
 0x1ee   : > { %v4495_v49 = vpop.f32.mrf.mxu0  ;;  %v4372_v45 = vpop.f32.mrf.mxu1 }
 0x1ef   : > { %v2446_v4 = vadd.f32 %v4372_v45, %v5897_v35  ;;  %v6002_v11 = vadd.f32 %v2678_v52, %v2443_v53 }
 0x1f0   : > { %v3261_v2 = vpop.f32.mrf.mxu0  ;;  %v2399_v58 = vpop.f32.mrf.mxu1 }
 0x1f1   : > { %v2444_v13 = vadd.f32 %v2399_v58, %v5900_v38  ;;  %v6012_v36 = vadd.f32 %v4424_v63, %v2446_v4  ;;  %v3442_v38 = vld [vmem:[%s6010_s30 + $0x23] sm:$0xff] }
 0x1f2   : > { %v4496_v47 = vpop.f32.mrf.mxu0  ;;  %v4443_v54 = vpop.f32.mrf.mxu1  ;;  %v3446_v4 = vld [vmem:[%s6010_s30 + $0x43] sm:$0xff] }
 0x1f3   : > { %v3072_v35 = vadd.f32 %v4443_v54, %v5903_v30  ;;  %v6016_v25 = vadd.f32 %v2681_v0, %v2444_v13 }
 0x1f4   : > { %v3264_v46 = vpop.f32.mrf.mxu0  ;;  %v2927_v21 = vpop.f32.mrf.mxu1 }
 0x1f5   : > { %v3406_v8 = vadd.f32 %v4495_v49, %v3072_v35  ;;  %v3070_v31 = vadd.f32 %v2927_v21, %v5906_v16  ;;  %v3441_v49 = vld [vmem:[%s6010_s30 + $0x1b] sm:$0xff]  ;;  %v3444_v35 = vld [vmem:[%s6010_s30 + $0x33] sm:$0xff] }
 0x1f6   : > { %v4499_v32 = vpop.f32.mrf.mxu0  ;;  %v4444_v52 = vpop.f32.mrf.mxu1 }
 0x1f7   : > { %v3478_v30 = vadd.f32 %v3442_v38, %v3406_v8  ;;  %v3404_v9 = vadd.f32 %v3261_v2, %v3070_v31  ;;  %v3073_v27 = vadd.f32 %v4444_v52, %v5909_v7  ;;  %v3447_v31 = vld [vmem:[%s6010_s30 + $0x4b] sm:$0xff] }
 0x1f8   : > { %v3277_v6 = vpop.f32.mrf.mxu0  ;;  %v2930_v16 = vpop.f32.mrf.mxu1 }
 0x1f9   : > { %3514 = vst [vmem:[%s6023_s8 + $0x10] sm:$0xff] %v3478_v30  ;;  %v3476_v41 = vadd.f32 %v3440_v62, %v3404_v9  ;;  %v3407_v0 = vadd.f32 %v4496_v47, %v3073_v27  ;;  %v3071_v61 = vadd.f32 %v2930_v16, %v5912_v12  ;;  %v3445_v9 = vld [vmem:[%s6010_s30 + $0x3b] sm:$0xff] }
 0x1fa   : > { %v4500_v63 = vpop.f32.mrf.mxu0  ;;  %v4447_v17 = vpop.f32.mrf.mxu1 }
 0x1fb   : > { %3512 = vst [vmem:[%s6023_s8] sm:$0xff] %v3476_v41  ;;  %v3479_v53 = vadd.f32 %v3443_v22, %v3407_v0  ;;  %v3405_v2 = vadd.f32 %v3264_v46, %v3071_v61  ;;  %v3076_v7 = vadd.f32 %v4447_v17, %v5915_v1  ;;  %v3450_v41 = vld [vmem:[%s6010_s30 + $0x63] sm:$0xff]  ;;  %v3448_v17 = vld [vmem:[%s6010_s30 + $0x53] sm:$0xff] }
 0x1fc   : > { %v3280_v20 = vpop.f32.mrf.mxu0  ;;  %v2943_v58 = vpop.f32.mrf.mxu1 }
 0x1fd   : > { %3515 = vst [vmem:[%s6023_s8 + $0x18] sm:$0xff] %v3479_v53  ;;  %v3477_v13 = vadd.f32 %v3441_v49, %v3405_v2  ;;  %v3410_v47 = vadd.f32 %v4499_v32, %v3076_v7  ;;  %v3074_v12 = vadd.f32 %v2943_v58, %v5918_v42 }
 0x1fe   : > { %v4503_v45 = vpop.f32.mrf.mxu0  ;;  %v4448_v38 = vpop.f32.mrf.mxu1 }
 0x1ff   : > { %3513 = vst [vmem:[%s6023_s8 + $0x8] sm:$0xff] %v3477_v13  ;;  %v3482_v21 = vadd.f32 %v3446_v4, %v3410_v47  ;;  %v3408_v46 = vadd.f32 %v3277_v6, %v3074_v12  ;;  %v3077_v1 = vadd.f32 %v4448_v38, %v5921_v10  ;;  %v3451_v4 = vld [vmem:[%s6010_s30 + $0x6b] sm:$0xff]  ;;  %v3449_v12 = vld [vmem:[%s6010_s30 + $0x5b] sm:$0xff] }
 0x200   : > { %v3293_v54 = vpop.f32.mrf.mxu0  ;;  %v2946_v62 = vpop.f32.mrf.mxu1 }
 0x201   : > { %3518 = vst [vmem:[%s6023_s8 + $0x30] sm:$0xff] %v3482_v21  ;;  %v3480_v52 = vadd.f32 %v3444_v35, %v3408_v46  ;;  %v3411_v32 = vadd.f32 %v4500_v63, %v3077_v1  ;;  %v3075_v42 = vadd.f32 %v2946_v62, %v5924_v23  ;;  %v3454_v46 = vld [vmem:[%s6010_s30 + $0x83] sm:$0xff] }
 0x202   : > { %v4504_v8 = vpop.f32.mrf.mxu0  ;;  %v4451_v27 = vpop.f32.mrf.mxu1 }
 0x203   : > { %3516 = vst [vmem:[%s6023_s8 + $0x20] sm:$0xff] %v3480_v52  ;;  %v3483_v22 = vadd.f32 %v3447_v31, %v3411_v32  ;;  %v3409_v6 = vadd.f32 %v3280_v20, %v3075_v42  ;;  %v3080_v10 = vadd.f32 %v4451_v27, %v5927_v14  ;;  %v3452_v52 = vld [vmem:[%s6010_s30 + $0x73] sm:$0xff]  ;;  %v3455_v27 = vld [vmem:[%s6010_s30 + $0x8b] sm:$0xff] }
 0x204   : > { %v3296_v30 = vpop.f32.mrf.mxu0  ;;  %v2959_v0 = vpop.f32.mrf.mxu1 }
 0x205   : > { %3519 = vst [vmem:[%s6023_s8 + $0x38] sm:$0xff] %v3483_v22  ;;  %v3481_v61 = vadd.f32 %v3445_v9, %v3409_v6  ;;  %v3414_v63 = vadd.f32 %v4503_v45, %v3080_v10  ;;  %v3078_v23 = vadd.f32 %v2959_v0, %v5930_v28 }
 0x206   : > { %v4507_v16 = vpop.f32.mrf.mxu0  ;;  %v4452_v53 = vpop.f32.mrf.mxu1 }
 0x207   : > { %3517 = vst [vmem:[%s6023_s8 + $0x28] sm:$0xff] %v3481_v61  ;;  %v3486_v2 = vadd.f32 %v3450_v41, %v3414_v63  ;;  %v3412_v20 = vadd.f32 %v3293_v54, %v3078_v23  ;;  %v3081_v14 = vadd.f32 %v4452_v53, %v5933_v29  ;;  %v3453_v41 = vld [vmem:[%s6010_s30 + $0x7b] sm:$0xff] }
 0x208   : > { %v3309_v49 = vpop.f32.mrf.mxu0  ;;  %v2962_v58 = vpop.f32.mrf.mxu1 }
 0x209   : > { %3522 = vst [vmem:[%s6023_s8 + $0x50] sm:$0xff] %v3486_v2  ;;  %v3484_v13 = vadd.f32 %v3448_v17, %v3412_v20  ;;  %v3415_v45 = vadd.f32 %v4504_v8, %v3081_v14  ;;  %v3079_v28 = vadd.f32 %v2962_v58, %v5936_v19  ;;  %v3456_v14 = vld [vmem:[%s6010_s30 + $0x93] sm:$0xff] }
 0x20a   : > { %v4508_v7 = vpop.f32.mrf.mxu0  ;;  %v4455_v35 = vpop.f32.mrf.mxu1 }
 0x20b   : > { %3520 = vst [vmem:[%s6023_s8 + $0x40] sm:$0xff] %v3484_v13  ;;  %v3487_v38 = vadd.f32 %v3451_v4, %v3415_v45  ;;  %v3413_v54 = vadd.f32 %v3296_v30, %v3079_v28  ;;  %v3084_v29 = vadd.f32 %v4455_v35, %v5939_v56  ;;  %v3459_v45 = vld [vmem:[%s6010_s30 + $0xab] sm:$0xff] }
 0x20c   : > { %v3312_v47 = vpop.f32.mrf.mxu0  ;;  %v2975_v1 = vpop.f32.mrf.mxu1 }
 0x20d   : > { %3523 = vst [vmem:[%s6023_s8 + $0x58] sm:$0xff] %v3487_v38  ;;  %v3485_v31 = vadd.f32 %v3449_v12, %v3413_v54  ;;  %v3418_v8 = vadd.f32 %v4507_v16, %v3084_v29  ;;  %v3082_v19 = vadd.f32 %v2975_v1, %v5942_v59  ;;  %v3457_v38 = vld [vmem:[%s6010_s30 + $0x9b] sm:$0xff]  ;;  %v3462_v1 = vld [vmem:[%s6010_s30 + $0xc3] sm:$0xff] }
 0x20e   : > { %v4511_v21 = vpop.f32.mrf.mxu0  ;;  %v4456_v32 = vpop.f32.mrf.mxu1 }
 0x20f   : > { %3521 = vst [vmem:[%s6023_s8 + $0x48] sm:$0xff] %v3485_v31  ;;  %v3490_v42 = vadd.f32 %v3454_v46, %v3418_v8  ;;  %v3416_v30 = vadd.f32 %v3309_v49, %v3082_v19  ;;  %v3085_v56 = vadd.f32 %v4456_v32, %v5945_v34  ;;  %v3458_v49 = vld [vmem:[%s6010_s30 + $0xa3] sm:$0xff] }
 0x210   : > { %v3325_v62 = vpop.f32.mrf.mxu0  ;;  %v2978_v22 = vpop.f32.mrf.mxu1 }
 0x211   : > { %3526 = vst [vmem:[%s6023_s8 + $0x70] sm:$0xff] %v3490_v42  ;;  %v3488_v6 = vadd.f32 %v3452_v52, %v3416_v30  ;;  %v3419_v10 = vadd.f32 %v4508_v7, %v3085_v56  ;;  %v3083_v59 = vadd.f32 %v2978_v22, %v5948_v43  ;;  %v3460_v52 = vld [vmem:[%s6010_s30 + $0xb3] sm:$0xff] }
 0x212   : > { %v4512_v9 = vpop.f32.mrf.mxu0  ;;  %v4459_v0 = vpop.f32.mrf.mxu1 }
 0x213   : > { %3524 = vst [vmem:[%s6023_s8 + $0x60] sm:$0xff] %v3488_v6  ;;  %v3491_v61 = vadd.f32 %v3455_v27, %v3419_v10  ;;  %v3417_v63 = vadd.f32 %v3312_v47, %v3083_v59  ;;  %v3088_v34 = vadd.f32 %v4459_v0, %v5951_v18  ;;  %v3461_v59 = vld [vmem:[%s6010_s30 + $0xbb] sm:$0xff] }
 0x214   : > { %v3328_v16 = vpop.f32.mrf.mxu0  ;;  %v2991_v17 = vpop.f32.mrf.mxu1 }
 0x215   : > { %3527 = vst [vmem:[%s6023_s8 + $0x78] sm:$0xff] %v3491_v61  ;;  %v3489_v53 = vadd.f32 %v3453_v41, %v3417_v63  ;;  %v3422_v2 = vadd.f32 %v4511_v21, %v3088_v34  ;;  %v3086_v43 = vadd.f32 %v2991_v17, %v5954_v44  ;;  %v3466_v63 = vld [vmem:[%s6010_s30 + $0xe3] sm:$0xff] }
 0x216   : > { %v4515_v23 = vpop.f32.mrf.mxu0  ;;  %v4460_v7 = vpop.f32.mrf.mxu1 }
 0x217   : > { %3525 = vst [vmem:[%s6023_s8 + $0x68] sm:$0xff] %v3489_v53  ;;  %v3494_v4 = vadd.f32 %v3458_v49, %v3422_v2  ;;  %v3420_v58 = vadd.f32 %v3325_v62, %v3086_v43  ;;  %v3089_v18 = vadd.f32 %v4460_v7, %v5957_v37  ;;  %v3464_v53 = vld [vmem:[%s6010_s30 + $0xd3] sm:$0xff]  ;;  %v3467_v7 = vld [vmem:[%s6010_s30 + $0xeb] sm:$0xff] }
 0x218   : > { %v3341_v20 = vpop.f32.mrf.mxu0  ;;  %v2994_v28 = vpop.f32.mrf.mxu1 }
 0x219   : > { %3530 = vst [vmem:[%s6023_s8 + $0x90] sm:$0xff] %v3494_v4  ;;  %v3492_v47 = vadd.f32 %v3456_v14, %v3420_v58  ;;  %v3423_v12 = vadd.f32 %v4512_v9, %v3089_v18  ;;  %v3087_v44 = vadd.f32 %v2994_v28, %v5960_v26  ;;  %v3463_v9 = vld [vmem:[%s6010_s30 + $0xcb] sm:$0xff] }
 0x21a   : > { %v4516_v13 = vpop.f32.mrf.mxu0  ;;  %v4463_v54 = vpop.f32.mrf.mxu1 }
 0x21b   : > { %3528 = vst [vmem:[%s6023_s8 + $0x80] sm:$0xff] %v3492_v47  ;;  %v3495_v29 = vadd.f32 %v3459_v45, %v3423_v12  ;;  %v3421_v21 = vadd.f32 %v3328_v16, %v3087_v44  ;;  %v3092_v37 = vadd.f32 %v4463_v54, %v5963_v50  ;;  %v3470_v44 = vld [vmem:[%s6010_s30 + $0x103] sm:$0xff] }
 0x21c   : > { %v3344_v35 = vpop.f32.mrf.mxu0  ;;  %v3007_v31 = vpop.f32.mrf.mxu1 }
 0x21d   : > { %3531 = vst [vmem:[%s6023_s8 + $0x98] sm:$0xff] %v3495_v29  ;;  %v3493_v8 = vadd.f32 %v3457_v38, %v3421_v21  ;;  %v3426_v19 = vadd.f32 %v4515_v23, %v3092_v37  ;;  %v3090_v26 = vadd.f32 %v3007_v31, %v5966_v51 }
 0x21e   : > { %v4519_v46 = vpop.f32.mrf.mxu0  ;;  %v4464_v32 = vpop.f32.mrf.mxu1 }
 0x21f   : > { %3529 = vst [vmem:[%s6023_s8 + $0x88] sm:$0xff] %v3493_v8  ;;  %v3498_v42 = vadd.f32 %v3462_v1, %v3426_v19  ;;  %v3424_v30 = vadd.f32 %v3341_v20, %v3090_v26  ;;  %v3093_v50 = vadd.f32 %v4464_v32, %v5969_v60 }
 0x220   : > { %v3357_v62 = vpop.f32.mrf.mxu0  ;;  %v3010_v27 = vpop.f32.mrf.mxu1 }
 0x221   : > { %3534 = vst [vmem:[%s6023_s8 + $0xb0] sm:$0xff] %v3498_v42  ;;  %v3496_v22 = vadd.f32 %v3460_v52, %v3424_v30  ;;  %v3427_v6 = vadd.f32 %v4516_v13, %v3093_v50  ;;  %v3091_v51 = vadd.f32 %v3010_v27, %v5972_v3  ;;  %v3465_v13 = vld [vmem:[%s6010_s30 + $0xdb] sm:$0xff] }
 0x222   : > { %v4520_v56 = vpop.f32.mrf.mxu0  ;;  %v4467_v16 = vpop.f32.mrf.mxu1 }
 0x223   : > { %3532 = vst [vmem:[%s6023_s8 + $0xa0] sm:$0xff] %v3496_v22  ;;  %v3499_v41 = vadd.f32 %v3463_v9, %v3427_v6  ;;  %v3425_v0 = vadd.f32 %v3344_v35, %v3091_v51  ;;  %v3096_v60 = vadd.f32 %v4467_v16, %v5975_v48  ;;  %v3472_v6 = vld [vmem:[%s6010_s30 + $0x113] sm:$0xff]  ;;  %v3475_v16 = vld [vmem:[%s6010_s30 + $0x12b] sm:$0xff] }
 0x224   : > { %v3360_v10 = vpop.f32.mrf.mxu0  ;;  %v3023_v34 = vpop.f32.mrf.mxu1 }
 0x225   : > { %3535 = vst [vmem:[%s6023_s8 + $0xb8] sm:$0xff] %v3499_v41  ;;  %v3497_v23 = vadd.f32 %v3461_v59, %v3425_v0  ;;  %v3430_v49 = vadd.f32 %v4519_v46, %v3096_v60  ;;  %v3094_v3 = vadd.f32 %v3023_v34, %v5978_v5 }
 0x226   : > { %v4523_v61 = vpop.f32.mrf.mxu0  ;;  %v4468_v2 = vpop.f32.mrf.mxu1 }
 0x227   : > { %3533 = vst [vmem:[%s6023_s8 + $0xa8] sm:$0xff] %v3497_v23  ;;  %v3502_v43 = vadd.f32 %v3466_v63, %v3430_v49  ;;  %v3428_v20 = vadd.f32 %v3357_v62, %v3094_v3  ;;  %v3097_v48 = vadd.f32 %v4468_v2, %v5981_v24 }
 0x228   : > { %v3373_v17 = vpop.f32.mrf.mxu0  ;;  %v3026_v4 = vpop.f32.mrf.mxu1 }
 0x229   : > { %3538 = vst [vmem:[%s6023_s8 + $0xd0] sm:$0xff] %v3502_v43  ;;  %v3500_v58 = vadd.f32 %v3464_v53, %v3428_v20  ;;  %v3431_v18 = vadd.f32 %v4520_v56, %v3097_v48  ;;  %v3095_v5 = vadd.f32 %v3026_v4, %v5984_v33  ;;  %v3468_v33 = vld [vmem:[%s6010_s30 + $0xf3] sm:$0xff] }
 0x22a   : > { %v4524_v14 = vpop.f32.mrf.mxu0  ;;  %v4471_v45 = vpop.f32.mrf.mxu1 }
 0x22b   : > { %3536 = vst [vmem:[%s6023_s8 + $0xc0] sm:$0xff] %v3500_v58  ;;  %v3503_v47 = vadd.f32 %v3467_v7, %v3431_v18  ;;  %v3429_v12 = vadd.f32 %v3360_v10, %v3095_v5  ;;  %v3100_v24 = vadd.f32 %v4471_v45, %v5987_v15  ;;  %v3471_v15 = vld [vmem:[%s6010_s30 + $0x10b] sm:$0xff] }
 0x22c   : > { %v3376_v28 = vpop.f32.mrf.mxu0  ;;  %v3039_v35 = vpop.f32.mrf.mxu1 }
 0x22d   : > { %3539 = vst [vmem:[%s6023_s8 + $0xd8] sm:$0xff] %v3503_v47  ;;  %v3501_v38 = vadd.f32 %v3465_v13, %v3429_v12  ;;  %v3434_v54 = vadd.f32 %v4523_v61, %v3100_v24  ;;  %v3098_v29 = vadd.f32 %v3039_v35, %v5990_v40  ;;  %v3469_v40 = vld [vmem:[%s6010_s30 + $0xfb] sm:$0xff] }
 0x22e   : > { %v4472_v21 = vpop.f32.mrf.mxu1  ;;  %v4527_v37 = vpop.f32.mrf.mxu0 }
 0x22f   : > { %3537 = vst [vmem:[%s6023_s8 + $0xc8] sm:$0xff] %v3501_v38  ;;  %v3506_v46 = vadd.f32 %v3470_v44, %v3434_v54  ;;  %v3432_v1 = vadd.f32 %v3373_v17, %v3098_v29  ;;  %v3101_v31 = vadd.f32 %v4472_v21, %v5993_v55  ;;  %v3474_v55 = vld [vmem:[%s6010_s30 + $0x123] sm:$0xff] }
 0x230   : > { %v3042_v8 = vpop.f32.mrf.mxu1  ;;  %v3389_v52 = vpop.f32.mrf.mxu0 }
 0x231   : > { %3542 = vst [vmem:[%s6023_s8 + $0xf0] sm:$0xff] %v3506_v46  ;;  %v3504_v19 = vadd.f32 %v3468_v33, %v3432_v1  ;;  %v3435_v26 = vadd.f32 %v4524_v14, %v3101_v31  ;;  %v3099_v62 = vadd.f32 %v3042_v8, %v5996_v57 }
 0x232   : > { %v4475_v32 = vpop.f32.mrf.mxu1  ;;  %v4528_v57 = vpop.f32.mrf.mxu0 }
 0x233   : > { %3540 = vst [vmem:[%s6023_s8 + $0xe0] sm:$0xff] %v3504_v19  ;;  %v3507_v42 = vadd.f32 %v3471_v15, %v3435_v26  ;;  %v3433_v30 = vadd.f32 %v3376_v28, %v3099_v62  ;;  %v3104_v50 = vadd.f32 %v4475_v32, %v5999_v39 }
 0x234   : > { %v3055_v56 = vpop.f32.mrf.mxu1  ;;  %v3392_v63 = vpop.f32.mrf.mxu0 }
 0x235   : > { %3543 = vst [vmem:[%s6023_s8 + $0xf8] sm:$0xff] %v3507_v42  ;;  %v3505_v9 = vadd.f32 %v3469_v40, %v3433_v30  ;;  %v3438_v27 = vadd.f32 %v4527_v37, %v3104_v50  ;;  %v3102_v22 = vadd.f32 %v3055_v56, %v6002_v11  ;;  %v3473_v11 = vld [vmem:[%s6010_s30 + $0x11b] sm:$0xff] }
 0x236   : > { %v4476_v51 = vpop.f32.mrf.mxu1 }
 0x237   : > { %3541 = vst [vmem:[%s6023_s8 + $0xe8] sm:$0xff] %v3505_v9  ;;  %v3510_v10 = vadd.f32 %v3474_v55, %v3438_v27  ;;  %v3436_v59 = vadd.f32 %v3389_v52, %v3102_v22  ;;  %v3105_v39 = vadd.f32 %v4476_v51, %v6012_v36 }
 0x238   : > { %v3058_v41 = vpop.f32.mrf.mxu1 }
 0x239   : > { %3546 = vst [vmem:[%s6023_s8 + $0x110] sm:$0xff] %v3510_v10  ;;  %v3508_v0 = vadd.f32 %v3472_v6, %v3436_v59  ;;  %v3439_v60 = vadd.f32 %v4528_v57, %v3105_v39  ;;  %v3103_v61 = vadd.f32 %v3058_v41, %v6016_v25 }
 0x23b   : > { %3544 = vst [vmem:[%s6023_s8 + $0x100] sm:$0xff] %v3508_v0  ;;  %v3511_v34 = vadd.f32 %v3475_v16, %v3439_v60  ;;  %v3437_v23 = vadd.f32 %v3392_v63, %v3103_v61 }
 0x23d   : > { %3547 = vst [vmem:[%s6023_s8 + $0x118] sm:$0xff] %v3511_v34  ;;  %v3509_v49 = vadd.f32 %v3473_v11, %v3437_v23 }
 0x23f   : > { %3545 = vst [vmem:[%s6023_s8 + $0x108] sm:$0xff] %v3509_v49 }
 0x240 PF: > { %s15_s18 = sadd.s32 1, %s4635_s18  }
 0x241   : > { %p12_p4 = scmp.ge.s32.totalorder %s15_s18, 4  }
 0x243   :  { %14 = sbr.rel (!%p12_p4) target bundleno = 1 (0x1), region = 81 }

</bundles_post_ra>
